<compile_context>
chip_gen: v5e
topology: v5e:2x2
jax: 0.10.0
libtpu: 0.0.40
codegen_flags: <defaults>
</compile_context>

<pallas_src>
import functools

import jax
import jax.numpy as jnp
from jax.experimental import pallas as pl
from jax.experimental.pallas import tpu as pltpu


def _round_up(x, m):
    return (x + m - 1) // m * m


def _vmem_spec():
    return pl.BlockSpec(memory_space=pltpu.MemorySpace.VMEM)


# ----------------------------- fused kernel --------------------------------

def _decoder_step_kernel(num_layers, src_len, *refs):
    """Fused attention + context + GRU stack + output projection.

    Inputs (VMEM; lane dims padded to 128; matmul weights bf16, pre-transposed):
      emb   : (Bp, Ep)         bf16
      enc   : (Bp, Sp, Hp)     f32
      hid   : (L, Bp, Hp)      f32   (aliased with hout output)
      wah   : (Hp, Hp)         bf16  attention weight half hitting `hidden`
      wae   : (Hp, Hp)         bf16  attention weight half hitting `enc`
      ba    : (1, Hp)          f32
      vb    : (Hp, 128)        bf16  scoring vector broadcast across 128 lanes
      layer 0      : wih_e (Ep,3Hp), wih_w (Hp,3Hp), whh (Hp,3Hp), bih, bhh
      layers 1..L-1: wih (Hp,3Hp), whh (Hp,3Hp), bih, bhh
      wfc_x : (Hp, Vp) bf16, wfc_w : (Hp, Vp) bf16, bfc : (1, Vp) f32
    Outputs:
      pred  : (Bp, Vp) f32
      hout  : (L, Bp, Hp) f32
    """
    f32 = jnp.float32
    bf16 = jnp.bfloat16

    n_fixed = 7
    emb_ref, enc_ref, hid_ref, wah_ref, wae_ref, ba_ref, vb_ref = refs[:n_fixed]
    idx = n_fixed
    l0_refs = refs[idx:idx + 5]
    idx += 5
    layer_refs = []
    for _ in range(1, num_layers):
        layer_refs.append(refs[idx:idx + 4])
        idx += 4
    wfcx_ref, wfcw_ref, bfc_ref = refs[idx:idx + 3]
    idx += 3
    pred_ref, hout_ref = refs[idx:idx + 2]

    enc = enc_ref[...]                                      # (Bp, Sp, Hp) f32
    Bp, Sp, Hp = enc.shape

    # Read the whole hidden state up front (hid/hout may alias the same HBM
    # buffer via input_output_aliases — read before any write).
    hid = hid_ref[...]                                      # (L, Bp, Hp) f32
    hid_last = hid[num_layers - 1]                          # (Bp, Hp)

    # ---- Bahdanau attention: contractions on the MXU (bf16 in, f32 acc) ----
    e_h = jnp.dot(hid_last.astype(bf16), wah_ref[...],
                  preferred_element_type=f32)               # (Bp, Hp)
    enc2d = enc.reshape(Bp * Sp, Hp)
    e_e = jnp.dot(enc2d.astype(bf16), wae_ref[...],
                  preferred_element_type=f32)               # (Bp*Sp, Hp)
    energy = jnp.tanh(e_h[:, None, :] + e_e.reshape(Bp, Sp, Hp)
                      + ba_ref[...][None, :, :])            # (Bp, Sp, Hp)

    # Scores: vb is the scoring vector broadcast over a single 128-lane slab,
    # so every lane of `sc[b, s, :]` carries the same scalar score.
    sc = jnp.dot(energy.reshape(Bp * Sp, Hp).astype(bf16), vb_ref[...],
                 preferred_element_type=f32).reshape(Bp, Sp, 128)

    if Sp != src_len:
        # Mask padded source positions so they get zero attention weight.
        pos = jax.lax.broadcasted_iota(jnp.int32, sc.shape, 1)
        sc = jnp.where(pos < src_len, sc, -1e30)

    # Softmax over the source length S (exact divide for parity).
    m = jnp.max(sc, axis=1, keepdims=True)
    ex = jnp.exp(sc - m)
    denom = jnp.sum(ex, axis=1, keepdims=True)
    attn = ex / denom                                       # (Bp, Sp, 128)

    # context = sum_s alpha[b,s] * enc[b,s,:]  (lane-0 broadcast of the slab)
    weighted = jnp.sum(attn[:, :, 0:1] * enc, axis=1)       # (Bp, Hp) f32
    weighted_b = weighted.astype(bf16)

    def gru_cell(gi, gh, h_prev):
        # PyTorch gate order r, z, n; gate slices land on 128-lane boundaries.
        r = jax.nn.sigmoid(gi[:, :Hp] + gh[:, :Hp])
        z = jax.nn.sigmoid(gi[:, Hp:2 * Hp] + gh[:, Hp:2 * Hp])
        n = jnp.tanh(gi[:, 2 * Hp:] + r * gh[:, 2 * Hp:])
        return (1.0 - z) * n + z * h_prev

    # ---- GRU layer 0: split input weights (no concat of [emb, weighted]) ----
    wih_e_ref, wih_w_ref, whh0_ref, bih0_ref, bhh0_ref = l0_refs
    h_prev = hid[0]
    gi = (jnp.dot(emb_ref[...], wih_e_ref[...], preferred_element_type=f32)
          + jnp.dot(weighted_b, wih_w_ref[...], preferred_element_type=f32)
          + bih0_ref[...])
    gh = (jnp.dot(h_prev.astype(bf16), whh0_ref[...],
                  preferred_element_type=f32) + bhh0_ref[...])
    h_new = gru_cell(gi, gh, h_prev)
    hout_ref[0, :, :] = h_new
    x = h_new                  # inter-layer dropout is identity in eval mode

    # ---- GRU layers 1..L-1 (statically unrolled) ----
    for l in range(1, num_layers):
        wih_ref, whh_ref, bih_ref, bhh_ref = layer_refs[l - 1]
        h_prev = hid[l]
        gi = (jnp.dot(x.astype(bf16), wih_ref[...],
                      preferred_element_type=f32) + bih_ref[...])
        gh = (jnp.dot(h_prev.astype(bf16), whh_ref[...],
                      preferred_element_type=f32) + bhh_ref[...])
        h_new = gru_cell(gi, gh, h_prev)
        hout_ref[l, :, :] = h_new
        x = h_new

    # ---- fc_out: split weights (no concat of [output, weighted]) ----
    pred_ref[...] = (jnp.dot(x.astype(bf16), wfcx_ref[...],
                             preferred_element_type=f32)
                     + jnp.dot(weighted_b, wfcw_ref[...],
                               preferred_element_type=f32)
                     + bfc_ref[...])


# ----------------------------- weight packing -------------------------------

def pack_decoder_params(params, hidden_size, embed_size, output_size,
                        num_layers):
    """Pre-transpose + lane-pad all weights once; matmul weights -> bf16."""
    H, E, V = hidden_size, embed_size, output_size
    Hp, Ep, Vp = _round_up(H, 128), _round_up(E, 128), _round_up(V, 128)
    f32, bf16 = jnp.float32, jnp.bfloat16

    packed = {"embedding": params["embedding"].astype(f32)}

    aw = params["attn_w"]                               # (H, 2H)
    packed["wah"] = (jnp.zeros((Hp, Hp), f32)
                     .at[:H, :H].set(aw[:, :H].T)).astype(bf16)
    packed["wae"] = (jnp.zeros((Hp, Hp), f32)
                     .at[:H, :H].set(aw[:, H:].T)).astype(bf16)
    packed["ba"] = jnp.zeros((1, Hp), f32).at[0, :H].set(params["attn_b"])
    v = params["v_w"].reshape(H)
    packed["vb"] = (jnp.zeros((Hp, 128), f32)
                    .at[:H, :].set(jnp.broadcast_to(v[:, None], (H, 128)))
                    ).astype(bf16)

    packed["gru"] = []
    for l in range(num_layers):
        w_ih, w_hh = params["gru_w_ih"][l], params["gru_w_hh"][l]
        b_ih, b_hh = params["gru_b_ih"][l], params["gru_b_hh"][l]
        whh = jnp.zeros((Hp, 3 * Hp), f32)
        bih = jnp.zeros((1, 3 * Hp), f32)
        bhh = jnp.zeros((1, 3 * Hp), f32)
        if l == 0:
            wih_e = jnp.zeros((Ep, 3 * Hp), f32)        # hits `embedded`
            wih_w = jnp.zeros((Hp, 3 * Hp), f32)        # hits `weighted`
        else:
            wih = jnp.zeros((Hp, 3 * Hp), f32)
        for g in range(3):                              # gates r, z, n
            blk = w_ih[g * H:(g + 1) * H, :]            # (H, Din)
            if l == 0:                                  # Din = E + H
                wih_e = wih_e.at[:E, g * Hp:g * Hp + H].set(blk[:, :E].T)
                wih_w = wih_w.at[:H, g * Hp:g * Hp + H].set(blk[:, E:].T)
            else:                                       # Din = H
                wih = wih.at[:H, g * Hp:g * Hp + H].set(blk.T)
            whh = whh.at[:H, g * Hp:g * Hp + H].set(
                w_hh[g * H:(g + 1) * H, :].T)
            bih = bih.at[0, g * Hp:g * Hp + H].set(b_ih[g * H:(g + 1) * H])
            bhh = bhh.at[0, g * Hp:g * Hp + H].set(b_hh[g * H:(g + 1) * H])
        if l == 0:
            packed["gru"].append((wih_e.astype(bf16), wih_w.astype(bf16),
                                  whh.astype(bf16), bih, bhh))
        else:
            packed["gru"].append((wih.astype(bf16), whh.astype(bf16),
                                  bih, bhh))

    fw = params["fc_w"]                                 # (V, 2H)
    packed["wfc_x"] = (jnp.zeros((Hp, Vp), f32)
                       .at[:H, :V].set(fw[:, :H].T)).astype(bf16)   # `output`
    packed["wfc_w"] = (jnp.zeros((Hp, Vp), f32)
                       .at[:H, :V].set(fw[:, H:].T)).astype(bf16)   # `weighted`
    packed["bfc"] = jnp.zeros((1, Vp), f32).at[0, :V].set(params["fc_b"])
    return packed


# ----------------------------- forward --------------------------------------

@functools.partial(jax.jit, static_argnames=("num_layers", "output_size"))
def decoder_forward(packed, input_ids, hidden, encoder_outputs, *,
                    num_layers, output_size):
    """Replicates Decoder.forward (eval mode) with a single fused kernel."""
    B = input_ids.shape[0]
    L, _, H = hidden.shape
    S = encoder_outputs.shape[1]
    E = packed["embedding"].shape[1]
    V = output_size
    Hp, Ep, Vp = _round_up(H, 128), _round_up(E, 128), _round_up(V, 128)
    Bp = _round_up(B, 16)          # bf16 sublane tile
    Sp = _round_up(S, 8)           # keep reshapes / axis-1 reductions copy-free

    # embedded = dropout(embedding(input.unsqueeze(1)))  -> (B, E)
    emb = jnp.take(packed["embedding"], input_ids, axis=0)

    emb_p = jnp.zeros((Bp, Ep), jnp.bfloat16).at[:B, :E].set(
        emb.astype(jnp.bfloat16))
    enc_p = jnp.zeros((Bp, Sp, Hp), jnp.float32).at[:B, :S, :H].set(
        encoder_outputs)
    hid_p = jnp.zeros((L, Bp, Hp), jnp.float32).at[:, :B, :H].set(hidden)

    inputs = [emb_p, enc_p, hid_p, packed["wah"], packed["wae"],
              packed["ba"], packed["vb"]]
    for l in range(num_layers):
        inputs.extend(packed["gru"][l])
    inputs.extend([packed["wfc_x"], packed["wfc_w"], packed["bfc"]])

    pred_p, hid_out_p = pl.pallas_call(
        functools.partial(_decoder_step_kernel, num_layers, S),
        out_shape=(jax.ShapeDtypeStruct((Bp, Vp), jnp.float32),
                   jax.ShapeDtypeStruct((L, Bp, Hp), jnp.float32)),
        in_specs=[_vmem_spec()] * len(inputs),
        out_specs=(_vmem_spec(), _vmem_spec()),
        input_output_aliases={2: 1},       # hidden updated in place
        compiler_params=pltpu.CompilerParams(
            vmem_limit_bytes=32 * 1024 * 1024),
    )(*inputs)

    prediction = pred_p[:B, :V]
    hidden_out = hid_out_p[:, :B, :H]
    return prediction, hidden_out


# ----------------------------- param init ----------------------------------

def init_params(key, output_size, embed_size, hidden_size, num_layers):
    keys = jax.random.split(key, 8 + 4 * num_layers)
    s = 0.1
    params = {
        "embedding": s * jax.random.normal(keys[0],
                                           (output_size, embed_size),
                                           jnp.float32),
        "attn_w": s * jax.random.normal(keys[1],
                                        (hidden_size, 2 * hidden_size),
                                        jnp.float32),
        "attn_b": s * jax.random.normal(keys[2], (hidden_size,), jnp.float32),
        "v_w": s * jax.random.normal(keys[3], (1, hidden_size), jnp.float32),
        "fc_w": s * jax.random.normal(keys[4],
                                      (output_size, 2 * hidden_size),
                                      jnp.float32),
        "fc_b": s * jax.random.normal(keys[5], (output_size,), jnp.float32),
        "gru_w_ih": [], "gru_w_hh": [], "gru_b_ih": [], "gru_b_hh": [],
    }
    for l in range(num_layers):
        din = hidden_size + embed_size if l == 0 else hidden_size
        k0, k1, k2, k3 = jax.random.split(keys[8 + l], 4)
        params["gru_w_ih"].append(
            s * jax.random.normal(k0, (3 * hidden_size, din), jnp.float32))
        params["gru_w_hh"].append(
            s * jax.random.normal(k1, (3 * hidden_size, hidden_size),
                                  jnp.float32))
        params["gru_b_ih"].append(
            s * jax.random.normal(k2, (3 * hidden_size,), jnp.float32))
        params["gru_b_hh"].append(
            s * jax.random.normal(k3, (3 * hidden_size,), jnp.float32))
    return params


# ----------------------------- main ----------------------------------------

if __name__ == "__main__":
    # Small shapes consistent with the module's forward.
    B, S = 2, 8            # batch, encoder seq length
    V = 16                 # output_size (vocab)
    E = 32                 # embed_size
    H = 32                 # hidden_size
    L = 2                  # num_layers

    key = jax.random.PRNGKey(0)
    kp, ki, kh, ke = jax.random.split(key, 4)

    params = init_params(kp, V, E, H, L)
    packed = pack_decoder_params(params, H, E, V, L)   # one-time weight prep

    input_ids = jax.random.randint(ki, (B,), 0, V, dtype=jnp.int32)
    hidden = jax.random.normal(kh, (L, B, H), jnp.float32)
    encoder_outputs = jax.random.normal(ke, (B, S, H), jnp.float32)

    prediction, new_hidden = decoder_forward(
        packed, input_ids, hidden, encoder_outputs,
        num_layers=L, output_size=V)
    jax.block_until_ready((prediction, new_hidden))

    assert prediction.shape == (B, V)
    assert new_hidden.shape == (L, B, H)
    print("KERNEL_OK")
</pallas_src>

<mosaic_0001>
module attributes {stable_mosaic.version = 11 : i64} {
  func.func @_decoder_step_kernel(%arg0: memref<16x128xbf16, #tpu.memory_space<vmem>>, %arg1: memref<16x8x128xf32, #tpu.memory_space<vmem>>, %arg2: memref<2x16x128xf32, #tpu.memory_space<vmem>>, %arg3: memref<128x128xbf16, #tpu.memory_space<vmem>>, %arg4: memref<128x128xbf16, #tpu.memory_space<vmem>>, %arg5: memref<1x128xf32, #tpu.memory_space<vmem>>, %arg6: memref<128x128xbf16, #tpu.memory_space<vmem>>, %arg7: memref<128x384xbf16, #tpu.memory_space<vmem>>, %arg8: memref<128x384xbf16, #tpu.memory_space<vmem>>, %arg9: memref<128x384xbf16, #tpu.memory_space<vmem>>, %arg10: memref<1x384xf32, #tpu.memory_space<vmem>>, %arg11: memref<1x384xf32, #tpu.memory_space<vmem>>, %arg12: memref<128x384xbf16, #tpu.memory_space<vmem>>, %arg13: memref<128x384xbf16, #tpu.memory_space<vmem>>, %arg14: memref<1x384xf32, #tpu.memory_space<vmem>>, %arg15: memref<1x384xf32, #tpu.memory_space<vmem>>, %arg16: memref<128x128xbf16, #tpu.memory_space<vmem>>, %arg17: memref<128x128xbf16, #tpu.memory_space<vmem>>, %arg18: memref<1x128xf32, #tpu.memory_space<vmem>>, %arg19: memref<16x128xf32, #tpu.memory_space<vmem>>, %arg20: memref<2x16x128xf32, #tpu.memory_space<vmem>>) attributes {dimension_semantics = [], scalar_prefetch = 0 : i64, scratch_operands = 0 : i64, tpu.core_type = #tpu.core_type<tc>} {
    %c0 = arith.constant 0 : index
    %c0_0 = arith.constant 0 : index
    %c0_1 = arith.constant 0 : index
    %0 = vector.load %arg1[%c0, %c0_0, %c0_1] : memref<16x8x128xf32, #tpu.memory_space<vmem>>, vector<16x8x128xf32>
    %c0_2 = arith.constant 0 : index
    %c0_3 = arith.constant 0 : index
    %c0_4 = arith.constant 0 : index
    %1 = vector.load %arg2[%c0_2, %c0_3, %c0_4] : memref<2x16x128xf32, #tpu.memory_space<vmem>>, vector<2x16x128xf32>
    %2 = vector.extract_strided_slice %1 {offsets = [1, 0, 0], sizes = [1, 16, 128], strides = [1, 1, 1]} : vector<2x16x128xf32> to vector<1x16x128xf32>
    %3 = vector.shape_cast %2 : vector<1x16x128xf32> to vector<16x128xf32>
    %4 = arith.truncf %3 : vector<16x128xf32> to vector<16x128xbf16>
    %c0_5 = arith.constant 0 : index
    %c0_6 = arith.constant 0 : index
    %5 = vector.load %arg3[%c0_5, %c0_6] : memref<128x128xbf16, #tpu.memory_space<vmem>>, vector<128x128xbf16>
    %cst = arith.constant dense<0.000000e+00> : vector<16x128xf32>
    %6 = tpu.matmul %4, %5, %cst {dimension_numbers = #tpu.dot_dimension_numbers<[1], [0], [0], [1], [0, 0, 1, 1], [], []>} : vector<16x128xbf16>, vector<128x128xbf16>, vector<16x128xf32> -> vector<16x128xf32>
    %7 = vector.shape_cast %0 : vector<16x8x128xf32> to vector<128x128xf32>
    %8 = arith.truncf %7 : vector<128x128xf32> to vector<128x128xbf16>
    %c0_7 = arith.constant 0 : index
    %c0_8 = arith.constant 0 : index
    %9 = vector.load %arg4[%c0_7, %c0_8] : memref<128x128xbf16, #tpu.memory_space<vmem>>, vector<128x128xbf16>
    %cst_9 = arith.constant dense<0.000000e+00> : vector<128x128xf32>
    %10 = tpu.matmul %8, %9, %cst_9 {dimension_numbers = #tpu.dot_dimension_numbers<[1], [0], [0], [1], [0, 0, 1, 1], [], []>} : vector<128x128xbf16>, vector<128x128xbf16>, vector<128x128xf32> -> vector<128x128xf32>
    %11 = vector.shape_cast %6 : vector<16x128xf32> to vector<16x1x128xf32>
    %12 = vector.shape_cast %10 : vector<128x128xf32> to vector<16x8x128xf32>
    %13 = vector.broadcast %11 : vector<16x1x128xf32> to vector<16x8x128xf32>
    %14 = arith.addf %13, %12 : vector<16x8x128xf32>
    %c0_10 = arith.constant 0 : index
    %c0_11 = arith.constant 0 : index
    %15 = vector.load %arg5[%c0_10, %c0_11] : memref<1x128xf32, #tpu.memory_space<vmem>>, vector<1x128xf32>
    %16 = vector.shape_cast %15 : vector<1x128xf32> to vector<1x1x128xf32>
    %17 = vector.broadcast %16 : vector<1x1x128xf32> to vector<16x8x128xf32>
    %18 = arith.addf %14, %17 : vector<16x8x128xf32>
    %19 = math.tanh %18 : vector<16x8x128xf32>
    %20 = vector.shape_cast %19 : vector<16x8x128xf32> to vector<128x128xf32>
    %21 = arith.truncf %20 : vector<128x128xf32> to vector<128x128xbf16>
    %c0_12 = arith.constant 0 : index
    %c0_13 = arith.constant 0 : index
    %22 = vector.load %arg6[%c0_12, %c0_13] : memref<128x128xbf16, #tpu.memory_space<vmem>>, vector<128x128xbf16>
    %cst_14 = arith.constant dense<0.000000e+00> : vector<128x128xf32>
    %23 = tpu.matmul %21, %22, %cst_14 {dimension_numbers = #tpu.dot_dimension_numbers<[1], [0], [0], [1], [0, 0, 1, 1], [], []>} : vector<128x128xbf16>, vector<128x128xbf16>, vector<128x128xf32> -> vector<128x128xf32>
    %24 = vector.shape_cast %23 : vector<128x128xf32> to vector<16x8x128xf32>
    %cst_15 = arith.constant dense<0xFF800000> : vector<16x128xf32>
    %25 = vector.multi_reduction <maximumf>, %24, %cst_15 [1] : vector<16x8x128xf32> to vector<16x128xf32>
    %26 = vector.shape_cast %25 : vector<16x128xf32> to vector<16x1x128xf32>
    %27 = vector.broadcast %26 : vector<16x1x128xf32> to vector<16x8x128xf32>
    %28 = arith.subf %24, %27 : vector<16x8x128xf32>
    %29 = math.exp %28 : vector<16x8x128xf32>
    %cst_16 = arith.constant dense<0.000000e+00> : vector<16x128xf32>
    %30 = vector.multi_reduction <add>, %29, %cst_16 [1] : vector<16x8x128xf32> to vector<16x128xf32>
    %31 = vector.shape_cast %30 : vector<16x128xf32> to vector<16x1x128xf32>
    %32 = vector.broadcast %31 : vector<16x1x128xf32> to vector<16x8x128xf32>
    %33 = arith.divf %29, %32 : vector<16x8x128xf32>
    %34 = vector.extract_strided_slice %33 {offsets = [0, 0, 0], sizes = [16, 8, 1], strides = [1, 1, 1]} : vector<16x8x128xf32> to vector<16x8x1xf32>
    %35 = vector.broadcast %34 : vector<16x8x1xf32> to vector<16x8x128xf32>
    %36 = arith.mulf %35, %0 : vector<16x8x128xf32>
    %cst_17 = arith.constant dense<0.000000e+00> : vector<16x128xf32>
    %37 = vector.multi_reduction <add>, %36, %cst_17 [1] : vector<16x8x128xf32> to vector<16x128xf32>
    %38 = arith.truncf %37 : vector<16x128xf32> to vector<16x128xbf16>
    %39 = vector.extract_strided_slice %1 {offsets = [0, 0, 0], sizes = [1, 16, 128], strides = [1, 1, 1]} : vector<2x16x128xf32> to vector<1x16x128xf32>
    %40 = vector.shape_cast %39 : vector<1x16x128xf32> to vector<16x128xf32>
    %c0_18 = arith.constant 0 : index
    %c0_19 = arith.constant 0 : index
    %41 = vector.load %arg0[%c0_18, %c0_19] : memref<16x128xbf16, #tpu.memory_space<vmem>>, vector<16x128xbf16>
    %c0_20 = arith.constant 0 : index
    %c0_21 = arith.constant 0 : index
    %42 = vector.load %arg7[%c0_20, %c0_21] : memref<128x384xbf16, #tpu.memory_space<vmem>>, vector<128x384xbf16>
    %cst_22 = arith.constant dense<0.000000e+00> : vector<16x384xf32>
    %43 = tpu.matmul %41, %42, %cst_22 {dimension_numbers = #tpu.dot_dimension_numbers<[1], [0], [0], [1], [0, 0, 1, 1], [], []>} : vector<16x128xbf16>, vector<128x384xbf16>, vector<16x384xf32> -> vector<16x384xf32>
    %c0_23 = arith.constant 0 : index
    %c0_24 = arith.constant 0 : index
    %44 = vector.load %arg8[%c0_23, %c0_24] : memref<128x384xbf16, #tpu.memory_space<vmem>>, vector<128x384xbf16>
    %cst_25 = arith.constant dense<0.000000e+00> : vector<16x384xf32>
    %45 = tpu.matmul %38, %44, %cst_25 {dimension_numbers = #tpu.dot_dimension_numbers<[1], [0], [0], [1], [0, 0, 1, 1], [], []>} : vector<16x128xbf16>, vector<128x384xbf16>, vector<16x384xf32> -> vector<16x384xf32>
    %46 = arith.addf %43, %45 : vector<16x384xf32>
    %c0_26 = arith.constant 0 : index
    %c0_27 = arith.constant 0 : index
    %47 = vector.load %arg10[%c0_26, %c0_27] : memref<1x384xf32, #tpu.memory_space<vmem>>, vector<1x384xf32>
    %48 = vector.broadcast %47 : vector<1x384xf32> to vector<16x384xf32>
    %49 = arith.addf %46, %48 : vector<16x384xf32>
    %50 = arith.truncf %40 : vector<16x128xf32> to vector<16x128xbf16>
    %c0_28 = arith.constant 0 : index
    %c0_29 = arith.constant 0 : index
    %51 = vector.load %arg9[%c0_28, %c0_29] : memref<128x384xbf16, #tpu.memory_space<vmem>>, vector<128x384xbf16>
    %cst_30 = arith.constant dense<0.000000e+00> : vector<16x384xf32>
    %52 = tpu.matmul %50, %51, %cst_30 {dimension_numbers = #tpu.dot_dimension_numbers<[1], [0], [0], [1], [0, 0, 1, 1], [], []>} : vector<16x128xbf16>, vector<128x384xbf16>, vector<16x384xf32> -> vector<16x384xf32>
    %c0_31 = arith.constant 0 : index
    %c0_32 = arith.constant 0 : index
    %53 = vector.load %arg11[%c0_31, %c0_32] : memref<1x384xf32, #tpu.memory_space<vmem>>, vector<1x384xf32>
    %54 = vector.broadcast %53 : vector<1x384xf32> to vector<16x384xf32>
    %55 = arith.addf %52, %54 : vector<16x384xf32>
    %56 = vector.extract_strided_slice %49 {offsets = [0, 0], sizes = [16, 128], strides = [1, 1]} : vector<16x384xf32> to vector<16x128xf32>
    %57 = vector.extract_strided_slice %55 {offsets = [0, 0], sizes = [16, 128], strides = [1, 1]} : vector<16x384xf32> to vector<16x128xf32>
    %58 = arith.addf %56, %57 : vector<16x128xf32>
    %59 = arith.negf %58 : vector<16x128xf32>
    %60 = math.exp %59 : vector<16x128xf32>
    %cst_33 = arith.constant 1.000000e+00 : f32
    %61 = vector.broadcast %cst_33 : f32 to vector<16x128xf32>
    %62 = arith.addf %61, %60 : vector<16x128xf32>
    %63 = arith.divf %61, %62 : vector<16x128xf32>
    %64 = vector.extract_strided_slice %49 {offsets = [0, 128], sizes = [16, 128], strides = [1, 1]} : vector<16x384xf32> to vector<16x128xf32>
    %65 = vector.extract_strided_slice %55 {offsets = [0, 128], sizes = [16, 128], strides = [1, 1]} : vector<16x384xf32> to vector<16x128xf32>
    %66 = arith.addf %64, %65 : vector<16x128xf32>
    %67 = arith.negf %66 : vector<16x128xf32>
    %68 = math.exp %67 : vector<16x128xf32>
    %cst_34 = arith.constant 1.000000e+00 : f32
    %69 = vector.broadcast %cst_34 : f32 to vector<16x128xf32>
    %70 = arith.addf %69, %68 : vector<16x128xf32>
    %71 = arith.divf %69, %70 : vector<16x128xf32>
    %72 = vector.extract_strided_slice %49 {offsets = [0, 256], sizes = [16, 128], strides = [1, 1]} : vector<16x384xf32> to vector<16x128xf32>
    %73 = vector.extract_strided_slice %55 {offsets = [0, 256], sizes = [16, 128], strides = [1, 1]} : vector<16x384xf32> to vector<16x128xf32>
    %74 = arith.mulf %63, %73 : vector<16x128xf32>
    %75 = arith.addf %72, %74 : vector<16x128xf32>
    %76 = math.tanh %75 : vector<16x128xf32>
    %cst_35 = arith.constant 1.000000e+00 : f32
    %77 = vector.broadcast %cst_35 : f32 to vector<16x128xf32>
    %78 = arith.subf %77, %71 : vector<16x128xf32>
    %79 = arith.mulf %78, %76 : vector<16x128xf32>
    %80 = arith.mulf %71, %40 : vector<16x128xf32>
    %81 = arith.addf %79, %80 : vector<16x128xf32>
    %c0_36 = arith.constant 0 : index
    %c0_37 = arith.constant 0 : index
    %c0_38 = arith.constant 0 : index
    %82 = vector.load %arg20[%c0_36, %c0_37, %c0_38] : memref<2x16x128xf32, #tpu.memory_space<vmem>>, vector<1x16x128xf32>
    %83 = vector.shape_cast %82 : vector<1x16x128xf32> to vector<16x128xf32>
    %84 = vector.shape_cast %81 : vector<16x128xf32> to vector<1x16x128xf32>
    tpu.vector_store %arg20[%c0_36, %c0_37, %c0_38], %84 {strides = array<i32>} : memref<2x16x128xf32, #tpu.memory_space<vmem>>, vector<1x16x128xf32>,
    %85 = vector.extract_strided_slice %1 {offsets = [1, 0, 0], sizes = [1, 16, 128], strides = [1, 1, 1]} : vector<2x16x128xf32> to vector<1x16x128xf32>
    %86 = vector.shape_cast %85 : vector<1x16x128xf32> to vector<16x128xf32>
    %87 = arith.truncf %81 : vector<16x128xf32> to vector<16x128xbf16>
    %c0_39 = arith.constant 0 : index
    %c0_40 = arith.constant 0 : index
    %88 = vector.load %arg12[%c0_39, %c0_40] : memref<128x384xbf16, #tpu.memory_space<vmem>>, vector<128x384xbf16>
    %cst_41 = arith.constant dense<0.000000e+00> : vector<16x384xf32>
    %89 = tpu.matmul %87, %88, %cst_41 {dimension_numbers = #tpu.dot_dimension_numbers<[1], [0], [0], [1], [0, 0, 1, 1], [], []>} : vector<16x128xbf16>, vector<128x384xbf16>, vector<16x384xf32> -> vector<16x384xf32>
    %c0_42 = arith.constant 0 : index
    %c0_43 = arith.constant 0 : index
    %90 = vector.load %arg14[%c0_42, %c0_43] : memref<1x384xf32, #tpu.memory_space<vmem>>, vector<1x384xf32>
    %91 = vector.broadcast %90 : vector<1x384xf32> to vector<16x384xf32>
    %92 = arith.addf %89, %91 : vector<16x384xf32>
    %93 = arith.truncf %86 : vector<16x128xf32> to vector<16x128xbf16>
    %c0_44 = arith.constant 0 : index
    %c0_45 = arith.constant 0 : index
    %94 = vector.load %arg13[%c0_44, %c0_45] : memref<128x384xbf16, #tpu.memory_space<vmem>>, vector<128x384xbf16>
    %cst_46 = arith.constant dense<0.000000e+00> : vector<16x384xf32>
    %95 = tpu.matmul %93, %94, %cst_46 {dimension_numbers = #tpu.dot_dimension_numbers<[1], [0], [0], [1], [0, 0, 1, 1], [], []>} : vector<16x128xbf16>, vector<128x384xbf16>, vector<16x384xf32> -> vector<16x384xf32>
    %c0_47 = arith.constant 0 : index
    %c0_48 = arith.constant 0 : index
    %96 = vector.load %arg15[%c0_47, %c0_48] : memref<1x384xf32, #tpu.memory_space<vmem>>, vector<1x384xf32>
    %97 = vector.broadcast %96 : vector<1x384xf32> to vector<16x384xf32>
    %98 = arith.addf %95, %97 : vector<16x384xf32>
    %99 = vector.extract_strided_slice %92 {offsets = [0, 0], sizes = [16, 128], strides = [1, 1]} : vector<16x384xf32> to vector<16x128xf32>
    %100 = vector.extract_strided_slice %98 {offsets = [0, 0], sizes = [16, 128], strides = [1, 1]} : vector<16x384xf32> to vector<16x128xf32>
    %101 = arith.addf %99, %100 : vector<16x128xf32>
    %102 = arith.negf %101 : vector<16x128xf32>
    %103 = math.exp %102 : vector<16x128xf32>
    %cst_49 = arith.constant 1.000000e+00 : f32
    %104 = vector.broadcast %cst_49 : f32 to vector<16x128xf32>
    %105 = arith.addf %104, %103 : vector<16x128xf32>
    %106 = arith.divf %104, %105 : vector<16x128xf32>
    %107 = vector.extract_strided_slice %92 {offsets = [0, 128], sizes = [16, 128], strides = [1, 1]} : vector<16x384xf32> to vector<16x128xf32>
    %108 = vector.extract_strided_slice %98 {offsets = [0, 128], sizes = [16, 128], strides = [1, 1]} : vector<16x384xf32> to vector<16x128xf32>
    %109 = arith.addf %107, %108 : vector<16x128xf32>
    %110 = arith.negf %109 : vector<16x128xf32>
    %111 = math.exp %110 : vector<16x128xf32>
    %cst_50 = arith.constant 1.000000e+00 : f32
    %112 = vector.broadcast %cst_50 : f32 to vector<16x128xf32>
    %113 = arith.addf %112, %111 : vector<16x128xf32>
    %114 = arith.divf %112, %113 : vector<16x128xf32>
    %115 = vector.extract_strided_slice %92 {offsets = [0, 256], sizes = [16, 128], strides = [1, 1]} : vector<16x384xf32> to vector<16x128xf32>
    %116 = vector.extract_strided_slice %98 {offsets = [0, 256], sizes = [16, 128], strides = [1, 1]} : vector<16x384xf32> to vector<16x128xf32>
    %117 = arith.mulf %106, %116 : vector<16x128xf32>
    %118 = arith.addf %115, %117 : vector<16x128xf32>
    %119 = math.tanh %118 : vector<16x128xf32>
    %cst_51 = arith.constant 1.000000e+00 : f32
    %120 = vector.broadcast %cst_51 : f32 to vector<16x128xf32>
    %121 = arith.subf %120, %114 : vector<16x128xf32>
    %122 = arith.mulf %121, %119 : vector<16x128xf32>
    %123 = arith.mulf %114, %86 : vector<16x128xf32>
    %124 = arith.addf %122, %123 : vector<16x128xf32>
    %c1 = arith.constant 1 : index
    %c0_52 = arith.constant 0 : index
    %c0_53 = arith.constant 0 : index
    %125 = vector.load %arg20[%c1, %c0_52, %c0_53] : memref<2x16x128xf32, #tpu.memory_space<vmem>>, vector<1x16x128xf32>
    %126 = vector.shape_cast %125 : vector<1x16x128xf32> to vector<16x128xf32>
    %127 = vector.shape_cast %124 : vector<16x128xf32> to vector<1x16x128xf32>
    tpu.vector_store %arg20[%c1, %c0_52, %c0_53], %127 {strides = array<i32>} : memref<2x16x128xf32, #tpu.memory_space<vmem>>, vector<1x16x128xf32>,
    %128 = arith.truncf %124 : vector<16x128xf32> to vector<16x128xbf16>
    %c0_54 = arith.constant 0 : index
    %c0_55 = arith.constant 0 : index
    %129 = vector.load %arg16[%c0_54, %c0_55] : memref<128x128xbf16, #tpu.memory_space<vmem>>, vector<128x128xbf16>
    %cst_56 = arith.constant dense<0.000000e+00> : vector<16x128xf32>
    %130 = tpu.matmul %128, %129, %cst_56 {dimension_numbers = #tpu.dot_dimension_numbers<[1], [0], [0], [1], [0, 0, 1, 1], [], []>} : vector<16x128xbf16>, vector<128x128xbf16>, vector<16x128xf32> -> vector<16x128xf32>
    %c0_57 = arith.constant 0 : index
    %c0_58 = arith.constant 0 : index
    %131 = vector.load %arg17[%c0_57, %c0_58] : memref<128x128xbf16, #tpu.memory_space<vmem>>, vector<128x128xbf16>
    %cst_59 = arith.constant dense<0.000000e+00> : vector<16x128xf32>
    %132 = tpu.matmul %38, %131, %cst_59 {dimension_numbers = #tpu.dot_dimension_numbers<[1], [0], [0], [1], [0, 0, 1, 1], [], []>} : vector<16x128xbf16>, vector<128x128xbf16>, vector<16x128xf32> -> vector<16x128xf32>
    %133 = arith.addf %130, %132 : vector<16x128xf32>
    %c0_60 = arith.constant 0 : index
    %c0_61 = arith.constant 0 : index
    %134 = vector.load %arg18[%c0_60, %c0_61] : memref<1x128xf32, #tpu.memory_space<vmem>>, vector<1x128xf32>
    %135 = vector.broadcast %134 : vector<1x128xf32> to vector<16x128xf32>
    %136 = arith.addf %133, %135 : vector<16x128xf32>
    %c0_62 = arith.constant 0 : index
    %c0_63 = arith.constant 0 : index
    %137 = vector.load %arg19[%c0_62, %c0_63] : memref<16x128xf32, #tpu.memory_space<vmem>>, vector<16x128xf32>
    tpu.vector_store %arg19[%c0_62, %c0_63], %136 {strides = array<i32>} : memref<16x128xf32, #tpu.memory_space<vmem>>, vector<16x128xf32>,
    return
  }
}

</mosaic_0001>

<bundles_post_ra>
// kernel: decoder_forward.1
= control target key start
LH: loop header
LB: loop body
LE: loop exit
PB: predicated region body
PF: predicated region fallthrough
CT: control target
= control target key end

     0   :  { %s4725_s0 = inlined_call_operand.vmem [shape: bf16[16,128], index: 0, kind: input, shape index: {}]   ;;  %s4726_s1 = inlined_call_operand.vmem [shape: f32[16,8,128], index: 1, kind: input, shape index: {}]   ;;  %s4727_s2 = inlined_call_operand.vmem [shape: f32[2,16,128], index: 2, kind: input, shape index: {}, may-alias: {2,20}]   ;;  %s4728_s3 = inlined_call_operand.vmem [shape: bf16[128,128], index: 3, kind: input, shape index: {}]   ;;  %s4729_s4 = inlined_call_operand.vmem [shape: bf16[128,128], index: 4, kind: input, shape index: {}]   ;;  %s4730_s5 = inlined_call_operand.vmem [shape: f32[1,128], index: 5, kind: input, shape index: {}]   ;;  %s4731_s6 = inlined_call_operand.hbm [shape: bf16[128,128], index: 6, kind: input, shape index: {}]   ;;  %s4732_s7 = inlined_call_operand.hbm [shape: bf16[128,384], index: 7, kind: input, shape index: {}]   ;;  %s4733_s8 = inlined_call_operand.hbm [shape: bf16[128,384], index: 8, kind: input, shape index: {}]   ;;  %s4734_s9 = inlined_call_operand.hbm [shape: bf16[128,384], index: 9, kind: input, shape index: {}]   ;;  %s4735_s10 = inlined_call_operand.vmem [shape: f32[1,384], index: 10, kind: input, shape index: {}]   ;;  %s4736_s11 = inlined_call_operand.vmem [shape: f32[1,384], index: 11, kind: input, shape index: {}]   ;;  %s4737_s12 = inlined_call_operand.hbm [shape: bf16[128,384], index: 12, kind: input, shape index: {}]   ;;  %s4738_s13 = inlined_call_operand.hbm [shape: bf16[128,384], index: 13, kind: input, shape index: {}]   ;;  %s4739_s14 = inlined_call_operand.vmem [shape: f32[1,384], index: 14, kind: input, shape index: {}]   ;;  %s4740_s15 = inlined_call_operand.vmem [shape: f32[1,384], index: 15, kind: input, shape index: {}]   ;;  %s4741_s16 = inlined_call_operand.hbm [shape: bf16[128,128], index: 16, kind: input, shape index: {}]   ;;  %s4742_s17 = inlined_call_operand.hbm [shape: bf16[128,128], index: 17, kind: input, shape index: {}]   ;;  %s4743_s18 = inlined_call_operand.vmem [shape: f32[1,128], index: 18, kind: input, shape index: {}]   ;;  %s4744_s19 = inlined_call_operand.vmem [shape: f32[16,128], index: 19, kind: output, shape index: {0}]   ;;  %s4745_s20 = inlined_call_operand.vmem [shape: f32[2,16,128], index: 20, kind: output, shape index: {1}, may-alias: {2,20}]  }
   0x1   :  { %4750 = sst [smem:[#allocation20_spill]] %s4725_s0 }
   0x2   :  { %4751 = sst [smem:[#allocation21_spill]] %s4726_s1 }
   0x3   :  { %4752 = sst [smem:[#allocation22_spill]] %s4727_s2 }
   0x4   :  { %4753 = sst [smem:[#allocation23_spill]] %s4728_s3 }
   0x5   :  { %4754 = sst [smem:[#allocation24_spill]] %s4729_s4 }
   0x6   :  { %26 = vsyncpa [#allocation3], 0 }
   0x7   :  { %27 = vsyncpa [#allocation5], 0 }
   0x8   :  { %28 = vsyncpa [#allocation8], 0 }
   0x9   :  { %29 = vsyncpa [#allocation11], 0  ;;  %s60_s23 = sshll.u32 %s4732_s7, 4  ;;  %s61_s23 = int_to_ptr.hbm [resolvable:$true] %s60_s23 }
   0xa   :  { %30 = vsyncpa [#allocation14], 0  ;;  %s3991_s24 = smov [#allocation4]   ;;  %s86_s26 = sshll.u32 %s4734_s9, 4  ;;  %s87_s26 = int_to_ptr.hbm [resolvable:$true] %s86_s26 }
   0xb   :  { %s62_s2 = sshll.u32 %s3991_s24, 4  ;;  %s3992_s27 = smov 192   ;;  %s63_s2 = int_to_ptr.vmem [resolvable:$true] %s62_s2 }
   0xc   :  { %s3993_s28 = smov 12   ;;  %s3994_s4 = smov [#allocation7]  }
   0xd   :  { %68 = dma.hbm_to_vmem [thread:$0]  %s61_s23, 3072, %s63_s2, [#allocation5], %s3992_s27, %s3992_s27, %s3993_s28  }
   0xe   :  { %s88_s29 = sshll.u32 %s3994_s4, 4  ;;  %s116_s0 = sshll.u32 %s4738_s13, 4  ;;  %s89_s29 = int_to_ptr.vmem [resolvable:$true] %s88_s29  ;;  %s117_s0 = int_to_ptr.hbm [resolvable:$true] %s116_s0 }
   0xf   :  { %94 = dma.hbm_to_vmem [thread:$0]  %s87_s26, 3072, %s89_s29, [#allocation8], %s3992_s27, %s3992_s27, %s3993_s28  }
  0x10   :  { %s47_s1 = sshll.u32 %s4731_s6, 4  ;;  %s3995_s22 = smov [#allocation10]   ;;  %s48_s1 = int_to_ptr.hbm [resolvable:$true] %s47_s1 }
  0x11   :  { %s118_s24 = sshll.u32 %s3995_s22, 4  ;;  %s3996_s23 = smov [#allocation2]   ;;  %s119_s24 = int_to_ptr.vmem [resolvable:$true] %s118_s24 }
  0x12   :  { %124 = dma.hbm_to_vmem [thread:$0]  %s117_s0, 3072, %s119_s24, [#allocation11], %s3992_s27, %s3992_s27, %s3993_s28  }
  0x13   :  { %s49_s13 = sshll.u32 %s3996_s23, 4  ;;  %s3997_s2 = smov 64   ;;  %s50_s13 = int_to_ptr.vmem [resolvable:$true] %s49_s13 }
  0x14   :  { %s3998_s25 = smov 4   ;;  %s73_s4 = sshll.u32 %s4733_s8, 4  ;;  %s74_s4 = int_to_ptr.hbm [resolvable:$true] %s73_s4 }
  0x15   :  { %55 = dma.hbm_to_vmem [thread:$0]  %s48_s1, 1024, %s50_s13, [#allocation3], %s3997_s2, %s3997_s2, %s3998_s25  }
  0x16   :  { %s3999_s6 = smov [#allocation6]   ;;  %s103_s9 = sshll.u32 %s4737_s12, 4  ;;  %s104_s9 = int_to_ptr.hbm [resolvable:$true] %s103_s9 }
  0x17   :  { %s75_s29 = sshll.u32 %s3999_s6, 4  ;;  %s4000_s0 = smov [#allocation9]   ;;  %s76_s29 = int_to_ptr.vmem [resolvable:$true] %s75_s29 }
  0x18   :  { %81 = dma.hbm_to_vmem [thread:$0]  %s74_s4, 3072, %s76_s29, [#allocation5], %s3992_s27, %s3992_s27, %s3993_s28  }
  0x19   :  { %s105_s21 = sshll.u32 %s4000_s0, 4  ;;  %s133_s24 = sshll.u32 %s4741_s16, 4  ;;  %s106_s21 = int_to_ptr.vmem [resolvable:$true] %s105_s21  ;;  %s134_s24 = int_to_ptr.hbm [resolvable:$true] %s133_s24 }
  0x1a   :  { %111 = dma.hbm_to_vmem [thread:$0]  %s104_s9, 3072, %s106_s21, [#allocation8], %s3992_s27, %s3992_s27, %s3993_s28  }
  0x1b   :  { %s146_s12 = sshll.u32 %s4742_s17, 4  ;;  %s4001_s13 = smov [#allocation12]   ;;  %s147_s12 = int_to_ptr.hbm [resolvable:$true] %s146_s12 }
  0x1c   :  { %s135_s3 = sshll.u32 %s4001_s13, 4  ;;  %s4002_s26 = smov [#allocation13]   ;;  %s136_s3 = int_to_ptr.vmem [resolvable:$true] %s135_s3 }
  0x1d   :  { %141 = dma.hbm_to_vmem [thread:$0]  %s134_s24, 1024, %s136_s3, [#allocation11], %s3997_s2, %s3997_s2, %s3998_s25  }
  0x1e   :  { %s148_s4 = sshll.u32 %s4002_s26, 4  ;;  %s149_s4 = int_to_ptr.vmem [resolvable:$true] %s148_s4 }
  0x1f   :  { %154 = dma.hbm_to_vmem [thread:$0]  %s147_s12, 1024, %s149_s4, [#allocation14], %s3997_s2, %s3997_s2, %s3998_s25  }
  0x20   :  { %3981 = dma.done.wait [#allocation3], 1024  }
  0x21   :  { %3982 = vsyncadd [#allocation3], 4294966272 }
  0x22   :  { %3983 = dma.done.wait [#allocation5], 6144  }
  0x23   :  { %3984 = vsyncadd [#allocation5], 4294961152 }
  0x24   :  { %3985 = dma.done.wait [#allocation8], 6144  }
  0x25   :  { %3986 = vsyncadd [#allocation8], 4294961152 }
  0x26   :  { %3987 = dma.done.wait [#allocation11], 4096  }
  0x27   :  { %3988 = vsyncadd [#allocation11], 4294963200 }
  0x28   :  { %3989 = dma.done.wait [#allocation14], 1024  }
  0x29   :  { %3990 = vsyncadd [#allocation14], 4294966272  ;;  %s4755_s27 = sld [smem:[#allocation23_spill]]  ;;  %v3479_v37 = vld [vmem:[#allocation2 + $0x38] sm:$0xff]  ;;  %v3478_v38 = vld [vmem:[#allocation2 + $0x30] sm:$0xff] }
  0x2a   :  { %s4756_s29 = sld [smem:[#allocation24_spill]]  ;;  %581 = vmatpush.bf16.msra.mxu2 %v3479_v37  ;;  %v3477_v39 = vld [vmem:[#allocation2 + $0x28] sm:$0xff]  ;;  %v3476_v43 = vld [vmem:[#allocation2 + $0x20] sm:$0xff]  ;;  %v3475_v44 = vld [vmem:[#allocation2 + $0x18] sm:$0xff] }
  0x2b   :  { %s4757_s24 = sld [smem:[#allocation22_spill]]  ;;  %v3474_v45 = vld [vmem:[#allocation2 + $0x10] sm:$0xff]  ;;  %v3473_v48 = vld [vmem:[#allocation2 + $0x8] sm:$0xff]  ;;  %v3472_v50 = vld [vmem:[#allocation2] sm:$0xff] }
  0x2c   :  { %s4758_s3 = sld [smem:[#allocation21_spill]]  ;;  %v4256_v56 = vld [vmem:[%s4730_s5] ss:$0 sm:$0xff] }
  0x2d   :  { %s4759_s26 = sld [smem:[#allocation20_spill]] }
  0x2e   :  { %582 = vmatpush.bf16.msra.mxu2 %v3478_v38 }
  0x2f   :  { %v3463_v0 = vld [vmem:[%s4755_s27 + $0x38] sm:$0xff]  ;;  %v3462_v2 = vld [vmem:[%s4755_s27 + $0x30] sm:$0xff]  ;;  %v3461_v4 = vld [vmem:[%s4755_s27 + $0x28] sm:$0xff] }
  0x30   :  { %v3471_v1 = vld [vmem:[%s4756_s29 + $0x38] sm:$0xff]  ;;  %274 = vmatpush.bf16.msra.mxu0 %v3463_v0  ;;  %v3470_v3 = vld [vmem:[%s4756_s29 + $0x30] sm:$0xff]  ;;  %v3469_v5 = vld [vmem:[%s4756_s29 + $0x28] sm:$0xff] }
  0x31   :  { %360 = vmatpush.bf16.msra.mxu1 %v3471_v1  ;;  %v3460_v6 = vld [vmem:[%s4755_s27 + $0x20] sm:$0xff]  ;;  %v3459_v8 = vld [vmem:[%s4755_s27 + $0x18] sm:$0xff]  ;;  %v3458_v10 = vld [vmem:[%s4755_s27 + $0x10] sm:$0xff] }
  0x32   :  { %v3468_v7 = vld [vmem:[%s4756_s29 + $0x20] sm:$0xff]  ;;  %v3467_v9 = vld [vmem:[%s4756_s29 + $0x18] sm:$0xff]  ;;  %v3466_v11 = vld [vmem:[%s4756_s29 + $0x10] sm:$0xff]  ;;  %583 = vmatpush.bf16.msra.mxu2 %v3477_v39 }
  0x33   :  { %v3457_v12 = vld [vmem:[%s4755_s27 + $0x8] sm:$0xff]  ;;  %v3456_v14 = vld [vmem:[%s4755_s27] sm:$0xff]  ;;  %v207_v16 = vld [vmem:[%s4757_s24 + $0x10] sm:$0xff] }
  0x34   :  { %275 = vmatpush.bf16.msra.mxu0 %v3462_v2  ;;  %v3465_v13 = vld [vmem:[%s4756_s29 + $0x8] sm:$0xff]  ;;  %v3464_v15 = vld [vmem:[%s4756_s29] sm:$0xff]  ;;  %v208_v17 = vld [vmem:[%s4757_s24 + $0x18] sm:$0xff] }
  0x35   :  { %361 = vmatpush.bf16.msra.mxu1 %v3470_v3  ;;  %v189_v18 = vld [vmem:[%s4758_s3] sm:$0xff]  ;;  %v190_v19 = vld [vmem:[%s4758_s3 + $0x8] sm:$0xff]  ;;  %v4208_v20 = vpack.c.bf16 %v208_v17, %v207_v16  ;;  %v191_v22 = vld [vmem:[%s4758_s3 + $0x10] sm:$0xff] }
  0x36   :  { %v288_v21 = vpack.c.bf16 %v190_v19, %v189_v18  ;;  %v192_v23 = vld [vmem:[%s4758_s3 + $0x18] sm:$0xff]  ;;  %v193_v25 = vld [vmem:[%s4758_s3 + $0x20] sm:$0xff]  ;;  %v194_v26 = vld [vmem:[%s4758_s3 + $0x28] sm:$0xff]  ;;  %584 = vmatpush.bf16.msra.mxu2 %v3476_v43 }
  0x37   :  { %v289_v24 = vpack.c.bf16 %v192_v23, %v191_v22  ;;  %v290_v27 = vpack.c.bf16 %v194_v26, %v193_v25  ;;  %v195_v28 = vld [vmem:[%s4758_s3 + $0x30] sm:$0xff]  ;;  %v196_v29 = vld [vmem:[%s4758_s3 + $0x38] sm:$0xff]  ;;  %v197_v31 = vld [vmem:[%s4758_s3 + $0x40] sm:$0xff] }
  0x38   :  { %276 = vmatpush.bf16.msra.mxu0 %v3461_v4  ;;  %v291_v30 = vpack.c.bf16 %v196_v29, %v195_v28  ;;  %v198_v32 = vld [vmem:[%s4758_s3 + $0x48] sm:$0xff]  ;;  %v199_v34 = vld [vmem:[%s4758_s3 + $0x50] sm:$0xff]  ;;  %v200_v35 = vld [vmem:[%s4758_s3 + $0x58] sm:$0xff] }
  0x39   :  { %362 = vmatpush.bf16.msra.mxu1 %v3469_v5  ;;  %v292_v33 = vpack.c.bf16 %v198_v32, %v197_v31  ;;  %v293_v36 = vpack.c.bf16 %v200_v35, %v199_v34  ;;  %v201_v40 = vld [vmem:[%s4758_s3 + $0x60] sm:$0xff]  ;;  %v202_v41 = vld [vmem:[%s4758_s3 + $0x68] sm:$0xff]  ;;  %v203_v46 = vld [vmem:[%s4758_s3 + $0x70] sm:$0xff] }
  0x3a   :  { %v294_v42 = vpack.c.bf16 %v202_v41, %v201_v40  ;;  %585 = vmatpush.bf16.msra.mxu2 %v3475_v44  ;;  %v204_v47 = vld [vmem:[%s4758_s3 + $0x78] sm:$0xff] }
  0x3b   :  { %v295_v49 = vpack.c.bf16 %v204_v47, %v203_v46 }
  0x3c   :  { %277 = vmatpush.bf16.msra.mxu0 %v3460_v6 }
  0x3d   :  { %363 = vmatpush.bf16.msra.mxu1 %v3468_v7 }
  0x3e   :  { %586 = vmatpush.bf16.msra.mxu2 %v3474_v45 }
  0x40   :  { %278 = vmatpush.bf16.msra.mxu0 %v3459_v8 }
  0x41   :  { %364 = vmatpush.bf16.msra.mxu1 %v3467_v9 }
  0x42   :  { %587 = vmatpush.bf16.msra.mxu2 %v3473_v48 }
  0x44   :  { %279 = vmatpush.bf16.msra.mxu0 %v3458_v10 }
  0x45   :  { %365 = vmatpush.bf16.msra.mxu1 %v3466_v11 }
  0x46   :  { %588 = vmatpush.bf16.msra.mxu2 %v3472_v50 }
  0x48   :  { %280 = vmatpush.bf16.msra.mxu0 %v3457_v12 }
  0x49   :  { %366 = vmatpush.bf16.msra.mxu1 %v3465_v13 }
  0x4c   :  { %281 = vmatpush.bf16.msra.mxu0 %v3456_v14 }
  0x4d   :  { %367 = vmatpush.bf16.msra.mxu1 %v3464_v15 }
  0x4f   :  { %282 = vmatmul.bf16.vlgmr.msra.gmra.mxu0 %v4208_v20 }
  0x50   :  { %368 = vmatmul.bf16.vlgmr.msra.gmra.mxu1 %v288_v21 }
  0x60   :  { %373 = vmatmul.bf16.gmra.mxu1 %v289_v24 }
  0x70   :  { %378 = vmatmul.bf16.gmra.mxu1 %v290_v27 }
  0x80   :  { %383 = vmatmul.bf16.gmra.mxu1 %v291_v30 }
  0x90   :  { %388 = vmatmul.bf16.gmra.mxu1 %v292_v33 }
  0xa0   :  { %393 = vmatmul.bf16.gmra.mxu1 %v293_v36 }
  0xb0   :  { %398 = vmatmul.bf16.gmra.mxu1 %v294_v42 }
  0xc0   :  { %403 = vmatmul.bf16.gmra.mxu1 %v295_v49 }
  0xcc   :  { %v283_v51 = vpop.f32.mrf.mxu0 }
  0xcd   :  { %v369_v52 = vpop.f32.mrf.mxu1  ;;  %v425_v53 = vperm.slane %v283_v51, 0  ;;  %v411_v54 = vrot.slane %v283_v51, 1  ;;  %v412_v62 = vrot.slane %v283_v51, 2  ;;  %v413_v3 = vrot.slane %v283_v51, 3 }
  0xce   :  { %v414_v11 = vrot.slane %v283_v51, 4  ;;  %v415_v16 = vrot.slane %v283_v51, 5  ;;  %v416_v25 = vrot.slane %v283_v51, 6  ;;  %v417_v30 = vrot.slane %v283_v51, 7 }
  0xcf   :  { %v457_v55 = vadd.f32 %v425_v53, %v369_v52  ;;  %v426_v57 = vperm.slane %v411_v54, 0  ;;  %v427_v1 = vperm.slane %v412_v62, 0  ;;  %v428_v6 = vperm.slane %v413_v3, 0 }
  0xd0   :  { %v429_v14 = vperm.slane %v414_v11, 0  ;;  %v430_v19 = vperm.slane %v415_v16, 0  ;;  %v431_v28 = vperm.slane %v416_v25, 0  ;;  %v432_v33 = vperm.slane %v417_v30, 0 }
  0xd1   :  { %v477_v58 = vadd.f32 %v4256_v56, %v457_v55 }
  0xd3   :  { %3635 = vtanh.f32 %v477_v58 }
  0xd4   :  { %v285_v38 = vpop.f32.mrf.mxu0 }
  0xd5   :  { %v371_v59 = vpop.f32.mrf.mxu1  ;;  %v433_v41 = vperm.slane %v285_v38, 0  ;;  %v418_v43 = vrot.slane %v285_v38, 1  ;;  %v419_v51 = vrot.slane %v285_v38, 2 }
  0xd6   :  { %v458_v60 = vadd.f32 %v426_v57, %v371_v59  ;;  %v420_v57 = vrot.slane %v285_v38, 3 }
  0xd7   :  { %v434_v46 = vperm.slane %v418_v43, 0  ;;  %v435_v54 = vperm.slane %v419_v51, 0 }
  0xd8   :  { %v478_v61 = vadd.f32 %v4256_v56, %v458_v60  ;;  %v436_v60 = vperm.slane %v420_v57, 0  ;;  %v4003_v57 = vmov 0  }
  0xd9   :  { %v3636_v0 = vpop.eup %3635  ;;  %3630 = vset.pattern.permute.xlu0 %v4003_v57  ;;  %3631 = vset.pattern.permute.xlu2 %v4003_v57 }
  0xda   :  { %3637 = vtanh.f32 %v478_v61  ;;  %3632 = vset.pattern.permute.xlu1 %v4003_v57 }
  0xdd   :  { %v374_v63 = vpop.f32.mrf.mxu1 }
  0xde   :  { %v459_v4 = vadd.f32 %v427_v1, %v374_v63  ;;  %v421_v1 = vrot.slane %v285_v38, 4 }
  0xe0   :  { %v3638_v2 = vpop.eup %3637  ;;  %v479_v7 = vadd.f32 %v4256_v56, %v459_v4  ;;  %v437_v4 = vperm.slane %v421_v1, 0 }
  0xe1   :  { %v509_v5 = vpack.c.bf16 %v3638_v2, %v3636_v0 }
  0xe2   :  { %3639 = vtanh.f32 %v479_v7 }
  0xe3   :  { %589 = vmatmul.bf16.vlgmr.msra.gmra.mxu2 %v509_v5 }
  0xe5   :  { %v376_v8 = vpop.f32.mrf.mxu1 }
  0xe6   :  { %v460_v9 = vadd.f32 %v428_v6, %v376_v8  ;;  %v422_v6 = vrot.slane %v285_v38, 5 }
  0xe8   :  { %v480_v10 = vadd.f32 %v4256_v56, %v460_v9  ;;  %v3640_v13 = vpop.eup %3639  ;;  %v438_v9 = vperm.slane %v422_v6, 0 }
  0xea   :  { %3641 = vtanh.f32 %v480_v10 }
  0xed   :  { %v379_v12 = vpop.f32.mrf.mxu1 }
  0xee   :  { %v461_v17 = vadd.f32 %v429_v14, %v379_v12  ;;  %v423_v14 = vrot.slane %v285_v38, 6 }
  0xf0   :  { %v3642_v15 = vpop.eup %3641  ;;  %v481_v21 = vadd.f32 %v4256_v56, %v461_v17  ;;  %v439_v17 = vperm.slane %v423_v14, 0 }
  0xf1   :  { %v510_v18 = vpack.c.bf16 %v3642_v15, %v3640_v13 }
  0xf2   :  { %3643 = vtanh.f32 %v481_v21 }
  0xf3   :  { %594 = vmatmul.bf16.gmra.mxu2 %v510_v18 }
  0xf5   :  { %v381_v22 = vpop.f32.mrf.mxu1 }
  0xf6   :  { %v462_v23 = vadd.f32 %v430_v19, %v381_v22  ;;  %v424_v19 = vrot.slane %v285_v38, 7 }
  0xf8   :  { %v482_v24 = vadd.f32 %v4256_v56, %v462_v23  ;;  %v3644_v27 = vpop.eup %3643  ;;  %v440_v23 = vperm.slane %v424_v19, 0 }
  0xfa   :  { %3645 = vtanh.f32 %v482_v24 }
  0xfd   :  { %v384_v26 = vpop.f32.mrf.mxu1 }
  0xfe   :  { %v463_v31 = vadd.f32 %v431_v28, %v384_v26 }
 0x100   :  { %v3646_v29 = vpop.eup %3645  ;;  %v483_v34 = vadd.f32 %v4256_v56, %v463_v31 }
 0x101   :  { %v511_v32 = vpack.c.bf16 %v3646_v29, %v3644_v27 }
 0x102   :  { %3647 = vtanh.f32 %v483_v34 }
 0x103   :  { %599 = vmatmul.bf16.gmra.mxu2 %v511_v32 }
 0x105   :  { %v386_v35 = vpop.f32.mrf.mxu1 }
 0x106   :  { %v464_v36 = vadd.f32 %v432_v33, %v386_v35 }
 0x108   :  { %v484_v37 = vadd.f32 %v4256_v56, %v464_v36  ;;  %v3648_v40 = vpop.eup %3647 }
 0x10a   :  { %3649 = vtanh.f32 %v484_v37 }
 0x10d   :  { %v389_v39 = vpop.f32.mrf.mxu1 }
 0x10e   :  { %v465_v44 = vadd.f32 %v433_v41, %v389_v39 }
 0x110   :  { %v3650_v42 = vpop.eup %3649  ;;  %v485_v47 = vadd.f32 %v4256_v56, %v465_v44 }
 0x111   :  { %v512_v45 = vpack.c.bf16 %v3650_v42, %v3648_v40 }
 0x112   :  { %3651 = vtanh.f32 %v485_v47 }
 0x113   :  { %604 = vmatmul.bf16.gmra.mxu2 %v512_v45 }
 0x115   :  { %v391_v48 = vpop.f32.mrf.mxu1 }
 0x116   :  { %v466_v49 = vadd.f32 %v434_v46, %v391_v48 }
 0x118   :  { %v486_v50 = vadd.f32 %v4256_v56, %v466_v49  ;;  %v3652_v53 = vpop.eup %3651 }
 0x11a   :  { %3653 = vtanh.f32 %v486_v50 }
 0x11d   :  { %v394_v52 = vpop.f32.mrf.mxu1 }
 0x11e   :  { %v467_v58 = vadd.f32 %v435_v54, %v394_v52 }
 0x120   :  { %v3654_v55 = vpop.eup %3653  ;;  %v487_v61 = vadd.f32 %v4256_v56, %v467_v58 }
 0x121   :  { %v513_v59 = vpack.c.bf16 %v3654_v55, %v3652_v53 }
 0x122   :  { %3655 = vtanh.f32 %v487_v61 }
 0x123   :  { %609 = vmatmul.bf16.gmra.mxu2 %v513_v59 }
 0x125   :  { %v396_v62 = vpop.f32.mrf.mxu1 }
 0x126   :  { %v468_v63 = vadd.f32 %v436_v60, %v396_v62 }
 0x128   :  { %v488_v0 = vadd.f32 %v4256_v56, %v468_v63  ;;  %v3656_v3 = vpop.eup %3655 }
 0x12a   :  { %3657 = vtanh.f32 %v488_v0 }
 0x12d   :  { %v399_v2 = vpop.f32.mrf.mxu1 }
 0x12e   :  { %v469_v7 = vadd.f32 %v437_v4, %v399_v2 }
 0x130   :  { %v3658_v5 = vpop.eup %3657  ;;  %v489_v10 = vadd.f32 %v4256_v56, %v469_v7 }
 0x131   :  { %v514_v8 = vpack.c.bf16 %v3658_v5, %v3656_v3 }
 0x132   :  { %3659 = vtanh.f32 %v489_v10 }
 0x133   :  { %614 = vmatmul.bf16.gmra.mxu2 %v514_v8 }
 0x135   :  { %v401_v11 = vpop.f32.mrf.mxu1 }
 0x136   :  { %v470_v12 = vadd.f32 %v438_v9, %v401_v11 }
 0x138   :  { %v490_v13 = vadd.f32 %v4256_v56, %v470_v12  ;;  %v3660_v16 = vpop.eup %3659 }
 0x13a   :  { %3661 = vtanh.f32 %v490_v13 }
 0x13d   :  { %v404_v15 = vpop.f32.mrf.mxu1 }
 0x13e   :  { %v471_v21 = vadd.f32 %v439_v17, %v404_v15 }
 0x140   :  { %v3662_v18 = vpop.eup %3661  ;;  %v491_v24 = vadd.f32 %v4256_v56, %v471_v21 }
 0x141   :  { %v515_v22 = vpack.c.bf16 %v3662_v18, %v3660_v16 }
 0x142   :  { %3663 = vtanh.f32 %v491_v24 }
 0x143   :  { %619 = vmatmul.bf16.gmra.mxu2 %v515_v22 }
 0x145   :  { %v406_v25 = vpop.f32.mrf.mxu1 }
 0x146   :  { %v472_v26 = vadd.f32 %v440_v23, %v406_v25 }
 0x148   :  { %v492_v27 = vadd.f32 %v4256_v56, %v472_v26  ;;  %v3664_v28 = vpop.eup %3663 }
 0x14a   :  { %3665 = vtanh.f32 %v492_v27 }
 0x150   :  { %v3666_v29 = vpop.eup %3665 }
 0x151   :  { %v516_v30 = vpack.c.bf16 %v3666_v29, %v3664_v28 }
 0x153   :  { %624 = vmatmul.bf16.gmra.mxu2 %v516_v30 }
 0x166   :  { %v590_v31 = vpop.f32.mrf.mxu2 }
 0x167   :  { %v630_v32 = vrot.slane %v590_v31, 4 }
 0x169   :  { %v631_v33 = vmax.f32 %v590_v31, %v630_v32 }
 0x16b   :  { %v632_v34 = vrot.slane %v631_v33, 2 }
 0x16d   :  { %v633_v35 = vmax.f32 %v631_v33, %v632_v34 }
 0x16e   :  { %v592_v36 = vpop.f32.mrf.mxu2 }
 0x16f   :  { %v634_v37 = vrot.slane %v633_v35, 1  ;;  %v636_v38 = vrot.slane %v592_v36, 4 }
 0x171   :  { %v635_v39 = vmax.f32 %v633_v35, %v634_v37  ;;  %v637_v40 = vmax.f32 %v592_v36, %v636_v38 }
 0x173   :  { %v726_v41 = vsub.f32 %v590_v31, %v635_v39  ;;  %v638_v42 = vrot.slane %v637_v40, 2 }
 0x175   :  { %v742_v43 = vmul.f32 1.442695, %v726_v41  ;;  %v639_v56 = vmax.f32 %v637_v40, %v638_v42 }
 0x176   :  { %v595_v44 = vpop.f32.mrf.mxu2 }
 0x177   :  { %3667 = vpow2.f32 %v742_v43  ;;  %v640_v45 = vrot.slane %v639_v56, 1  ;;  %v642_v46 = vrot.slane %v595_v44, 4 }
 0x179   :  { %v641_v47 = vmax.f32 %v639_v56, %v640_v45  ;;  %v643_v48 = vmax.f32 %v595_v44, %v642_v46 }
 0x17b   :  { %v727_v49 = vsub.f32 %v592_v36, %v641_v47  ;;  %v644_v50 = vrot.slane %v643_v48, 2 }
 0x17d   :  { %v4274_v51 = vpop.eup %3667  ;;  %v744_v52 = vmul.f32 1.442695, %v727_v49  ;;  %v645_v53 = vmax.f32 %v643_v48, %v644_v50 }
 0x17e   :  { %v774_v54 = vrot.slane %v4274_v51, 4  ;;  %v597_v55 = vpop.f32.mrf.mxu2 }
 0x17f   :  { %3669 = vpow2.f32 %v744_v52  ;;  %v646_v58 = vrot.slane %v645_v53, 1  ;;  %v648_v59 = vrot.slane %v597_v55, 4 }
 0x180   :  { %v775_v60 = vadd.f32 %v4274_v51, %v774_v54 }
 0x181   :  { %v647_v61 = vmax.f32 %v645_v53, %v646_v58  ;;  %v649_v62 = vmax.f32 %v597_v55, %v648_v59 }
 0x182   :  { %v776_v63 = vrot.slane %v775_v60, 2 }
 0x183   :  { %v728_v0 = vsub.f32 %v595_v44, %v647_v61  ;;  %v650_v1 = vrot.slane %v649_v62, 2 }
 0x184   :  { %v777_v2 = vadd.f32 %v776_v63, %v775_v60 }
 0x185   :  { %v4278_v3 = vpop.eup %3669  ;;  %v746_v4 = vmul.f32 1.442695, %v728_v0  ;;  %v651_v5 = vmax.f32 %v649_v62, %v650_v1 }
 0x186   :  { %v780_v6 = vrot.slane %v4278_v3, 4  ;;  %v600_v7 = vpop.f32.mrf.mxu2  ;;  %v778_v8 = vrot.slane %v777_v2, 1 }
 0x187   :  { %3671 = vpow2.f32 %v746_v4  ;;  %v652_v9 = vrot.slane %v651_v5, 1  ;;  %v654_v10 = vrot.slane %v600_v7, 4 }
 0x188   :  { %v781_v11 = vadd.f32 %v4278_v3, %v780_v6  ;;  %v779_v12 = vadd.f32 %v778_v8, %v777_v2 }
 0x189   :  { %v653_v13 = vmax.f32 %v651_v5, %v652_v9  ;;  %v655_v14 = vmax.f32 %v600_v7, %v654_v10 }
 0x18a   :  { %v782_v15 = vrot.slane %v781_v11, 2  ;;  %3673 = vrcp.f32 %v779_v12  ;;  %v879_v38 = vand.u32 2147483647, %v779_v12  ;;  %v881_v39 = vand.u32 2147483648, %v779_v12 }
 0x18b   :  { %v729_v16 = vsub.f32 %v597_v55, %v653_v13  ;;  %v656_v17 = vrot.slane %v655_v14, 2  ;;  %vm875_vm1 = vweird.f32 %v779_v12 }
 0x18c   :  { %v783_v18 = vadd.f32 %v782_v15, %v781_v11  ;;  %vm880_vm3 = vcmp.eq.f32.partialorder %v879_v38, 8.507059e+37  ;;  %v882_v52 = vor.u32 1.1754944e-38, %v881_v39 }
 0x18d   :  { %v4282_v19 = vpop.eup %3671  ;;  %v748_v21 = vmul.f32 1.442695, %v729_v16  ;;  %v657_v22 = vmax.f32 %v655_v14, %v656_v17 }
 0x18e   :  { %v786_v23 = vrot.slane %v4282_v19, 4  ;;  %v602_v24 = vpop.f32.mrf.mxu2  ;;  %v784_v25 = vrot.slane %v783_v18, 1 }
 0x18f   :  { %3675 = vpow2.f32 %v748_v21  ;;  %v658_v26 = vrot.slane %v657_v22, 1  ;;  %v660_v27 = vrot.slane %v602_v24, 4 }
 0x190   :  { %v3674_v28 = vpop.eup %3673  ;;  %v787_v29 = vadd.f32 %v4282_v19, %v786_v23  ;;  %v4286_v30 = vadd.f32 %v784_v25, %v783_v18 }
 0x191   :  { %v659_v31 = vmax.f32 %v657_v22, %v658_v26  ;;  %v661_v32 = vmax.f32 %v602_v24, %v660_v27  ;;  %v871_v33 = vmul.f32 %v3674_v28, %v779_v12  ;;  %vm876_vm0 = vweird.f32 %v3674_v28 }
 0x192   :  { %3677 = vrcp.f32 %v4286_v30  ;;  %v788_v37 = vrot.slane %v787_v29, 2  ;;  %vm877_vm2 = vmor %vm875_vm1, %vm876_vm0  ;;  %v894_v2 = vand.u32 2147483647, %v4286_v30  ;;  %v896_v4 = vand.u32 2147483648, %v4286_v30 }
 0x193   :  { %v730_v34 = vsub.f32 %v600_v7, %v659_v31  ;;  %v662_v35 = vrot.slane %v661_v32, 2  ;;  %v872_v36 = vsub.f32 1.0, %v871_v33  ;;  %vm890_vm5 = vweird.f32 %v4286_v30 }
 0x194   :  { %v789_v56 = vadd.f32 %v788_v37, %v787_v29  ;;  %v897_v14 = vor.u32 1.1754944e-38, %v896_v4  ;;  %vm895_vm7 = vcmp.eq.f32.partialorder %v894_v2, 8.507059e+37 }
 0x195   :  { %v4289_v40 = vpop.eup %3675  ;;  %v750_v41 = vmul.f32 1.442695, %v730_v34  ;;  %v663_v42 = vmax.f32 %v661_v32, %v662_v35  ;;  %v873_v43 = vmul.f32 %v3674_v28, %v872_v36 }
 0x196   :  { %v792_v44 = vrot.slane %v4289_v40, 4  ;;  %v605_v45 = vpop.f32.mrf.mxu2  ;;  %v790_v53 = vrot.slane %v789_v56, 1 }
 0x197   :  { %3679 = vpow2.f32 %v750_v41  ;;  %v664_v46 = vrot.slane %v663_v42, 1  ;;  %v666_v47 = vrot.slane %v605_v45, 4  ;;  %v874_v48 = vadd.f32 %v3674_v28, %v873_v43 }
 0x198   :  { %v3678_v49 = vpop.eup %3677  ;;  %v793_v50 = vadd.f32 %v4289_v40, %v792_v44  ;;  %v4295_v61 = vadd.f32 %v790_v53, %v789_v56 }
 0x199   :  { %v665_v54 = vmax.f32 %v663_v42, %v664_v46  ;;  %v667_v55 = vmax.f32 %v605_v45, %v666_v47  ;;  %v878_v57 = vsel %vm877_vm2, %v3674_v28, %v874_v48  ;;  %v886_v58 = vmul.f32 %v3678_v49, %v4286_v30 }
 0x19a   :  { %v794_v59 = vrot.slane %v793_v50, 2  ;;  %v883_v60 = vsel %vm880_vm3, %v882_v52, %v878_v57  ;;  %vm891_vm4 = vweird.f32 %v3678_v49  ;;  %3681 = vrcp.f32 %v4295_v61 }
 0x19b   :  { %v731_v62 = vsub.f32 %v602_v24, %v665_v54  ;;  %v668_v63 = vrot.slane %v667_v55, 2  ;;  %v884_v0 = vmul.f32 %v4274_v51, %v883_v60  ;;  %v887_v1 = vsub.f32 1.0, %v886_v58  ;;  %vm892_vm6 = vmor %vm890_vm5, %vm891_vm4 }
 0x19c   :  { %v795_v9 = vadd.f32 %v794_v59, %v793_v50  ;;  %v909_v32 = vand.u32 2147483647, %v4295_v61  ;;  %v911_v33 = vand.u32 2147483648, %v4295_v61  ;;  %vm905_vm9 = vweird.f32 %v4295_v61 }
 0x19d   :  { %v4301_v5 = vpop.eup %3679  ;;  %v752_v6 = vmul.f32 1.442695, %v731_v62  ;;  %v669_v7 = vmax.f32 %v667_v55, %v668_v63  ;;  %1112 = vperm.xlu0 %3630, %v884_v0   ;;  %v888_v8 = vmul.f32 %v3678_v49, %v887_v1 }
 0x19e   :  { %v798_v10 = vrot.slane %v4301_v5, 4  ;;  %v4304_v11 = vpop.f32.mrf.mxu2  ;;  %v796_v15 = vrot.slane %v795_v9, 1  ;;  %v912_v43 = vor.u32 1.1754944e-38, %v911_v33  ;;  %vm910_vm11 = vcmp.eq.f32.partialorder %v909_v32, 8.507059e+37 }
 0x19f   :  { %3683 = vpow2.f32 %v752_v6  ;;  %v670_v51 = vrot.slane %v669_v7, 1  ;;  %v889_v12 = vadd.f32 %v3678_v49, %v888_v8  ;;  %v672_v37 = vrot.slane %v4304_v11, 4 }
 0x1a0   :  { %v799_v13 = vadd.f32 %v4301_v5, %v798_v10  ;;  %v3682_v18 = vpop.eup %3681  ;;  %v797_v23 = vadd.f32 %v796_v15, %v795_v9 }
 0x1a1   :  { %v671_v16 = vmax.f32 %v669_v7, %v670_v51  ;;  %v893_v17 = vsel %vm892_vm6, %v3678_v49, %v889_v12  ;;  %v901_v26 = vmul.f32 %v3682_v18, %v4295_v61  ;;  %vm906_vm8 = vweird.f32 %v3682_v18 }
 0x1a2   :  { %v800_v21 = vrot.slane %v799_v13, 2  ;;  %v898_v22 = vsel %vm895_vm7, %v897_v14, %v893_v17  ;;  %3685 = vrcp.f32 %v797_v23  ;;  %vm907_vm10 = vmor %vm905_vm9, %vm906_vm8  ;;  %v673_v48 = vmax.f32 %v4304_v11, %v672_v37 }
 0x1a3   :  { %v732_v24 = vsub.f32 %v605_v45, %v671_v16  ;;  %v899_v25 = vmul.f32 %v4278_v3, %v898_v22  ;;  %v902_v29 = vsub.f32 1.0, %v901_v26  ;;  %v924_v58 = vand.u32 2147483647, %v797_v23 }
 0x1a4   :  { %v801_v34 = vadd.f32 %v800_v21, %v799_v13  ;;  %v926_v59 = vand.u32 2147483648, %v797_v23  ;;  %v674_v1 = vrot.slane %v673_v48, 2  ;;  %vm920_vm13 = vweird.f32 %v797_v23 }
 0x1a5   :  { %v4311_v27 = vpop.eup %3683  ;;  %v754_v28 = vmul.f32 1.442695, %v732_v24  ;;  %1117 = vperm.xlu0 %3630, %v899_v25   ;;  %v903_v36 = vmul.f32 %v3682_v18, %v902_v29  ;;  %vm925_vm15 = vcmp.eq.f32.partialorder %v924_v58, 8.507059e+37 }
 0x1a6   :  { %v804_v30 = vrot.slane %v4311_v27, 4  ;;  %v610_v31 = vpop.f32.mrf.mxu2  ;;  %v802_v38 = vrot.slane %v801_v34, 1  ;;  %v927_v9 = vor.u32 1.1754944e-38, %v926_v59  ;;  %v675_v15 = vmax.f32 %v673_v48, %v674_v1 }
 0x1a7   :  { %3687 = vpow2.f32 %v754_v28  ;;  %v678_v35 = vrot.slane %v610_v31, 4  ;;  %v904_v41 = vadd.f32 %v3682_v18, %v903_v36 }
 0x1a8   :  { %v805_v3 = vadd.f32 %v4311_v27, %v804_v30  ;;  %v3686_v42 = vpop.eup %3685  ;;  %v4319_v56 = vadd.f32 %v802_v38, %v801_v34 }
 0x1a9   :  { %v679_v39 = vmax.f32 %v610_v31, %v678_v35  ;;  %v908_v46 = vsel %vm907_vm10, %v3682_v18, %v904_v41  ;;  %v916_v47 = vmul.f32 %v3686_v42, %v797_v23  ;;  %vm921_vm12 = vweird.f32 %v3686_v42 }
 0x1aa   :  { %v806_v44 = vrot.slane %v805_v3, 2  ;;  %v913_v49 = vsel %vm910_vm11, %v912_v43, %v908_v46  ;;  %3689 = vrcp.f32 %v4319_v56  ;;  %vm922_vm14 = vmor %vm920_vm13, %vm921_vm12  ;;  %v939_v24 = vand.u32 2147483647, %v4319_v56 }
 0x1ab   :  { %v680_v45 = vrot.slane %v679_v39, 2  ;;  %v914_v53 = vmul.f32 %v4282_v19, %v913_v49  ;;  %v917_v54 = vsub.f32 1.0, %v916_v47  ;;  %v941_v25 = vand.u32 2147483648, %v4319_v56 }
 0x1ac   :  { %v807_v60 = vadd.f32 %v806_v44, %v805_v3  ;;  %vm935_vm1 = vweird.f32 %v4319_v56  ;;  %vm940_vm3 = vcmp.eq.f32.partialorder %v939_v24, 8.507059e+37 }
 0x1ad   :  { %v4323_v50 = vpop.eup %3687  ;;  %v681_v52 = vmax.f32 %v679_v39, %v680_v45  ;;  %1122 = vperm.xlu2 %3631, %v914_v53   ;;  %v918_v63 = vmul.f32 %v3686_v42, %v917_v54  ;;  %v942_v36 = vor.u32 1.1754944e-38, %v941_v25 }
 0x1ae   :  { %v810_v55 = vrot.slane %v4323_v50, 4  ;;  %v612_v57 = vpop.f32.mrf.mxu2  ;;  %v808_v2 = vrot.slane %v807_v60, 1 }
 0x1af   :  { %v682_v61 = vrot.slane %v681_v52, 1  ;;  %v684_v62 = vrot.slane %v612_v57, 4  ;;  %v919_v7 = vadd.f32 %v3686_v42, %v918_v63 }
 0x1b0   :  { %v811_v0 = vadd.f32 %v4323_v50, %v810_v55  ;;  %v3690_v19 = vpop.eup %3689  ;;  %v4328_v10 = vadd.f32 %v808_v2, %v807_v60 }
 0x1b1   :  { %v683_v4 = vmax.f32 %v681_v52, %v682_v61  ;;  %v685_v6 = vmax.f32 %v612_v57, %v684_v62  ;;  %v923_v13 = vsel %vm922_vm14, %v3686_v42, %v919_v7  ;;  %v931_v14 = vmul.f32 %v3690_v19, %v4319_v56 }
 0x1b2   :  { %v812_v8 = vrot.slane %v811_v0, 2  ;;  %v928_v16 = vsel %vm925_vm15, %v927_v9, %v923_v13  ;;  %3691 = vrcp.f32 %v4328_v10  ;;  %vm936_vm0 = vweird.f32 %v3690_v19 }
 0x1b3   :  { %v734_v51 = vsub.f32 %v610_v31, %v683_v4  ;;  %v686_v12 = vrot.slane %v685_v6, 2  ;;  %v929_v21 = vmul.f32 %v4289_v40, %v928_v16  ;;  %v932_v22 = vsub.f32 1.0, %v931_v14  ;;  %vm937_vm2 = vmor %vm935_vm1, %vm936_vm0 }
 0x1b4   :  { %v813_v26 = vadd.f32 %v812_v8, %v811_v0  ;;  %v676_v31 = vrot.slane %v675_v15, 1  ;;  %v954_v52 = vand.u32 2147483647, %v4328_v10  ;;  %v956_v53 = vand.u32 2147483648, %v4328_v10 }
 0x1b5   :  { %v758_v17 = vmul.f32 1.442695, %v734_v51  ;;  %v687_v18 = vmax.f32 %v685_v6, %v686_v12  ;;  %1127 = vperm.xlu0 %3630, %v929_v21   ;;  %v933_v30 = vmul.f32 %v3690_v19, %v932_v22  ;;  %vm950_vm5 = vweird.f32 %v4328_v10 }
 0x1b6   :  { %v4333_v23 = vpop.f32.mrf.mxu2  ;;  %v814_v32 = vrot.slane %v813_v26, 1  ;;  %v677_v42 = vmax.f32 %v675_v15, %v676_v31  ;;  %vm955_vm7 = vcmp.eq.f32.partialorder %v954_v52, 8.507059e+37  ;;  %v957_v0 = vor.u32 1.1754944e-38, %v956_v53 }
 0x1b7   :  { %3693 = vpow2.f32 %v758_v17  ;;  %v688_v28 = vrot.slane %v687_v18, 1  ;;  %v690_v29 = vrot.slane %v4333_v23, 4  ;;  %v934_v34 = vadd.f32 %v3690_v19, %v933_v30 }
 0x1b8   :  { %v3692_v35 = vpop.eup %3691  ;;  %v4341_v3 = vadd.f32 %v814_v32, %v813_v26  ;;  %v733_v58 = vsub.f32 %v4304_v11, %v677_v42 }
 0x1b9   :  { %v689_v33 = vmax.f32 %v687_v18, %v688_v28  ;;  %v691_v40 = vmax.f32 %v4333_v23, %v690_v29  ;;  %v938_v39 = vsel %vm937_vm2, %v3690_v19, %v934_v34  ;;  %v946_v41 = vmul.f32 %v3692_v35, %v4328_v10 }
 0x1ba   :  { %v943_v43 = vsel %vm940_vm3, %v942_v36, %v938_v39  ;;  %3695 = vrcp.f32 %v4341_v3  ;;  %vm951_vm4 = vweird.f32 %v3692_v35  ;;  %v756_v11 = vmul.f32 1.442695, %v733_v58 }
 0x1bb   :  { %v735_v37 = vsub.f32 %v612_v57, %v689_v33  ;;  %v692_v38 = vrot.slane %v691_v40, 2  ;;  %v944_v46 = vmul.f32 %v4301_v5, %v943_v43  ;;  %v947_v47 = vsub.f32 1.0, %v946_v41  ;;  %vm952_vm6 = vmor %vm950_vm5, %vm951_vm4 }
 0x1bc   :  { %v969_v19 = vand.u32 2147483647, %v4341_v3  ;;  %v971_v16 = vand.u32 2147483648, %v4341_v3  ;;  %vm965_vm9 = vweird.f32 %v4341_v3 }
 0x1bd   :  { %v4345_v44 = vpop.eup %3693  ;;  %v760_v45 = vmul.f32 1.442695, %v735_v37  ;;  %v693_v56 = vmax.f32 %v691_v40, %v692_v38  ;;  %1132 = vperm.xlu2 %3631, %v944_v46   ;;  %v948_v57 = vmul.f32 %v3692_v35, %v947_v47 }
 0x1be   :  { %v822_v48 = vrot.slane %v4345_v44, 4  ;;  %v617_v49 = vpop.f32.mrf.mxu2  ;;  %v972_v29 = vor.u32 1.1754944e-38, %v971_v16  ;;  %vm970_vm11 = vcmp.eq.f32.partialorder %v969_v19, 8.507059e+37 }
 0x1bf   :  { %3697 = vpow2.f32 %v760_v45  ;;  %v694_v54 = vrot.slane %v693_v56, 1  ;;  %v696_v55 = vrot.slane %v617_v49, 4  ;;  %v949_v61 = vadd.f32 %v3692_v35, %v948_v57 }
 0x1c0   :  { %v823_v59 = vadd.f32 %v4345_v44, %v822_v48  ;;  %v3696_v62 = vpop.eup %3695 }
 0x1c1   :  { %v695_v60 = vmax.f32 %v693_v56, %v694_v54  ;;  %v697_v5 = vmax.f32 %v617_v49, %v696_v55  ;;  %v953_v4 = vsel %vm952_vm6, %v3692_v35, %v949_v61  ;;  %v961_v6 = vmul.f32 %v3696_v62, %v4341_v3 }
 0x1c2   :  { %v824_v63 = vrot.slane %v823_v59, 2  ;;  %v958_v7 = vsel %vm955_vm7, %v957_v0, %v953_v4  ;;  %vm966_vm8 = vweird.f32 %v3696_v62 }
 0x1c3   :  { %v736_v1 = vsub.f32 %v4333_v23, %v695_v60  ;;  %v698_v2 = vrot.slane %v697_v5, 2  ;;  %v959_v12 = vmul.f32 %v4311_v27, %v958_v7  ;;  %v962_v13 = vsub.f32 1.0, %v961_v6  ;;  %vm967_vm10 = vmor %vm965_vm9, %vm966_vm8 }
 0x1c4   :  { %v825_v8 = vadd.f32 %v824_v63, %v823_v59 }
 0x1c5   :  { %v4358_v9 = vpop.eup %3697  ;;  %v762_v10 = vmul.f32 1.442695, %v736_v1  ;;  %v699_v51 = vmax.f32 %v697_v5, %v698_v2  ;;  %1137 = vperm.xlu1 %3632, %v959_v12   ;;  %v963_v22 = vmul.f32 %v3696_v62, %v962_v13 }
 0x1c6   :  { %v828_v14 = vrot.slane %v4358_v9, 4  ;;  %v620_v15 = vpop.f32.mrf.mxu2  ;;  %v826_v17 = vrot.slane %v825_v8, 1 }
 0x1c7   :  { %3699 = vpow2.f32 %v762_v10  ;;  %v700_v18 = vrot.slane %v699_v51, 1  ;;  %v702_v21 = vrot.slane %v620_v15, 4  ;;  %v964_v27 = vadd.f32 %v3696_v62, %v963_v22 }
 0x1c8   :  { %3701 = vpow2.f32 %v756_v11  ;;  %v829_v23 = vadd.f32 %v4358_v9, %v828_v14  ;;  %v827_v24 = vadd.f32 %v826_v17, %v825_v8 }
 0x1c9   :  { %v701_v25 = vmax.f32 %v699_v51, %v700_v18  ;;  %v703_v26 = vmax.f32 %v620_v15, %v702_v21  ;;  %v968_v32 = vsel %vm967_vm10, %v3696_v62, %v964_v27 }
 0x1ca   :  { %v830_v28 = vrot.slane %v829_v23, 2  ;;  %3703 = vrcp.f32 %v827_v24  ;;  %v973_v33 = vsel %vm970_vm11, %v972_v29, %v968_v32  ;;  %v999_v57 = vand.u32 2147483647, %v827_v24 }
 0x1cb   :  { %v737_v30 = vsub.f32 %v617_v49, %v701_v25  ;;  %v704_v31 = vrot.slane %v703_v26, 2  ;;  %v974_v37 = vmul.f32 %v4323_v50, %v973_v33  ;;  %v1001_v58 = vand.u32 2147483648, %v827_v24 }
 0x1cc   :  { %v831_v40 = vadd.f32 %v830_v28, %v829_v23  ;;  %vm995_vm13 = vweird.f32 %v827_v24  ;;  %vm1000_vm15 = vcmp.eq.f32.partialorder %v999_v57, 8.507059e+37 }
 0x1cd   :  { %v4366_v34 = vpop.eup %3699  ;;  %v764_v35 = vmul.f32 1.442695, %v737_v30  ;;  %v705_v36 = vmax.f32 %v703_v26, %v704_v31  ;;  %1142 = vperm.xlu0 %3630, %v974_v37   ;;  %v1002_v8 = vor.u32 1.1754944e-38, %v1001_v58 }
 0x1ce   :  { %v4369_v38 = vpop.eup %3701  ;;  %v834_v3 = vrot.slane %v4366_v34, 4  ;;  %v622_v39 = vpop.f32.mrf.mxu2  ;;  %v832_v41 = vrot.slane %v831_v40, 1 }
 0x1cf   :  { %3705 = vpow2.f32 %v764_v35  ;;  %v706_v42 = vrot.slane %v705_v36, 1  ;;  %v708_v43 = vrot.slane %v622_v39, 4  ;;  %v816_v50 = vrot.slane %v4369_v38, 4 }
 0x1d0   :  { %v3704_v45 = vpop.eup %3703  ;;  %v835_v56 = vadd.f32 %v4366_v34, %v834_v3  ;;  %v4373_v46 = vadd.f32 %v832_v41, %v831_v40 }
 0x1d1   :  { %v707_v47 = vmax.f32 %v705_v36, %v706_v42  ;;  %v709_v48 = vmax.f32 %v622_v39, %v708_v43  ;;  %v991_v49 = vmul.f32 %v3704_v45, %v827_v24  ;;  %vm996_vm12 = vweird.f32 %v3704_v45 }
 0x1d2   :  { %v836_v52 = vrot.slane %v835_v56, 2  ;;  %3707 = vrcp.f32 %v4373_v46  ;;  %v817_v63 = vadd.f32 %v4369_v38, %v816_v50  ;;  %vm997_vm14 = vmor %vm995_vm13, %vm996_vm12  ;;  %v1014_v24 = vand.u32 2147483647, %v4373_v46 }
 0x1d3   :  { %v738_v53 = vsub.f32 %v620_v15, %v707_v47  ;;  %v710_v54 = vrot.slane %v709_v48, 2  ;;  %v992_v55 = vsub.f32 1.0, %v991_v49  ;;  %v1016_v25 = vand.u32 2147483648, %v4373_v46 }
 0x1d4   :  { %v837_v59 = vadd.f32 %v836_v52, %v835_v56  ;;  %v818_v15 = vrot.slane %v817_v63, 2  ;;  %vm1010_vm1 = vweird.f32 %v4373_v46  ;;  %vm1015_vm3 = vcmp.eq.f32.partialorder %v1014_v24, 8.507059e+37 }
 0x1d5   :  { %v4377_v60 = vpop.eup %3705  ;;  %v766_v5 = vmul.f32 1.442695, %v738_v53  ;;  %v711_v61 = vmax.f32 %v709_v48, %v710_v54  ;;  %v993_v62 = vmul.f32 %v3704_v45, %v992_v55 }
 0x1d6   :  { %v840_v0 = vrot.slane %v4377_v60, 4  ;;  %v4381_v1 = vpop.f32.mrf.mxu2  ;;  %v838_v2 = vrot.slane %v837_v59, 1 }
 0x1d7   :  { %3709 = vpow2.f32 %v766_v5  ;;  %v712_v4 = vrot.slane %v711_v61, 1  ;;  %v714_v6 = vrot.slane %v4381_v1, 4  ;;  %v994_v11 = vadd.f32 %v3704_v45, %v993_v62 }
 0x1d8   :  { %v3708_v7 = vpop.eup %3707  ;;  %v841_v19 = vadd.f32 %v4377_v60, %v840_v0  ;;  %v4385_v10 = vadd.f32 %v838_v2, %v837_v59 }
 0x1d9   :  { %v713_v51 = vmax.f32 %v711_v61, %v712_v4  ;;  %v715_v12 = vmax.f32 %v4381_v1, %v714_v6  ;;  %v998_v13 = vsel %vm997_vm14, %v3704_v45, %v994_v11  ;;  %v1006_v14 = vmul.f32 %v3708_v7, %v4373_v46 }
 0x1da   :  { %v842_v16 = vrot.slane %v841_v19, 2  ;;  %v1003_v17 = vsel %vm1000_vm15, %v1002_v8, %v998_v13  ;;  %3711 = vrcp.f32 %v4385_v10  ;;  %vm1011_vm0 = vweird.f32 %v3708_v7 }
 0x1db   :  { %v739_v18 = vsub.f32 %v622_v39, %v713_v51  ;;  %v716_v21 = vrot.slane %v715_v12, 2  ;;  %v1004_v22 = vmul.f32 %v4345_v44, %v1003_v17  ;;  %v1007_v23 = vsub.f32 1.0, %v1006_v14  ;;  %vm1012_vm2 = vmor %vm1010_vm1, %vm1011_vm0 }
 0x1dc   :  { %v843_v26 = vadd.f32 %v842_v16, %v841_v19  ;;  %v819_v44 = vadd.f32 %v818_v15, %v817_v63  ;;  %v1017_v39 = vor.u32 1.1754944e-38, %v1016_v25  ;;  %v1029_v53 = vand.u32 2147483647, %v4385_v10 }
 0x1dd   :  { %v4393_v27 = vpop.eup %3709  ;;  %v768_v28 = vmul.f32 1.442695, %v739_v18  ;;  %v717_v29 = vmax.f32 %v715_v12, %v716_v21  ;;  %1152 = vperm.xlu1 %3632, %v1004_v22   ;;  %v1008_v30 = vmul.f32 %v3708_v7, %v1007_v23  ;;  %v1031_v54 = vand.u32 2147483648, %v4385_v10 }
 0x1de   :  { %v846_v31 = vrot.slane %v4393_v27, 4  ;;  %v627_v32 = vpop.f32.mrf.mxu2  ;;  %v844_v33 = vrot.slane %v843_v26, 1  ;;  %v820_v57 = vrot.slane %v819_v44, 1  ;;  %vm1025_vm5 = vweird.f32 %v4385_v10 }
 0x1df   :  { %3713 = vpow2.f32 %v768_v28  ;;  %v718_v40 = vrot.slane %v717_v29, 1  ;;  %v720_v35 = vrot.slane %v627_v32, 4  ;;  %v1009_v36 = vadd.f32 %v3708_v7, %v1008_v30 }
 0x1e0   :  { %v3712_v37 = vpop.eup %3711  ;;  %v847_v3 = vadd.f32 %v4393_v27, %v846_v31  ;;  %v4398_v41 = vadd.f32 %v844_v33, %v843_v26  ;;  %v1032_v4 = vor.u32 1.1754944e-38, %v1031_v54  ;;  %v4411_v11 = vadd.f32 %v820_v57, %v819_v44 }
 0x1e1   :  { %v719_v42 = vmax.f32 %v717_v29, %v718_v40  ;;  %v721_v43 = vmax.f32 %v627_v32, %v720_v35  ;;  %v1013_v45 = vsel %vm1012_vm2, %v3708_v7, %v1009_v36  ;;  %v1021_v56 = vmul.f32 %v3712_v37, %v4385_v10 }
 0x1e2   :  { %v848_v46 = vrot.slane %v847_v3, 2  ;;  %v1018_v47 = vsel %vm1015_vm3, %v1017_v39, %v1013_v45  ;;  %3715 = vrcp.f32 %v4398_v41  ;;  %vm1026_vm4 = vweird.f32 %v3712_v37 }
 0x1e3   :  { %v740_v48 = vsub.f32 %v4381_v1, %v719_v42  ;;  %v722_v49 = vrot.slane %v721_v43, 2  ;;  %v1019_v50 = vmul.f32 %v4358_v9, %v1018_v47  ;;  %v1022_v52 = vsub.f32 1.0, %v1021_v56  ;;  %vm1027_vm6 = vmor %vm1025_vm5, %vm1026_vm4 }
 0x1e4   :  { %v849_v55 = vadd.f32 %v848_v46, %v847_v3  ;;  %vm1030_vm7 = vcmp.eq.f32.partialorder %v1029_v53, 8.507059e+37  ;;  %v1046_v15 = vand.u32 2147483648, %v4398_v41  ;;  %v1044_v22 = vand.u32 2147483647, %v4398_v41 }
 0x1e5   :  { %v4406_v58 = vpop.eup %3713  ;;  %v770_v59 = vmul.f32 1.442695, %v740_v48  ;;  %v723_v5 = vmax.f32 %v721_v43, %v722_v49  ;;  %1157 = vperm.xlu1 %3632, %v1019_v50   ;;  %v1023_v61 = vmul.f32 %v3712_v37, %v1022_v52  ;;  %vm1040_vm9 = vweird.f32 %v4398_v41 }
 0x1e6   :  { %v852_v62 = vrot.slane %v4406_v58, 4  ;;  %v850_v63 = vrot.slane %v849_v55, 1  ;;  %v1047_v28 = vor.u32 1.1754944e-38, %v1046_v15  ;;  %vm1045_vm11 = vcmp.eq.f32.partialorder %v1044_v22, 8.507059e+37 }
 0x1e7   :  { %3717 = vpow2.f32 %v770_v59  ;;  %v724_v0 = vrot.slane %v723_v5, 1  ;;  %v1024_v9 = vadd.f32 %v3712_v37, %v1023_v61  ;;  %vm980_vm5 = vweird.f32 %v4411_v11 }
 0x1e8   :  { %v3716_v1 = vpop.eup %3715  ;;  %v853_v2 = vadd.f32 %v4406_v58, %v852_v62  ;;  %v851_v6 = vadd.f32 %v850_v63, %v849_v55 }
 0x1e9   :  { %v725_v7 = vmax.f32 %v723_v5, %v724_v0  ;;  %v1028_v19 = vsel %vm1027_vm6, %v3712_v37, %v1024_v9  ;;  %v1036_v8 = vmul.f32 %v3716_v1, %v4398_v41  ;;  %vm1041_vm8 = vweird.f32 %v3716_v1 }
 0x1ea   :  { %v854_v51 = vrot.slane %v853_v2, 2  ;;  %v1033_v12 = vsel %vm1030_vm7, %v1032_v4, %v1028_v19  ;;  %3719 = vrcp.f32 %v851_v6  ;;  %vm1042_vm10 = vmor %vm1040_vm9, %vm1041_vm8  ;;  %v1061_v36 = vand.u32 2147483648, %v851_v6 }
 0x1eb   :  { %v741_v13 = vsub.f32 %v627_v32, %v725_v7  ;;  %v1034_v14 = vmul.f32 %v4366_v34, %v1033_v12  ;;  %v1037_v10 = vsub.f32 1.0, %v1036_v8  ;;  %3721 = vrcp.f32 %v4411_v11 }
 0x1ec   :  { %v855_v16 = vadd.f32 %v854_v51, %v853_v2  ;;  %v1059_v41 = vand.u32 2147483647, %v851_v6  ;;  %vm1055_vm13 = vweird.f32 %v851_v6  ;;  %v1062_v47 = vor.u32 1.1754944e-38, %v1061_v36  ;;  %v3527_v36 = vld [vmem:[#allocation6 + $0xb0] sm:$0xf0] }
 0x1ed   :  { %v4417_v17 = vpop.eup %3717  ;;  %v772_v18 = vmul.f32 1.442695, %v741_v13  ;;  %1162 = vperm.xlu2 %3631, %v1034_v14   ;;  %v1038_v21 = vmul.f32 %v3716_v1, %v1037_v10  ;;  %v986_v8 = vand.u32 2147483648, %v4411_v11  ;;  %v984_v12 = vand.u32 2147483647, %v4411_v11 }
 0x1ee   :  { %v858_v23 = vrot.slane %v4417_v17, 4  ;;  %v856_v24 = vrot.slane %v855_v16, 1  ;;  %vm1060_vm15 = vcmp.eq.f32.partialorder %v1059_v41, 8.507059e+37 }
 0x1ef   :  { %3723 = vpow2.f32 %v772_v18  ;;  %v1039_v25 = vadd.f32 %v3716_v1, %v1038_v21  ;;  %v987_v18 = vor.u32 1.1754944e-38, %v986_v8  ;;  %vm985_vm8 = vcmp.eq.f32.partialorder %v984_v12, 8.507059e+37  ;;  %v2938_v8 = vld [vmem:[#allocation6 + $0x54] sm:$0xf0] }
 0x1f0   :  { %v3720_v34 = vpop.eup %3719  ;;  %v859_v26 = vadd.f32 %v4417_v17, %v858_v23  ;;  %v857_v29 = vadd.f32 %v856_v24, %v855_v16 }
 0x1f1   :  { %v1043_v30 = vsel %vm1042_vm10, %v3716_v1, %v1039_v25  ;;  %v1051_v31 = vmul.f32 %v3720_v34, %v851_v6  ;;  %v4423_v32 = vpop.eup %3721  ;;  %vm1056_vm12 = vweird.f32 %v3720_v34 }
 0x1f2   :  { %v860_v33 = vrot.slane %v859_v26, 2  ;;  %v1048_v44 = vsel %vm1045_vm11, %v1047_v28, %v1043_v30  ;;  %3725 = vrcp.f32 %v857_v29  ;;  %v976_v42 = vmul.f32 %v4423_v32, %v4411_v11  ;;  %vm1057_vm14 = vmor %vm1055_vm13, %vm1056_vm12 }
 0x1f3   :  { %v1049_v40 = vmul.f32 %v4377_v60, %v1048_v44  ;;  %v1052_v35 = vsub.f32 1.0, %v1051_v31  ;;  %v1076_v59 = vand.u32 2147483648, %v857_v29  ;;  %v1074_v62 = vand.u32 2147483647, %v857_v29 }
 0x1f4   :  { %v861_v37 = vadd.f32 %v860_v33, %v859_v26  ;;  %v977_v52 = vsub.f32 1.0, %v976_v42  ;;  %vm1070_vm1 = vweird.f32 %v857_v29  ;;  %vm981_vm3 = vweird.f32 %v4423_v32 }
 0x1f5   :  { %v4426_v3 = vpop.eup %3723  ;;  %1167 = vperm.xlu1 %3632, %v1049_v40   ;;  %v1053_v39 = vmul.f32 %v3720_v34, %v1052_v35  ;;  %v1077_v2 = vor.u32 1.1754944e-38, %v1076_v59  ;;  %vm1075_vm4 = vcmp.eq.f32.partialorder %v1074_v62, 8.507059e+37  ;;  %vm982_vm6 = vmor %vm980_vm5, %vm981_vm3  ;;  %v2948_v59 = vld [vmem:[#allocation6 + $0x60] sm:$0xf]  ;;  %vm1422_vm3 = vcmask 1044484  }
 0x1f6   :  { %v864_v43 = vrot.slane %v4426_v3, 4  ;;  %v862_v45 = vrot.slane %v861_v37, 1  ;;  %v978_v63 = vmul.f32 %v4423_v32, %v977_v52  ;;  %v3520_v52 = vld [vmem:[#allocation6 + $0x7c] sm:$0xf]  ;;  %vm1426_vm5 = vcmask 1046534  }
 0x1f7   :  { %v1054_v56 = vadd.f32 %v3720_v34, %v1053_v39  ;;  %v2986_v39 = vld [vmem:[#allocation6 + $0xb4] sm:$0xf0] }
 0x1f8   :  { %v3726_v46 = vpop.eup %3725  ;;  %v865_v60 = vadd.f32 %v4426_v3, %v864_v43  ;;  %v863_v48 = vadd.f32 %v862_v45, %v861_v37  ;;  %v2972_v43 = vld [vmem:[#allocation6 + $0x90] sm:$0xf]  ;;  %v3524_v45 = vld [vmem:[#allocation6 + $0x98] sm:$0xf0] }
 0x1f9   :  { %v1058_v49 = vsel %vm1057_vm14, %v3720_v34, %v1054_v56  ;;  %v1066_v50 = vmul.f32 %v3726_v46, %v857_v29  ;;  %vm1071_vm0 = vweird.f32 %v3726_v46  ;;  %v3523_v56 = vld [vmem:[#allocation6 + $0x94] sm:$0xf] }
 0x1fa   :  { %v866_v53 = vrot.slane %v865_v60, 2  ;;  %v1063_v54 = vsel %vm1060_vm15, %v1062_v47, %v1058_v49  ;;  %3727 = vrcp.f32 %v863_v48  ;;  %vm1072_vm2 = vmor %vm1070_vm1, %vm1071_vm0  ;;  %v1091_v14 = vand.u32 2147483648, %v863_v48 }
 0x1fb   :  { %v1064_v55 = vmul.f32 %v4393_v27, %v1063_v54  ;;  %v1067_v57 = vsub.f32 1.0, %v1066_v50  ;;  %v979_v27 = vadd.f32 %v4423_v32, %v978_v63  ;;  %v1089_v16 = vand.u32 2147483647, %v863_v48  ;;  %v3521_v50 = vld [vmem:[#allocation6 + $0x80] sm:$0xf0] }
 0x1fc   :  { %v867_v5 = vadd.f32 %v866_v53, %v865_v60  ;;  %vm1085_vm9 = vweird.f32 %v863_v48  ;;  %v2974_v60 = vld [vmem:[#allocation6 + $0x9c] sm:$0xf0]  ;;  %v2962_v54 = vld [vmem:[#allocation6 + $0x84] sm:$0xf0]  ;;  %v2950_v63 = vld [vmem:[#allocation6 + $0x6c] sm:$0xf0] }
 0x1fd   :  { %1172 = vperm.xlu0 %3630, %v1064_v55   ;;  %v1068_v61 = vmul.f32 %v3726_v46, %v1067_v57  ;;  %v983_v10 = vsel %vm982_vm6, %v4423_v32, %v979_v27  ;;  %vm1090_vm11 = vcmp.eq.f32.partialorder %v1089_v16, 8.507059e+37  ;;  %v2965_v55 = vor.u32 %v3520_v52, %v2962_v54  ;;  %v3515_v27 = vld [vmem:[#allocation6 + $0x50] sm:$0xf0] }
 0x1fe   :  { %v868_v0 = vrot.slane %v867_v5, 1  ;;  %v988_v23 = vsel %vm985_vm8, %v987_v18, %v983_v10  ;;  %v3512_v10 = vld [vmem:[#allocation6 + $0x38] sm:$0xf0]  ;;  %v2926_v18 = vld [vmem:[#allocation6 + $0x3c] sm:$0xf0]  ;;  %vm1416_vm0 = vcmask 1041409  }
 0x1ff   :  { %v1069_v9 = vadd.f32 %v3726_v46, %v1068_v61  ;;  %v989_v34 = vmul.f32 %v4369_v38, %v988_v23  ;;  %v2984_v38 = vld [vmem:[#allocation6 + $0xa8] sm:$0xf]  ;;  %v3517_v61 = vld [vmem:[#allocation6 + $0x64] sm:$0xf]  ;;  %vm1418_vm1 = vcmask 1042434   ;;  %vm1428_vm6 = vcmask 1047559  }
 0x200   :  { %v3728_v1 = vpop.eup %3727  ;;  %v869_v4 = vadd.f32 %v868_v0, %v867_v5  ;;  %v2985_v37 = vor.u32 %v3527_v36, %v2984_v38  ;;  %v3518_v5 = vld [vmem:[#allocation6 + $0x68] sm:$0xf0]  ;;  %v2902_v38 = vld [vmem:[#allocation6 + $0xc] sm:$0xf0] }
 0x201   :  { %v1073_v6 = vsel %vm1072_vm2, %v3726_v46, %v1069_v9  ;;  %v1081_v7 = vmul.f32 %v3728_v1, %v863_v48  ;;  %vm1086_vm7 = vweird.f32 %v3728_v1  ;;  %v2973_v46 = vor.u32 %v3524_v45, %v2972_v43  ;;  %v2992_v45 = vld [vmem:[#allocation6 + $0xb0] sm:$0xf] }
 0x202   :  { %v1078_v19 = vsel %vm1075_vm4, %v1077_v2, %v1073_v6  ;;  %3729 = vrcp.f32 %v869_v4  ;;  %vm1087_vm10 = vmor %vm1085_vm9, %vm1086_vm7  ;;  %v1106_v29 = vand.u32 2147483648, %v869_v4  ;;  %v1104_v31 = vand.u32 2147483647, %v869_v4  ;;  %1567 = vmatpush.bf16.msra.mxu3 %v2985_v37  ;;  %v2936_v6 = vld [vmem:[#allocation6 + $0x48] sm:$0xf] }
 0x203   :  { %v1079_v51 = vmul.f32 %v4406_v58, %v1078_v19  ;;  %v1082_v13 = vsub.f32 1.0, %v1081_v7  ;;  %v1092_v58 = vor.u32 1.1754944e-38, %v1091_v14  ;;  %vm1100_vm13 = vweird.f32 %v869_v4  ;;  %v3514_v7 = vld [vmem:[#allocation6 + $0x4c] sm:$0xf]  ;;  %v2924_v14 = vld [vmem:[#allocation6 + $0x30] sm:$0xf] }
 0x204   :  { %v1107_v33 = vor.u32 1.1754944e-38, %v1106_v29  ;;  %vm1105_vm15 = vcmp.eq.f32.partialorder %v1104_v31, 8.507059e+37  ;;  %v2977_v48 = vor.u32 %v3523_v56, %v2974_v60  ;;  %v2949_v62 = vor.u32 %v3518_v5, %v2948_v59  ;;  %v3188_v29 = vld [vmem:[#allocation7 + $0xb0] sm:$0xf]  ;;  %v3528_v56 = vld [vmem:[#allocation6 + $0xb8] sm:$0xf0] }
 0x205   :  { %1177 = vperm.xlu2 %3631, %v1079_v51   ;;  %v1083_v15 = vmul.f32 %v3728_v1, %v1082_v13  ;;  %v2953_v9 = vor.u32 %v3517_v61, %v2950_v63  ;;  %v2937_v19 = vor.u32 %v3515_v27, %v2936_v6  ;;  %v2941_v51 = vor.u32 %v3514_v7, %v2938_v8  ;;  %v2980_v61 = vld [vmem:[#allocation6 + $0x98] sm:$0xf]  ;;  %v3072_v63 = vld [vmem:[#allocation4 + $0x90] sm:$0xf]  ;;  %v3500_v27 = vld [vmem:[#allocation4 + $0x98] sm:$0xf0] }
 0x206   :  { %1568 = vmatpush.bf16.msra.mxu3 %v2973_v46  ;;  %v2925_v16 = vor.u32 %v3512_v10, %v2924_v14  ;;  %v3084_v46 = vld [vmem:[#allocation4 + $0xa8] sm:$0xf]  ;;  %v3779_v10 = vld [vmem:[%s4758_s3 + $0x58] sm:$0xff]  ;;  %vm1420_vm2 = vcmask 1043459   ;;  %vm1424_vm4 = vcmask 1045509  }
 0x207   :  { %v1084_v21 = vadd.f32 %v3728_v1, %v1083_v15  ;;  %v1123_v47 = vpop.permute.xlu2 %1122  ;;  %v3511_v15 = vld [vmem:[#allocation6 + $0x34] sm:$0xf] }
 0x208   :  { %v3730_v22 = vpop.eup %3729 }
 0x209   :  { %v1088_v24 = vsel %vm1087_vm10, %v3728_v1, %v1084_v21  ;;  %v1096_v11 = vmul.f32 %v3730_v22, %v869_v4  ;;  %vm1101_vm12 = vweird.f32 %v3730_v22  ;;  %v3771_v1 = vld [vmem:[%s4758_s3 + $0x10] sm:$0xff] }
 0x20a   :  { %v1093_v25 = vsel %vm1090_vm11, %v1092_v58, %v1088_v24  ;;  %vm1102_vm14 = vmor %vm1100_vm13, %vm1101_vm12  ;;  %v1192_v2 = vmul.f32 %v3771_v1, %v1123_v47  ;;  %v3772_v58 = vld [vmem:[%s4758_s3] sm:$0xff]  ;;  %v2993_v47 = vor.u32 %v3528_v56, %v2992_v45  ;;  %v3494_v56 = vld [vmem:[#allocation4 + $0x68] sm:$0xf0] }
 0x20b   :  { %v1094_v26 = vmul.f32 %v4417_v17, %v1093_v25  ;;  %v1097_v28 = vsub.f32 1.0, %v1096_v11  ;;  %v3526_v17 = vld [vmem:[#allocation6 + $0xac] sm:$0xf]  ;;  %v2912_v11 = vld [vmem:[#allocation6 + $0x18] sm:$0xf] }
 0x20c   :  { %v2989_v42 = vor.u32 %v3526_v17, %v2986_v39  ;;  %v1218_v12 = vrot.slane %v1192_v2, 4  ;;  %v3509_v25 = vld [vmem:[#allocation6 + $0x20] sm:$0xf0]  ;;  %v3773_v39 = vld [vmem:[%s4758_s3 + $0x8] sm:$0xff] }
 0x20d   :  { %1147 = vperm.xlu2 %3631, %v989_v34   ;;  %1182 = vperm.xlu1 %3632, %v1094_v26   ;;  %v1098_v30 = vmul.f32 %v3730_v22, %v1097_v28  ;;  %v2913_v34 = vor.u32 %v3509_v25, %v2912_v11  ;;  %v3508_v26 = vld [vmem:[#allocation6 + $0x1c] sm:$0xf]  ;;  %v2914_v28 = vld [vmem:[#allocation6 + $0x24] sm:$0xf0] }
 0x20e   :  { %1581 = vmatpush.bf16.msrb.mxu0 %v2989_v42  ;;  %v1219_v23 = vadd.f32 %v1218_v12, %v1192_v2  ;;  %v2917_v31 = vor.u32 %v3508_v26, %v2914_v28  ;;  %v3777_v2 = vld [vmem:[%s4758_s3 + $0x18] sm:$0xff]  ;;  %v3781_v26 = vld [vmem:[%s4758_s3 + $0x28] sm:$0xff] }
 0x20f   :  { %v1099_v32 = vadd.f32 %v3730_v22, %v1098_v30  ;;  %v1113_v41 = vpop.permute.xlu0 %1112 }
 0x210   :  { %v1190_v24 = vmul.f32 %v3772_v58, %v1113_v41  ;;  %v1220_v36 = vrot.slane %v1219_v23, 2 }
 0x211   :  { %v1103_v44 = vsel %vm1102_vm14, %v3730_v22, %v1099_v32  ;;  %v2929_v22 = vor.u32 %v3511_v15, %v2926_v18  ;;  %v3552_v32 = vld [vmem:[#allocation7 + $0xb8] sm:$0xf0]  ;;  %v2968_v18 = vld [vmem:[#allocation6 + $0x80] sm:$0xf] }
 0x212   :  { %v1108_v40 = vsel %vm1105_vm15, %v1107_v33, %v1103_v44  ;;  %1582 = vmatpush.bf16.msrb.mxu0 %v2977_v48  ;;  %v2900_v33 = vld [vmem:[#allocation6] sm:$0xf]  ;;  %v3506_v44 = vld [vmem:[#allocation6 + $0x8] sm:$0xf0]  ;;  %v1206_v17 = vrot.slane %v1190_v24, 4 }
 0x213   :  { %v1109_v35 = vmul.f32 %v4426_v3, %v1108_v40  ;;  %v2960_v3 = vld [vmem:[#allocation6 + $0x78] sm:$0xf]  ;;  %v3189_v40 = vor.u32 %v3552_v32, %v3188_v29  ;;  %v2901_v37 = vor.u32 %v3506_v44, %v2900_v33  ;;  %v3503_v48 = vld [vmem:[#allocation4 + $0xb0] sm:$0xf0] }
 0x214   :  { %v2961_v53 = vor.u32 %v3521_v50, %v2960_v3  ;;  %v1221_v3 = vadd.f32 %v1220_v36, %v1219_v23  ;;  %v4457_v50 = vadd.f32 %v1206_v17, %v1190_v24  ;;  %v3085_v59 = vor.u32 %v3503_v48, %v3084_v46  ;;  %v3060_v23 = vld [vmem:[#allocation4 + $0x78] sm:$0xf]  ;;  %v3782_v29 = vld [vmem:[%s4758_s3 + $0x30] sm:$0xff] }
 0x215   :  { %1187 = vperm.xlu0 %3630, %v1109_v35   ;;  %v3505_v35 = vld [vmem:[#allocation6 + $0x4] sm:$0xf]  ;;  %1996 = vmatpush.bf16.msrb.mxu1 %v3189_v40  ;;  %v3783_v40 = vld [vmem:[%s4758_s3 + $0x68] sm:$0xff]  ;;  %v3784_v48 = vld [vmem:[%s4758_s3 + $0x38] sm:$0xff] }
 0x216   :  { %1569 = vmatpush.bf16.msra.mxu3 %v2961_v53  ;;  %1583 = vmatpush.bf16.msrb.mxu0 %v2965_v55  ;;  %v2905_v43 = vor.u32 %v3505_v35, %v2902_v38  ;;  %v3774_v53 = vld [vmem:[%s4758_s3 + $0x40] sm:$0xff]  ;;  %v3775_v55 = vld [vmem:[%s4758_s3 + $0x48] sm:$0xff]  ;;  %v1222_v7 = vrot.slane %v1221_v3, 1  ;;  %v1208_v12 = vrot.slane %v4457_v50, 2 }
 0x217   :  { %v1118_v57 = vpop.permute.xlu0 %1117  ;;  %v4446_v0 = vpop.permute.xlu2 %1132 }
 0x218   :  { %v1191_v41 = vmul.f32 %v3773_v39, %v1118_v57  ;;  %v1223_v17 = vadd.f32 %v1222_v7, %v1221_v3  ;;  %v3048_v39 = vld [vmem:[#allocation4 + $0x60] sm:$0xf]  ;;  %v3036_v7 = vld [vmem:[#allocation4 + $0x48] sm:$0xf] }
 0x21a   :  { %1570 = vmatpush.bf16.msra.mxu3 %v2949_v62  ;;  %1584 = vmatpush.bf16.msrb.mxu0 %v2953_v9  ;;  %v1212_v52 = vrot.slane %v1191_v41, 4  ;;  %v3525_v62 = vld [vmem:[#allocation6 + $0xa0] sm:$0xf0] }
 0x21b   :  { %v3776_v9 = vld [vmem:[%s4758_s3 + $0x20] sm:$0xff]  ;;  %v2981_v6 = vor.u32 %v3525_v62, %v2980_v61  ;;  %v3176_v61 = vld [vmem:[#allocation7 + $0x98] sm:$0xf] }
 0x21c   :  { %v4469_v1 = vmul.f32 %v3776_v9, %v4446_v0  ;;  %v3549_v62 = vld [vmem:[#allocation7 + $0xa0] sm:$0xf0] }
 0x21e   :  { %1571 = vmatpush.bf16.msra.mxu3 %v2937_v19  ;;  %1585 = vmatpush.bf16.msrb.mxu0 %v2941_v51  ;;  %v3778_v19 = vld [vmem:[%s4758_s3 + $0x50] sm:$0xff]  ;;  %v3073_v51 = vor.u32 %v3500_v27, %v3072_v63  ;;  %v1230_v58 = vrot.slane %v4469_v1, 4  ;;  %v3516_v27 = vld [vmem:[#allocation6 + $0x58] sm:$0xf0] }
 0x21f   :  { %v2944_v63 = vld [vmem:[#allocation6 + $0x50] sm:$0xf] }
 0x222   :  { %1572 = vmatpush.bf16.msra.mxu3 %v2925_v16  ;;  %1586 = vmatpush.bf16.msrb.mxu0 %v2929_v22  ;;  %v1213_v16 = vadd.f32 %v1212_v52, %v1191_v41  ;;  %v3522_v22 = vld [vmem:[#allocation6 + $0x88] sm:$0xf0]  ;;  %v3049_v52 = vor.u32 %v3494_v56, %v3048_v39 }
 0x223   :  { %v2969_v25 = vor.u32 %v3522_v22, %v2968_v18  ;;  %v3488_v22 = vld [vmem:[#allocation4 + $0x38] sm:$0xf0]  ;;  %v3546_v56 = vld [vmem:[#allocation7 + $0x88] sm:$0xf0] }
 0x224   :  { %v1214_v41 = vrot.slane %v1213_v16, 2 }
 0x226   :  { %1573 = vmatpush.bf16.msra.mxu3 %v2913_v34  ;;  %1587 = vmatpush.bf16.msrb.mxu0 %v2917_v31  ;;  %v3497_v34 = vld [vmem:[#allocation4 + $0x80] sm:$0xf0]  ;;  %v4501_v9 = vadd.f32 %v1214_v41, %v1213_v16  ;;  %v3024_v16 = vld [vmem:[#allocation4 + $0x30] sm:$0xf] }
 0x227   :  { %v1128_v13 = vpop.permute.xlu0 %1127  ;;  %v3061_v32 = vor.u32 %v3497_v34, %v3060_v23  ;;  %v3025_v34 = vor.u32 %v3488_v22, %v3024_v16  ;;  %v3785_v41 = vld [vmem:[%s4758_s3 + $0x70] sm:$0xff] }
 0x22a   :  { %1574 = vmatpush.bf16.msra.mxu3 %v2901_v37  ;;  %1588 = vmatpush.bf16.msrb.mxu0 %v2905_v43  ;;  %v2956_v37 = vld [vmem:[#allocation6 + $0x68] sm:$0xf] }
 0x22e   :  { %1595 = vmatpush.bf16.msrb.mxu3 %v2993_v47  ;;  %1743 = vmatpush.bf16.msra.mxu0 %v3085_v59  ;;  %v4499_v59 = vadd.f32 %v1208_v12, %v4457_v50  ;;  %v2932_v50 = vld [vmem:[#allocation6 + $0x38] sm:$0xf]  ;;  %v3513_v12 = vld [vmem:[#allocation6 + $0x40] sm:$0xf0] }
 0x232   :  { %1596 = vmatpush.bf16.msrb.mxu3 %v2981_v6  ;;  %1744 = vmatpush.bf16.msra.mxu0 %v3073_v51  ;;  %v3177_v6 = vor.u32 %v3549_v62, %v3176_v61 }
 0x234   :  { %1997 = vmatpush.bf16.msrb.mxu1 %v3177_v6 }
 0x236   :  { %1597 = vmatpush.bf16.msrb.mxu3 %v2969_v25  ;;  %1745 = vmatpush.bf16.msra.mxu0 %v3061_v32 }
 0x237   :  { %v4444_v49 = vpop.permute.xlu1 %1137 }
 0x238   :  { %v1195_v28 = vmul.f32 %v3781_v26, %v4444_v49  ;;  %v3519_v49 = vld [vmem:[#allocation6 + $0x70] sm:$0xf0]  ;;  %v2920_v26 = vld [vmem:[#allocation6 + $0x20] sm:$0xf] }
 0x23a   :  { %v1236_v46 = vrot.slane %v1195_v28, 4  ;;  %1746 = vmatpush.bf16.msra.mxu0 %v3049_v52 }
 0x23f   :  { %v1143_v42 = vpop.permute.xlu0 %1142 }
 0x247   :  { %v1163_v21 = vpop.permute.xlu2 %1162 }
 0x248   :  { %v1200_v8 = vmul.f32 %v3778_v19, %v1163_v21  ;;  %v3780_v21 = vld [vmem:[%s4758_s3 + $0x60] sm:$0xff]  ;;  %v3491_v19 = vld [vmem:[#allocation4 + $0x50] sm:$0xf0] }
 0x24a   :  { %v1266_v31 = vrot.slane %v1200_v8, 4 }
 0x24f   :  { %v1153_v4 = vpop.permute.xlu1 %1152 }
 0x250   :  { %v1198_v54 = vmul.f32 %v3774_v53, %v1153_v4  ;;  %v1193_v4 = vmul.f32 %v3777_v2, %v1128_v13  ;;  %v1267_v53 = vadd.f32 %v1266_v31, %v1200_v8  ;;  %v1231_v2 = vadd.f32 %v1230_v58, %v4469_v1 }
 0x252   :  { %v1254_v14 = vrot.slane %v1198_v54, 4  ;;  %v1224_v24 = vrot.slane %v1193_v4, 4 }
 0x254   :  { %v1255_v33 = vadd.f32 %v1254_v14, %v1198_v54  ;;  %v1225_v43 = vadd.f32 %v1224_v24, %v1193_v4  ;;  %v2945_v14 = vor.u32 %v3516_v27, %v2944_v63  ;;  %v2933_v24 = vor.u32 %v3513_v12, %v2932_v50 }
 0x256   :  { %v1256_v54 = vrot.slane %v1255_v33, 2  ;;  %v1226_v8 = vrot.slane %v1225_v43, 2 }
 0x257   :  { %v1158_v30 = vpop.permute.xlu1 %1157 }
 0x258   :  { %v1199_v57 = vmul.f32 %v3775_v55, %v1158_v30  ;;  %v1196_v30 = vmul.f32 %v3782_v29, %v1143_v42  ;;  %v2957_v42 = vor.u32 %v3519_v49, %v2956_v37  ;;  %v1257_v18 = vadd.f32 %v1256_v54, %v1255_v33  ;;  %v3012_v33 = vld [vmem:[#allocation4 + $0x18] sm:$0xf]  ;;  %v3164_v49 = vld [vmem:[#allocation7 + $0x80] sm:$0xf] }
 0x259   :  { %v1216_v29 = vrot.slane %v4501_v9, 1  ;;  %v1227_v31 = vadd.f32 %v1226_v8, %v1225_v43  ;;  %v3165_v52 = vor.u32 %v3546_v56, %v3164_v49 }
 0x25a   :  { %v1260_v0 = vrot.slane %v1199_v57, 4  ;;  %v1242_v47 = vrot.slane %v1196_v30, 4  ;;  %1598 = vmatpush.bf16.msrb.mxu3 %v2957_v42 }
 0x25b   :  { %v1217_v61 = vadd.f32 %v1216_v29, %v4501_v9  ;;  %v1228_v62 = vrot.slane %v1227_v31, 1  ;;  %1998 = vmatpush.bf16.msrb.mxu1 %v3165_v52  ;;  %v3543_v52 = vld [vmem:[#allocation7 + $0x70] sm:$0xf0] }
 0x25c   :  { %v1261_v44 = vadd.f32 %v1260_v0, %v1199_v57  ;;  %v1304_v57 = vpack.c.bf16 %v1223_v17, %v1223_v17  ;;  %v3037_v0 = vor.u32 %v3491_v19, %v3036_v7  ;;  %v1258_v17 = vrot.slane %v1257_v18, 1 }
 0x25d   :  { %v1303_v9 = vpack.c.bf16 %v1217_v61, %v1217_v61 }
 0x25e   :  { %v1262_v3 = vrot.slane %v1261_v44, 2  ;;  %v4504_v1 = vunpack.c.l.b16 %v1304_v57  ;;  %1599 = vmatpush.bf16.msrb.mxu3 %v2945_v14  ;;  %1747 = vmatpush.bf16.msra.mxu0 %v3037_v0  ;;  %v3000_v57 = vld [vmem:[#allocation4] sm:$0xf] }
 0x25f   :  { %v1178_v60 = vpop.permute.xlu2 %1177 }
 0x260   :  { %v1203_v35 = vmul.f32 %v3783_v40, %v1178_v60  ;;  %v1263_v23 = vadd.f32 %v1262_v3, %v1261_v44  ;;  %v3485_v40 = vld [vmem:[#allocation4 + $0x20] sm:$0xf0] }
 0x262   :  { %v1284_v55 = vrot.slane %v1203_v35, 4  ;;  %v1264_v39 = vrot.slane %v1263_v23, 1  ;;  %1600 = vmatpush.bf16.msrb.mxu3 %v2933_v24  ;;  %1748 = vmatpush.bf16.msra.mxu0 %v3025_v34 }
 0x267   :  { %v1168_v5 = vpop.permute.xlu1 %1167  ;;  %v1148_v36 = vpop.permute.xlu2 %1147 }
 0x268   :  { %v1201_v15 = vmul.f32 %v3779_v10, %v1168_v5  ;;  %v1197_v60 = vmul.f32 %v3784_v48, %v1148_v36  ;;  %v1237_v10 = vadd.f32 %v1236_v46, %v1195_v28  ;;  %v3510_v28 = vld [vmem:[#allocation6 + $0x28] sm:$0xf0]  ;;  %v2908_v48 = vld [vmem:[#allocation6 + $0x8] sm:$0xf] }
 0x269   :  { %v2921_v42 = vor.u32 %v3510_v28, %v2920_v26 }
 0x26a   :  { %v1272_v38 = vrot.slane %v1201_v15, 4  ;;  %v1248_v51 = vrot.slane %v1197_v60, 4 }
 0x26b   :  { %1601 = vmatpush.bf16.msrb.mxu3 %v2921_v42 }
 0x26c   :  { %v1273_v5 = vadd.f32 %v1272_v38, %v1201_v15  ;;  %v1243_v15 = vadd.f32 %v1242_v47, %v1196_v30  ;;  %v1232_v30 = vrot.slane %v1231_v2, 2  ;;  %v1249_v32 = vadd.f32 %v1248_v51, %v1197_v60  ;;  %v3507_v60 = vld [vmem:[#allocation6 + $0x10] sm:$0xf0] }
 0x26d   :  { %v1238_v38 = vrot.slane %v1237_v10, 2  ;;  %v3013_v47 = vor.u32 %v3485_v40, %v3012_v33  ;;  %v2909_v19 = vor.u32 %v3507_v60, %v2908_v48  ;;  %v1259_v51 = vadd.f32 %v1258_v17, %v1257_v18  ;;  %v3786_v18 = vld [vmem:[%s4758_s3 + $0x78] sm:$0xff]  ;;  %v3152_v60 = vld [vmem:[#allocation7 + $0x68] sm:$0xf] }
 0x26e   :  { %v1274_v58 = vrot.slane %v1273_v5, 2  ;;  %v1244_v44 = vrot.slane %v1243_v15, 2  ;;  %v1233_v54 = vadd.f32 %v1232_v30, %v1231_v2  ;;  %v1250_v3 = vrot.slane %v1249_v32, 2 }
 0x26f   :  { %v1173_v13 = vpop.permute.xlu0 %1172  ;;  %v1239_v63 = vadd.f32 %v1238_v38, %v1237_v10  ;;  %1749 = vmatpush.bf16.msra.mxu0 %v3013_v47  ;;  %v1229_v10 = vadd.f32 %v1228_v62, %v1227_v31  ;;  %1602 = vmatpush.bf16.msrb.mxu3 %v2909_v19  ;;  %v1401_v31 = vunpack.c.l.b16 %v1303_v9 }
 0x270   :  { %v1202_v11 = vmul.f32 %v3780_v21, %v1173_v13  ;;  %v1268_v13 = vrot.slane %v1267_v53, 2  ;;  %v1210_v21 = vrot.slane %v4499_v59, 1  ;;  %v1245_v6 = vadd.f32 %v1244_v44, %v1243_v15 }
 0x271   :  { %v1251_v50 = vadd.f32 %v1250_v3, %v1249_v32  ;;  %v1240_v15 = vrot.slane %v1239_v63, 1  ;;  %v1305_v33 = vpack.c.bf16 %v1229_v10, %v1229_v10  ;;  %v3502_v10 = vld [vmem:[#allocation4 + $0xac] sm:$0xf] }
 0x272   :  { %v1278_v45 = vrot.slane %v1202_v11, 4  ;;  %v1269_v36 = vadd.f32 %v1268_v13, %v1267_v53  ;;  %v1211_v53 = vadd.f32 %v1210_v21, %v4499_v59  ;;  %v1234_v13 = vrot.slane %v1233_v54, 1 }
 0x273   :  { %v1246_v21 = vrot.slane %v1245_v6, 1  ;;  %v1252_v28 = vrot.slane %v1251_v50, 1  ;;  %v1241_v40 = vadd.f32 %v1240_v15, %v1239_v63  ;;  %v1403_v47 = vunpack.c.l.b16 %v1305_v33  ;;  %v3086_v15 = vld [vmem:[#allocation4 + $0xb4] sm:$0xf0]  ;;  %v3140_v33 = vld [vmem:[#allocation7 + $0x50] sm:$0xf] }
 0x274   :  { %v1279_v4 = vadd.f32 %v1278_v45, %v1202_v11  ;;  %v1285_v11 = vadd.f32 %v1284_v55, %v1203_v35  ;;  %v1275_v35 = vadd.f32 %v1274_v58, %v1273_v5  ;;  %v3482_v5 = vld [vmem:[#allocation4 + $0x8] sm:$0xf0]  ;;  %v1270_v8 = vrot.slane %v1269_v36, 1 }
 0x275   :  { %v3001_v2 = vor.u32 %v3482_v5, %v3000_v57  ;;  %v1302_v14 = vpack.c.bf16 %v1211_v53, %v1211_v53  ;;  %v1235_v32 = vadd.f32 %v1234_v13, %v1233_v54  ;;  %v1247_v49 = vadd.f32 %v1246_v21, %v1245_v6 }
 0x276   :  { %v1280_v25 = vrot.slane %v1279_v4, 2  ;;  %v1286_v43 = vrot.slane %v1285_v11, 2  ;;  %v1276_v27 = vrot.slane %v1275_v35, 1  ;;  %v1253_v42 = vadd.f32 %v1252_v28, %v1251_v50  ;;  %v3499_v28 = vld [vmem:[#allocation4 + $0x94] sm:$0xf] }
 0x277   :  { %1750 = vmatpush.bf16.msra.mxu0 %v3001_v2  ;;  %v1400_v38 = vunpack.c.l.b16 %v1302_v14  ;;  %v1307_v48 = vpack.c.bf16 %v1241_v40, %v1241_v40  ;;  %v1308_v57 = vpack.c.bf16 %v1247_v49, %v1247_v49  ;;  %v3540_v40 = vld [vmem:[#allocation7 + $0x58] sm:$0xf0]  ;;  %v3062_v49 = vld [vmem:[#allocation4 + $0x84] sm:$0xf0] }
 0x278   :  { %v1281_v46 = vadd.f32 %v1280_v25, %v1279_v4  ;;  %v1265_v4 = vadd.f32 %v1264_v39, %v1263_v23  ;;  %v1287_v0 = vadd.f32 %v1286_v43, %v1285_v11  ;;  %v1277_v23 = vadd.f32 %v1276_v27, %v1275_v35 }
 0x279   :  { %v1271_v11 = vadd.f32 %v1270_v8, %v1269_v36  ;;  %v1310_v25 = vpack.c.bf16 %v1259_v51, %v1259_v51  ;;  %v1417_v43 = vsel %vm1416_vm0, %v1401_v31, %v1400_v38  ;;  %v1309_v6 = vpack.c.bf16 %v1253_v42, %v1253_v42  ;;  %v3080_v31 = vld [vmem:[#allocation4 + $0x98] sm:$0xf]  ;;  %v3050_v42 = vld [vmem:[#allocation4 + $0x6c] sm:$0xf0] }
 0x27a   :  { %v1282_v59 = vrot.slane %v1281_v46, 1  ;;  %v1311_v22 = vpack.c.bf16 %v1265_v4, %v1265_v4  ;;  %v1288_v26 = vrot.slane %v1287_v0, 1  ;;  %v1313_v17 = vpack.c.bf16 %v1277_v23, %v1277_v23 }
 0x27b   :  { %v1312_v39 = vpack.c.bf16 %v1271_v11, %v1271_v11  ;;  %v1408_v36 = vunpack.c.l.b16 %v1310_v25  ;;  %v1405_v51 = vunpack.c.l.b16 %v1307_v48  ;;  %v1406_v14 = vunpack.c.l.b16 %v1308_v57  ;;  %v3490_v48 = vld [vmem:[#allocation4 + $0x4c] sm:$0xf]  ;;  %v3487_v57 = vld [vmem:[#allocation4 + $0x34] sm:$0xf] }
 0x27c   :  { %v1283_v34 = vadd.f32 %v1282_v59, %v1281_v46  ;;  %v1409_v44 = vunpack.c.l.b16 %v1311_v22  ;;  %v1306_v46 = vpack.c.bf16 %v1235_v32, %v1235_v32  ;;  %v1411_v54 = vunpack.c.l.b16 %v1313_v17  ;;  %v3504_v22 = vld [vmem:[#allocation4 + $0xb8] sm:$0xf0]  ;;  %v3501_v32 = vld [vmem:[#allocation4 + $0xa0] sm:$0xf0] }
 0x27d   :  { %v1410_v5 = vunpack.c.l.b16 %v1312_v39  ;;  %v1407_v9 = vunpack.c.l.b16 %v1309_v6  ;;  %v3496_v17 = vld [vmem:[#allocation4 + $0x7c] sm:$0xf]  ;;  %v3068_v39 = vld [vmem:[#allocation4 + $0x80] sm:$0xf]  ;;  %v3537_v6 = vld [vmem:[#allocation7 + $0x40] sm:$0xf0] }
 0x27e   :  { %v1314_v35 = vpack.c.bf16 %v1283_v34, %v1283_v34  ;;  %v1430_v53 = vsel %vm1416_vm0, %v1409_v44, %v1408_v36  ;;  %v1404_v27 = vunpack.c.l.b16 %v1306_v46  ;;  %v3089_v34 = vor.u32 %v3502_v10, %v3086_v15  ;;  %v3551_v10 = vld [vmem:[#allocation7 + $0xb0] sm:$0xf0]  ;;  %v3182_v15 = vld [vmem:[#allocation7 + $0xb4] sm:$0xf0] }
 0x27f   :  { %v1183_v37 = vpop.permute.xlu1 %1182  ;;  %v1431_v19 = vsel %vm1418_vm1, %v1410_v5, %v1430_v53  ;;  %v3081_v44 = vor.u32 %v3501_v32, %v3080_v31  ;;  %v3492_v53 = vld [vmem:[#allocation4 + $0x58] sm:$0xf0]  ;;  %v3026_v5 = vld [vmem:[#allocation4 + $0x3c] sm:$0xf0] }
 0x280   :  { %v1204_v45 = vmul.f32 %v3785_v41, %v1183_v37  ;;  %v1412_v61 = vunpack.c.l.b16 %v1314_v35  ;;  %v1432_v59 = vsel %vm1420_vm2, %v1411_v54, %v1431_v19  ;;  %v3498_v35 = vld [vmem:[#allocation4 + $0x88] sm:$0xf0]  ;;  %v4534_v54 = vld [vmem:[%s4759_s26] sm:$0xff]  ;;  %v3484_v19 = vld [vmem:[#allocation4 + $0x1c] sm:$0xf] }
 0x281   :  { %v3069_v36 = vor.u32 %v3498_v35, %v3068_v39 }
 0x282   :  { %v1290_v55 = vrot.slane %v1204_v45, 4 }
 0x284   :  { %v1291_v7 = vadd.f32 %v1290_v55, %v1204_v45  ;;  %v1289_v45 = vadd.f32 %v1288_v26, %v1287_v0  ;;  %v3153_v55 = vor.u32 %v3543_v52, %v3152_v60  ;;  %v1433_v0 = vsel %vm1422_vm3, %v1412_v61, %v1432_v59  ;;  %v3038_v60 = vld [vmem:[#allocation4 + $0x54] sm:$0xf0]  ;;  %v3044_v52 = vld [vmem:[#allocation4 + $0x50] sm:$0xf]  ;;  %v3486_v59 = vld [vmem:[#allocation4 + $0x28] sm:$0xf0] }
 0x285   :  { %v3032_v61 = vld [vmem:[#allocation4 + $0x38] sm:$0xf] }
 0x286   :  { %v1292_v12 = vrot.slane %v1291_v7, 2  ;;  %v1315_v63 = vpack.c.bf16 %v1289_v45, %v1289_v45  ;;  %1999 = vmatpush.bf16.msrb.mxu1 %v3153_v55  ;;  %v3493_v45 = vld [vmem:[#allocation4 + $0x64] sm:$0xf]  ;;  %v3045_v55 = vor.u32 %v3492_v53, %v3044_v52  ;;  %v3539_v53 = vld [vmem:[#allocation7 + $0x50] sm:$0xf0] }
 0x287   :  { %v1188_v16 = vpop.permute.xlu0 %1187  ;;  %v3053_v46 = vor.u32 %v3493_v45, %v3050_v42  ;;  %v3542_v45 = vld [vmem:[#allocation7 + $0x68] sm:$0xf0]  ;;  %v3541_v42 = vld [vmem:[#allocation7 + $0x64] sm:$0xf] }
 0x288   :  { %v1293_v58 = vadd.f32 %v1292_v12, %v1291_v7  ;;  %v1205_v24 = vmul.f32 %v3786_v18, %v1188_v16  ;;  %v1419_v7 = vsel %vm1418_vm1, %v4504_v1, %v1417_v43  ;;  %v1413_v12 = vunpack.c.l.b16 %v1315_v63  ;;  %v3092_v16 = vld [vmem:[#allocation4 + $0xb0] sm:$0xf]  ;;  %v3495_v43 = vld [vmem:[#allocation4 + $0x70] sm:$0xf0]  ;;  %v3128_v63 = vld [vmem:[#allocation7 + $0x38] sm:$0xf] }
 0x289   :  { %v1421_v8 = vsel %vm1420_vm2, %v1403_v47, %v1419_v7  ;;  %v3093_v26 = vor.u32 %v3504_v22, %v3092_v16 }
 0x28a   :  { %v1294_v29 = vrot.slane %v1293_v58, 1  ;;  %v1296_v30 = vrot.slane %v1205_v24, 4  ;;  %v1423_v1 = vsel %vm1422_vm3, %v1404_v27, %v1421_v8  ;;  %v1434_v18 = vsel %vm1424_vm4, %v1413_v12, %v1433_v0  ;;  %v3014_v8 = vld [vmem:[#allocation4 + $0x24] sm:$0xf0]  ;;  %v3481_v0 = vld [vmem:[#allocation4 + $0x4] sm:$0xf] }
 0x28b   :  { %v1425_v23 = vsel %vm1424_vm4, %v1405_v51, %v1423_v1  ;;  %v3029_v27 = vor.u32 %v3487_v57, %v3026_v5  ;;  %v3020_v51 = vld [vmem:[#allocation4 + $0x20] sm:$0xf]  ;;  %v3008_v12 = vld [vmem:[#allocation4 + $0x8] sm:$0xf]  ;;  %v3550_v1 = vld [vmem:[#allocation7 + $0xac] sm:$0xf] }
 0x28c   :  { %v1297_v37 = vadd.f32 %v1296_v30, %v1205_v24  ;;  %v1295_v41 = vadd.f32 %v1294_v29, %v1293_v58  ;;  %v1427_v24 = vsel %vm1426_vm5, %v1406_v14, %v1425_v23  ;;  %v3074_v30 = vld [vmem:[#allocation4 + $0x9c] sm:$0xf0]  ;;  %v3021_v14 = vor.u32 %v3486_v59, %v3020_v51  ;;  %v3120_v5 = vld [vmem:[#allocation7 + $0x30] sm:$0xf] }
 0x28d   :  { %v1429_v11 = vsel %vm1428_vm6, %v1407_v9, %v1427_v24  ;;  %v3077_v38 = vor.u32 %v3499_v28, %v3074_v30  ;;  %v3483_v9 = vld [vmem:[#allocation4 + $0x10] sm:$0xf0]  ;;  %v3548_v24 = vld [vmem:[#allocation7 + $0x98] sm:$0xf0]  ;;  %v3104_v28 = vld [vmem:[#allocation7 + $0x8] sm:$0xf] }
 0x28e   :  { %v1298_v56 = vrot.slane %v1297_v37, 2  ;;  %v1316_v62 = vpack.c.bf16 %v1295_v41, %v1295_v41  ;;  %v3065_v41 = vor.u32 %v3496_v17, %v3062_v49  ;;  %v3009_v22 = vor.u32 %v3483_v9, %v3008_v12  ;;  %v3544_v17 = vld [vmem:[#allocation7 + $0x7c] sm:$0xf] }
 0x290   :  { %v1299_v3 = vadd.f32 %v1298_v56, %v1297_v37  ;;  %v1414_v50 = vunpack.c.l.b16 %v1316_v62  ;;  %v3141_v37 = vor.u32 %v3540_v40, %v3140_v33  ;;  %v3056_v56 = vld [vmem:[#allocation4 + $0x68] sm:$0xf]  ;;  %v3489_v62 = vld [vmem:[#allocation4 + $0x40] sm:$0xf0]  ;;  %v3531_v33 = vld [vmem:[#allocation7 + $0x10] sm:$0xf0] }
 0x291   :  { %v3057_v47 = vor.u32 %v3495_v43, %v3056_v56  ;;  %v3033_v7 = vor.u32 %v3489_v62, %v3032_v61  ;;  %v3280_v40 = vld [vmem:[#allocation9 + $0xa8] sm:$0xf]  ;;  %v3105_v39 = vor.u32 %v3531_v33, %v3104_v28  ;;  %v3146_v56 = vld [vmem:[#allocation7 + $0x6c] sm:$0xf0]  ;;  %v4543_v43 = vld [vmem:[%s4757_s24] sm:$0xff] }
 0x292   :  { %v1300_v4 = vrot.slane %v1299_v3, 1  ;;  %v1435_v21 = vsel %vm1426_vm5, %v1414_v50, %v1434_v18  ;;  %2000 = vmatpush.bf16.msrb.mxu1 %v3141_v37  ;;  %v3002_v50 = vld [vmem:[#allocation4 + $0xc] sm:$0xf0]  ;;  %v3158_v37 = vld [vmem:[#allocation7 + $0x84] sm:$0xf0] }
 0x293   :  { %v3005_v16 = vor.u32 %v3481_v0, %v3002_v50  ;;  %v3168_v18 = vld [vmem:[#allocation7 + $0x90] sm:$0xf]  ;;  %v3536_v61 = vld [vmem:[#allocation7 + $0x38] sm:$0xf0]  ;;  %v3535_v62 = vld [vmem:[#allocation7 + $0x34] sm:$0xf] }
 0x294   :  { %v1301_v2 = vadd.f32 %v1300_v4, %v1299_v3  ;;  %v3041_v3 = vor.u32 %v3490_v48, %v3038_v60  ;;  %v3129_v4 = vor.u32 %v3537_v6, %v3128_v63  ;;  %v3169_v30 = vor.u32 %v3548_v24, %v3168_v18  ;;  %v3132_v60 = vld [vmem:[#allocation7 + $0x48] sm:$0xf]  ;;  %v3122_v63 = vld [vmem:[#allocation7 + $0x3c] sm:$0xf0]  ;;  %v3529_v0 = vld [vmem:[#allocation7 + $0x4] sm:$0xf] }
 0x295   :  { %v3149_v48 = vor.u32 %v3541_v42, %v3146_v56  ;;  %v3121_v6 = vor.u32 %v3536_v61, %v3120_v5  ;;  %v3098_v50 = vld [vmem:[#allocation7 + $0xc] sm:$0xf0]  ;;  %v3244_v18 = vld [vmem:[#allocation9 + $0x60] sm:$0xf]  ;;  %v3566_v24 = vld [vmem:[#allocation9 + $0x68] sm:$0xf0] }
 0x296   :  { %v1317_v13 = vpack.c.bf16 %v1301_v2, %v1301_v2  ;;  %2001 = vmatpush.bf16.msrb.mxu1 %v3129_v4  ;;  %v3017_v2 = vor.u32 %v3484_v19, %v3014_v8  ;;  %v3125_v4 = vor.u32 %v3535_v62, %v3122_v63  ;;  %v3532_v19 = vld [vmem:[#allocation7 + $0x1c] sm:$0xf]  ;;  %v3110_v8 = vld [vmem:[#allocation7 + $0x24] sm:$0xf0]  ;;  %v3101_v9 = vor.u32 %v3529_v0, %v3098_v50  ;;  %v3276_v56 = vld [vmem:[#allocation9 + $0x98] sm:$0xf] }
 0x297   :  { %v3113_v59 = vor.u32 %v3532_v19, %v3110_v8  ;;  %v3264_v63 = vld [vmem:[#allocation9 + $0x80] sm:$0xf]  ;;  %v3574_v50 = vld [vmem:[#allocation9 + $0xac] sm:$0xf] }
 0x298   :  { %v1415_v58 = vunpack.c.l.b16 %v1317_v13  ;;  %v3180_v13 = vld [vmem:[#allocation7 + $0xa8] sm:$0xf] }
 0x299   :  { %v3181_v23 = vor.u32 %v3551_v10, %v3180_v13  ;;  %v3268_v13 = vld [vmem:[#allocation9 + $0x90] sm:$0xf]  ;;  %v3572_v10 = vld [vmem:[#allocation9 + $0x98] sm:$0xf0] }
 0x29a   :  { %v1436_v25 = vsel %vm1428_vm6, %v1415_v58, %v1435_v21  ;;  %v3185_v58 = vor.u32 %v3550_v1, %v3182_v15  ;;  %v3547_v21 = vld [vmem:[#allocation7 + $0x94] sm:$0xf]  ;;  %v3269_v1 = vor.u32 %v3572_v10, %v3268_v13  ;;  %v3256_v15 = vld [vmem:[#allocation9 + $0x78] sm:$0xf] }
 0x29b   :  { %v4527_v29 = vpack.c.b16 %v1436_v25, %v1429_v11  ;;  %v3170_v11 = vld [vmem:[#allocation7 + $0x9c] sm:$0xf0]  ;;  %v3156_v25 = vld [vmem:[#allocation7 + $0x78] sm:$0xf] }
 0x29c   :  { %v3173_v31 = vor.u32 %v3547_v21, %v3170_v11  ;;  %v3245_v21 = vor.u32 %v3566_v24, %v3244_v18  ;;  %v3240_v24 = vld [vmem:[#allocation9 + $0x50] sm:$0xf] }
 0x29d   :  { %1575 = vmatmul.bf16.vlgmr.msra.gmra.mxu3 %v4527_v29  ;;  %1589 = vmatmul.bf16.vlgmr.msrb.gmra.mxu0 %v4527_v29 }
 0x29e   :  { %1757 = vmatpush.bf16.msra.mxu3 %v3089_v34  ;;  %1771 = vmatpush.bf16.msrb.mxu0 %v3093_v26  ;;  %v3116_v34 = vld [vmem:[#allocation7 + $0x20] sm:$0xf]  ;;  %v3534_v26 = vld [vmem:[#allocation7 + $0x28] sm:$0xf0] }
 0x29f   :  { %v3117_v32 = vor.u32 %v3534_v26, %v3116_v34 }
 0x2a1   :  { %2002 = vmatpush.bf16.msrb.mxu1 %v3117_v32 }
 0x2a2   :  { %1758 = vmatpush.bf16.msra.mxu3 %v3077_v38  ;;  %1772 = vmatpush.bf16.msrb.mxu0 %v3081_v44  ;;  %v3575_v38 = vld [vmem:[#allocation9 + $0xb0] sm:$0xf0]  ;;  %v3545_v44 = vld [vmem:[#allocation7 + $0x80] sm:$0xf0] }
 0x2a3   :  { %v3281_v49 = vor.u32 %v3575_v38, %v3280_v40  ;;  %v3157_v35 = vor.u32 %v3545_v44, %v3156_v25  ;;  %v3232_v40 = vld [vmem:[#allocation9 + $0x48] sm:$0xf]  ;;  %v3563_v38 = vld [vmem:[#allocation9 + $0x50] sm:$0xf0]  ;;  %v4563_v44 = vld [vmem:[%s4736_s11] sm:$0x7] }
 0x2a4   :  { %v1834_v62 = vperm.slane %v4563_v44, 0 }
 0x2a5   :  { %2275 = vmatpush.bf16.msrb.mxu2 %v3281_v49  ;;  %2003 = vmatpush.bf16.msrb.mxu1 %v3105_v39  ;;  %v3576_v49 = vld [vmem:[#allocation9 + $0xb8] sm:$0xf0]  ;;  %v4568_v39 = vld [vmem:[%s4735_s10] sm:$0x7] }
 0x2a6   :  { %1759 = vmatpush.bf16.msra.mxu3 %v3065_v41  ;;  %1773 = vmatpush.bf16.msrb.mxu0 %v3069_v36  ;;  %v3161_v41 = vor.u32 %v3544_v17, %v3158_v37  ;;  %v3144_v36 = vld [vmem:[#allocation7 + $0x60] sm:$0xf]  ;;  %v3233_v17 = vor.u32 %v3563_v38, %v3232_v40  ;;  %v3288_v37 = vld [vmem:[#allocation9 + $0xb0] sm:$0xf]  ;;  %v1787_v5 = vperm.slane %v4568_v39, 0 }
 0x2a7   :  { %v3270_v38 = vld [vmem:[#allocation9 + $0x9c] sm:$0xf0] }
 0x2a9   :  { %2276 = vmatpush.bf16.msrb.mxu2 %v3269_v1 }
 0x2aa   :  { %1760 = vmatpush.bf16.msra.mxu3 %v3053_v46  ;;  %1774 = vmatpush.bf16.msrb.mxu0 %v3057_v47  ;;  %v4548_v46 = vld [vmem:[%s4757_s24 + $0x8] sm:$0xff]  ;;  %v3145_v47 = vor.u32 %v3542_v45, %v3144_v36  ;;  %v1788_v36 = vperm.slane %v4568_v39, 1  ;;  %v1835_v45 = vperm.slane %v4563_v44, 1 }
 0x2ab   :  { %v1799_v52 = vpack.c.bf16 %v4548_v46, %v4543_v43 }
 0x2ad   :  { %1603 = vmatmul.bf16.vlgmr.msrb.gmra.mxu3 %v4527_v29  ;;  %1751 = vmatmul.bf16.vlgmr.msra.gmra.mxu0 %v4534_v54 }
 0x2ae   :  { %1761 = vmatpush.bf16.msra.mxu3 %v3041_v3  ;;  %1775 = vmatpush.bf16.msrb.mxu0 %v3045_v55  ;;  %v3134_v3 = vld [vmem:[#allocation7 + $0x54] sm:$0xf0]  ;;  %v3133_v55 = vor.u32 %v3539_v53, %v3132_v60 }
 0x2af   :  { %2004 = vmatmul.bf16.vlgmr.msrb.gmra.mxu1 %v1799_v52 }
 0x2b2   :  { %1762 = vmatpush.bf16.msra.mxu3 %v3029_v27  ;;  %1776 = vmatpush.bf16.msrb.mxu0 %v3033_v7  ;;  %v3108_v27 = vld [vmem:[#allocation7 + $0x18] sm:$0xf]  ;;  %v3533_v7 = vld [vmem:[#allocation7 + $0x20] sm:$0xf0] }
 0x2b3   :  { %v3109_v51 = vor.u32 %v3533_v7, %v3108_v27 }
 0x2b6   :  { %1763 = vmatpush.bf16.msra.mxu3 %v3017_v2  ;;  %1777 = vmatpush.bf16.msrb.mxu0 %v3021_v14  ;;  %v3096_v2 = vld [vmem:[#allocation7] sm:$0xf]  ;;  %v3530_v14 = vld [vmem:[#allocation7 + $0x8] sm:$0xf0] }
 0x2b7   :  { %v3097_v12 = vor.u32 %v3530_v14, %v3096_v2  ;;  %v3567_v2 = vld [vmem:[#allocation9 + $0x70] sm:$0xf0] }
 0x2ba   :  { %1764 = vmatpush.bf16.msra.mxu3 %v3005_v16  ;;  %1778 = vmatpush.bf16.msrb.mxu0 %v3009_v22  ;;  %v3569_v16 = vld [vmem:[#allocation9 + $0x80] sm:$0xf0] }
 0x2bb   :  { %v3257_v22 = vor.u32 %v3569_v16, %v3256_v15 }
 0x2bd   :  { %1765 = vmatmul.bf16.vlgmr.msra.gmra.mxu3 %v4534_v54  ;;  %1779 = vmatmul.bf16.vlgmr.msrb.gmra.mxu0 %v4534_v54  ;;  %v3538_v54 = vld [vmem:[#allocation7 + $0x4c] sm:$0xf] }
 0x2be   :  { %1968 = vmatpush.bf16.msrb.mxu3 %v3181_v23  ;;  %1982 = vmatpush.bf16.msra.mxu0 %v3185_v58  ;;  %v3137_v57 = vor.u32 %v3538_v54, %v3134_v3  ;;  %v3220_v54 = vld [vmem:[#allocation9 + $0x30] sm:$0xf]  ;;  %v3560_v3 = vld [vmem:[#allocation9 + $0x38] sm:$0xf0] }
 0x2bf   :  { %2277 = vmatpush.bf16.msrb.mxu2 %v3257_v22 }
 0x2c2   :  { %1969 = vmatpush.bf16.msrb.mxu3 %v3169_v30  ;;  %1983 = vmatpush.bf16.msra.mxu0 %v3173_v31 }
 0x2c3   :  { %2278 = vmatpush.bf16.msrb.mxu2 %v3245_v21  ;;  %v3564_v21 = vld [vmem:[#allocation9 + $0x58] sm:$0xf0] }
 0x2c4   :  { %v3241_v40 = vor.u32 %v3564_v21, %v3240_v24  ;;  %v3340_v24 = vld [vmem:[#allocation10 + $0x60] sm:$0xf]  ;;  %v3590_v21 = vld [vmem:[#allocation10 + $0x68] sm:$0xf0] }
 0x2c6   :  { %1970 = vmatpush.bf16.msrb.mxu3 %v3157_v35  ;;  %1984 = vmatpush.bf16.msra.mxu0 %v3161_v41  ;;  %v3289_v35 = vor.u32 %v3576_v49, %v3288_v37 }
 0x2c7   :  { %2279 = vmatpush.bf16.msrb.mxu2 %v3233_v17  ;;  %v3376_v17 = vld [vmem:[#allocation10 + $0xa8] sm:$0xf] }
 0x2ca   :  { %1971 = vmatpush.bf16.msrb.mxu3 %v3145_v47  ;;  %1985 = vmatpush.bf16.msra.mxu0 %v3149_v48  ;;  %v3573_v47 = vld [vmem:[#allocation9 + $0xa0] sm:$0xf0] }
 0x2cb   :  { %v3277_v60 = vor.u32 %v3573_v47, %v3276_v56  ;;  %v3568_v47 = vld [vmem:[#allocation9 + $0x7c] sm:$0xf] }
 0x2ce   :  { %1972 = vmatpush.bf16.msrb.mxu3 %v3133_v55  ;;  %1986 = vmatpush.bf16.msra.mxu0 %v3137_v57  ;;  %v3221_v55 = vor.u32 %v3560_v3, %v3220_v54  ;;  %v3596_v54 = vld [vmem:[#allocation10 + $0x98] sm:$0xf0] }
 0x2d0   :  { %2280 = vmatpush.bf16.msrb.mxu2 %v3221_v55 }
 0x2d2   :  { %1973 = vmatpush.bf16.msrb.mxu3 %v3121_v6  ;;  %1987 = vmatpush.bf16.msra.mxu0 %v3125_v4  ;;  %v3570_v6 = vld [vmem:[#allocation9 + $0x88] sm:$0xf0] }
 0x2d3   :  { %v3265_v4 = vor.u32 %v3570_v6, %v3264_v63  ;;  %v3565_v6 = vld [vmem:[#allocation9 + $0x64] sm:$0xf] }
 0x2d6   :  { %1974 = vmatpush.bf16.msrb.mxu3 %v3109_v51  ;;  %1988 = vmatpush.bf16.msra.mxu0 %v3113_v59  ;;  %v3252_v59 = vld [vmem:[#allocation9 + $0x68] sm:$0xf] }
 0x2d7   :  { %v3253_v0 = vor.u32 %v3567_v2, %v3252_v59  ;;  %v3554_v2 = vld [vmem:[#allocation9 + $0x8] sm:$0xf0] }
 0x2da   :  { %1975 = vmatpush.bf16.msrb.mxu3 %v3097_v12  ;;  %1989 = vmatpush.bf16.msra.mxu0 %v3101_v9  ;;  %v3282_v12 = vld [vmem:[#allocation9 + $0xb4] sm:$0xf0] }
 0x2db   :  { %v3285_v1 = vor.u32 %v3574_v50, %v3282_v12  ;;  %v3204_v12 = vld [vmem:[#allocation9 + $0x8] sm:$0xf] }
 0x2dd   :  { %1976 = vmatmul.bf16.vlgmr.msrb.gmra.mxu3 %v1799_v52  ;;  %1990 = vmatmul.bf16.vlgmr.msra.gmra.mxu0 %v1799_v52 }
 0x2de   :  { %2303 = vmatpush.bf16.msrb.mxu0 %v3289_v35  ;;  %2289 = vmatpush.bf16.msra.mxu3 %v3285_v1  ;;  %v3234_v1 = vld [vmem:[#allocation9 + $0x54] sm:$0xf0] }
 0x2e2   :  { %2304 = vmatpush.bf16.msrb.mxu0 %v3277_v60 }
 0x2e6   :  { %2305 = vmatpush.bf16.msrb.mxu0 %v3265_v4  ;;  %v3246_v4 = vld [vmem:[#allocation9 + $0x6c] sm:$0xf0] }
 0x2ea   :  { %2306 = vmatpush.bf16.msrb.mxu0 %v3253_v0 }
 0x2ee   :  { %2307 = vmatpush.bf16.msrb.mxu0 %v3241_v40  ;;  %v3222_v40 = vld [vmem:[#allocation9 + $0x3c] sm:$0xf0] }
 0x31a   :  { %v1590_v23 = vpop.f32.mrf.mxu0 }
 0x320   :  { %v1576_v58 = vpop.f32.mrf.mxu3 }
 0x322   :  { %v1592_v11 = vpop.f32.mrf.mxu0 }
 0x328   :  { %v1578_v25 = vpop.f32.mrf.mxu3 }
 0x32a   :  { %v1752_v34 = vpop.f32.mrf.mxu0 }
 0x32b   :  { %v1753_v57 = vadd.f32 %v1752_v34, %v1576_v58  ;;  %v3557_v58 = vld [vmem:[#allocation9 + $0x20] sm:$0xf0] }
 0x32d   :  { %v1793_v8 = vadd.f32 %v1787_v5, %v1753_v57 }
 0x330   :  { %v4552_v26 = vpop.f32.mrf.mxu3 }
 0x332   :  { %v1754_v28 = vpop.f32.mrf.mxu0 }
 0x333   :  { %v1755_v15 = vadd.f32 %v1754_v28, %v1578_v25  ;;  %v3599_v28 = vld [vmem:[#allocation10 + $0xb0] sm:$0xf0] }
 0x335   :  { %v1796_v35 = vadd.f32 %v1787_v5, %v1755_v15  ;;  %v3216_v5 = vld [vmem:[#allocation9 + $0x20] sm:$0xf] }
 0x338   :  { %v4554_v30 = vpop.f32.mrf.mxu3 }
 0x33a   :  { %v4556_v31 = vpop.f32.mrf.mxu0 }
 0x340   :  { %v1766_v32 = vpop.f32.mrf.mxu3 }
 0x341   :  { %v1767_v41 = vadd.f32 %v1766_v32, %v1590_v23  ;;  %v3208_v23 = vld [vmem:[#allocation9 + $0x18] sm:$0xf] }
 0x342   :  { %v4558_v33 = vpop.f32.mrf.mxu0  ;;  %v3209_v18 = vor.u32 %v3557_v58, %v3208_v23  ;;  %v3616_v23 = vld [vmem:[#allocation13 + $0x38] sm:$0xff] }
 0x343   :  { %v1794_v52 = vadd.f32 %v1788_v36, %v1767_v41 }
 0x344   :  { %2281 = vmatpush.bf16.msrb.mxu2 %v3209_v18 }
 0x348   :  { %v1768_v42 = vpop.f32.mrf.mxu3 }
 0x349   :  { %v1769_v27 = vadd.f32 %v1768_v42, %v1592_v11  ;;  %v3571_v11 = vld [vmem:[#allocation9 + $0x94] sm:$0xf]  ;;  %v3561_v42 = vld [vmem:[#allocation9 + $0x40] sm:$0xf0] }
 0x34a   :  { %v3273_v25 = vor.u32 %v3571_v11, %v3270_v38  ;;  %v3559_v11 = vld [vmem:[#allocation9 + $0x34] sm:$0xf] }
 0x34b   :  { %v1797_v9 = vadd.f32 %v1788_v36, %v1769_v27  ;;  %v3377_v36 = vor.u32 %v3599_v28, %v3376_v17  ;;  %v3595_v38 = vld [vmem:[#allocation10 + $0x94] sm:$0xf]  ;;  %v3366_v17 = vld [vmem:[#allocation10 + $0x9c] sm:$0xf0]  ;;  %v3225_v28 = vor.u32 %v3559_v11, %v3222_v40 }
 0x34c   :  { %2290 = vmatpush.bf16.msra.mxu3 %v3273_v25  ;;  %v3613_v40 = vld [vmem:[#allocation13 + $0x20] sm:$0xff] }
 0x34d   :  { %2485 = vmatpush.bf16.msra.mxu1 %v3377_v36  ;;  %v3328_v36 = vld [vmem:[#allocation10 + $0x48] sm:$0xf] }
 0x35a   :  { %v1991_v48 = vpop.f32.mrf.mxu0 }
 0x35b   :  { %v1992_v53 = vadd.f32 %v1991_v48, %v1835_v45  ;;  %v3258_v48 = vld [vmem:[#allocation9 + $0x84] sm:$0xf0] }
 0x35d   :  { %v2050_v61 = vadd.f32 %v1992_v53, %v1794_v52  ;;  %v3261_v52 = vor.u32 %v3568_v47, %v3258_v48  ;;  %v3364_v53 = vld [vmem:[#allocation10 + $0x90] sm:$0xf]  ;;  %v3556_v47 = vld [vmem:[#allocation9 + $0x1c] sm:$0xf]  ;;  %v3210_v48 = vld [vmem:[#allocation9 + $0x24] sm:$0xf0] }
 0x35e   :  { %v3365_v3 = vor.u32 %v3596_v54, %v3364_v53  ;;  %v3354_v54 = vld [vmem:[#allocation10 + $0x84] sm:$0xf0] }
 0x35f   :  { %v3192_v7 = vmul.f32 -1.442695, %v2050_v61  ;;  %v3558_v61 = vld [vmem:[#allocation9 + $0x28] sm:$0xf0]  ;;  %2291 = vmatpush.bf16.msra.mxu3 %v3261_v52  ;;  %v1789_v52 = vperm.slane %v4568_v39, 2 }
 0x360   :  { %v1977_v19 = vpop.f32.mrf.mxu3  ;;  %v3217_v63 = vor.u32 %v3558_v61, %v3216_v5  ;;  %2486 = vmatpush.bf16.msra.mxu1 %v3365_v3  ;;  %v2005_v5 = vpop.f32.mrf.mxu1 }
 0x361   :  { %3731 = vpow2.f32 %v3192_v7  ;;  %v1978_v51 = vadd.f32 %v1977_v19, %v1834_v62  ;;  %v3249_v7 = vor.u32 %v3565_v6, %v3246_v4  ;;  %v3352_v19 = vld [vmem:[#allocation10 + $0x78] sm:$0xf]  ;;  %v3584_v6 = vld [vmem:[#allocation10 + $0x38] sm:$0xf0] }
 0x362   :  { %v1993_v14 = vpop.f32.mrf.mxu0 }
 0x363   :  { %v2010_v13 = vadd.f32 %v1978_v51, %v1793_v8  ;;  %v1994_v10 = vadd.f32 %v1993_v14, %v1835_v45  ;;  %v3228_v45 = vld [vmem:[#allocation9 + $0x38] sm:$0xf]  ;;  %v3593_v8 = vld [vmem:[#allocation10 + $0x80] sm:$0xf0]  ;;  %v3196_v51 = vld [vmem:[#allocation9] sm:$0xf]  ;;  %2292 = vmatpush.bf16.msra.mxu3 %v3249_v7  ;;  %v3213_v7 = vor.u32 %v3556_v47, %v3210_v48 }
 0x364   :  { %v3229_v56 = vor.u32 %v3561_v42, %v3228_v45  ;;  %v3353_v0 = vor.u32 %v3593_v8, %v3352_v19  ;;  %v3197_v50 = vor.u32 %v3554_v2, %v3196_v51  ;;  %v3587_v45 = vld [vmem:[#allocation10 + $0x50] sm:$0xf0]  ;;  %v3614_v8 = vld [vmem:[#allocation13 + $0x28] sm:$0xff]  ;;  %v3553_v51 = vld [vmem:[#allocation9 + $0x4] sm:$0xf] }
 0x365   :  { %v3190_v16 = vmul.f32 -1.442695, %v2010_v13  ;;  %v2051_v22 = vadd.f32 %v1994_v10, %v1797_v9  ;;  %v3555_v9 = vld [vmem:[#allocation9 + $0x10] sm:$0xf0]  ;;  %v3562_v10 = vld [vmem:[#allocation9 + $0x4c] sm:$0xf] }
 0x366   :  { %2308 = vmatpush.bf16.msrb.mxu0 %v3229_v56  ;;  %v3205_v13 = vor.u32 %v3555_v9, %v3204_v12  ;;  %2487 = vmatpush.bf16.msra.mxu1 %v3353_v0  ;;  %v3237_v15 = vor.u32 %v3562_v10, %v3234_v1  ;;  %v3329_v56 = vor.u32 %v3587_v45, %v3328_v36  ;;  %v3589_v0 = vld [vmem:[#allocation10 + $0x64] sm:$0xf]  ;;  %v3304_v9 = vld [vmem:[#allocation10 + $0x18] sm:$0xf] }
 0x367   :  { %v3732_v34 = vpop.eup %3731  ;;  %3733 = vpow2.f32 %v3190_v16  ;;  %v3193_v32 = vmul.f32 -1.442695, %v2051_v22  ;;  %2282 = vmatpush.bf16.msrb.mxu2 %v3197_v50  ;;  %v3598_v16 = vld [vmem:[#allocation10 + $0xac] sm:$0xf]  ;;  %v3378_v22 = vld [vmem:[#allocation10 + $0xb4] sm:$0xf0] }
 0x368   :  { %v4574_v37 = vadd.f32 1.0, %v3732_v34  ;;  %v1979_v49 = vpop.f32.mrf.mxu3  ;;  %v3381_v18 = vor.u32 %v3598_v16, %v3378_v22  ;;  %2293 = vmatpush.bf16.msra.mxu3 %v3237_v15  ;;  %v3342_v50 = vld [vmem:[#allocation10 + $0x6c] sm:$0xf0] }
 0x369   :  { %3735 = vpow2.f32 %v3193_v32  ;;  %v1980_v41 = vadd.f32 %v1979_v49, %v1834_v62  ;;  %v3341_v32 = vor.u32 %v3590_v21, %v3340_v24  ;;  %v3384_v22 = vld [vmem:[#allocation10 + $0xb0] sm:$0xf]  ;;  %v3591_v24 = vld [vmem:[#allocation10 + $0x70] sm:$0xf0] }
 0x36a   :  { %3737 = vrcp.f32 %v4574_v37  ;;  %2309 = vmatpush.bf16.msrb.mxu0 %v3217_v63  ;;  %v3316_v63 = vld [vmem:[#allocation10 + $0x30] sm:$0xf]  ;;  %vm2065_vm12 = vweird.f32 %v4574_v37  ;;  %v2071_v48 = vand.u32 2147483648, %v4574_v37 }
 0x36b   :  { %v2011_v60 = vadd.f32 %v1980_v41, %v1796_v35  ;;  %2499 = vmatpush.bf16.msra.mxu2 %v3381_v18  ;;  %v3369_v35 = vor.u32 %v3595_v38, %v3366_v17  ;;  %v3615_v41 = vld [vmem:[#allocation13 + $0x30] sm:$0xff]  ;;  %2488 = vmatpush.bf16.msra.mxu1 %v3341_v32  ;;  %v3586_v17 = vld [vmem:[#allocation10 + $0x4c] sm:$0xf]  ;;  %v3348_v18 = vld [vmem:[#allocation10 + $0x68] sm:$0xf] }
 0x36c   :  { %2294 = vmatpush.bf16.msra.mxu3 %v3225_v28  ;;  %v3330_v28 = vld [vmem:[#allocation10 + $0x54] sm:$0xf0] }
 0x36d   :  { %v3734_v55 = vpop.eup %3733  ;;  %v3191_v57 = vmul.f32 -1.442695, %v2011_v60  ;;  %v3592_v60 = vld [vmem:[#allocation10 + $0x7c] sm:$0xf] }
 0x36e   :  { %v4577_v62 = vadd.f32 1.0, %v3734_v55  ;;  %2310 = vmatpush.bf16.msrb.mxu0 %v3205_v13  ;;  %v1781_v55 = vadd.f32 %v4556_v31, %v4552_v26  ;;  %v3357_v19 = vor.u32 %v3592_v60, %v3354_v54  ;;  %v3317_v26 = vor.u32 %v3584_v6, %v3316_v63  ;;  %v3198_v31 = vld [vmem:[#allocation9 + $0xc] sm:$0xf0]  ;;  %v3581_v13 = vld [vmem:[#allocation10 + $0x20] sm:$0xf0] }
 0x36f   :  { %v3736_v27 = vpop.eup %3735  ;;  %3739 = vpow2.f32 %v3191_v57  ;;  %v1836_v57 = vperm.slane %v4563_v44, 2  ;;  %2500 = vmatpush.bf16.msra.mxu2 %v3369_v35  ;;  %2489 = vmatpush.bf16.msra.mxu1 %v3329_v56  ;;  %v3201_v11 = vor.u32 %v3553_v51, %v3198_v31  ;;  %v3305_v38 = vor.u32 %v3581_v13, %v3304_v9  ;;  %v3372_v60 = vld [vmem:[#allocation10 + $0x98] sm:$0xf]  ;;  %v3318_v51 = vld [vmem:[#allocation10 + $0x3c] sm:$0xf0] }
 0x370   :  { %3741 = vrcp.f32 %v4577_v62  ;;  %v4580_v59 = vadd.f32 1.0, %v3736_v27  ;;  %v4582_v14 = vpop.eup %3737  ;;  %v2029_v4 = vand.u32 2147483647, %v4577_v62  ;;  %v2031_v27 = vand.u32 2147483648, %v4577_v62  ;;  %2295 = vmatpush.bf16.msra.mxu3 %v3213_v7  ;;  %v3612_v7 = vld [vmem:[#allocation13 + $0x18] sm:$0xff] }
 0x371   :  { %v2061_v58 = vmul.f32 %v4582_v14, %v4574_v37  ;;  %v1795_v1 = vadd.f32 %v1789_v52, %v1781_v55  ;;  %v2006_v15 = vadd.f32 %v2005_v5, %v1836_v57  ;;  %vm2025_vm8 = vweird.f32 %v4577_v62  ;;  %v3594_v9 = vld [vmem:[#allocation10 + $0x88] sm:$0xf0] }
 0x372   :  { %3743 = vrcp.f32 %v4580_v59  ;;  %2705 = vmatpush.bf16.msra.mxu0 %v3616_v23  ;;  %v3600_v23 = vld [vmem:[#allocation10 + $0xb8] sm:$0xf0]  ;;  %vm4621_vm10 = vcmp.eq.f32.partialorder %v2029_v4, 8.507059e+37  ;;  %v2032_v21 = vor.u32 1.1754944e-38, %v2031_v27  ;;  %vm2066_vm11 = vweird.f32 %v4582_v14  ;;  %v2007_v4 = vpop.f32.mrf.mxu1 }
 0x373   :  { %v2062_v53 = vsub.f32 1.0, %v2061_v58  ;;  %2501 = vmatpush.bf16.msra.mxu2 %v3357_v19  ;;  %2490 = vmatpush.bf16.msra.mxu1 %v3317_v26  ;;  %v3385_v36 = vor.u32 %v3600_v23, %v3384_v22  ;;  %vm4640_vm13 = vmor %vm2065_vm12, %vm2066_vm11  ;;  %v3333_v63 = vor.u32 %v3586_v17, %v3330_v28  ;;  %v2008_v13 = vadd.f32 %v2007_v4, %v1836_v57 }
 0x374   :  { %2296 = vmatpush.bf16.msra.mxu3 %v3201_v11  ;;  %vm2080_vm4 = vweird.f32 %v4580_v59  ;;  %v2084_v11 = vand.u32 2147483647, %v4580_v59 }
 0x375   :  { %v3740_v34 = vpop.eup %3739  ;;  %v2063_v10 = vmul.f32 %v4582_v14, %v2062_v53  ;;  %v3597_v53 = vld [vmem:[#allocation10 + $0xa0] sm:$0xf0] }
 0x376   :  { %v4587_v49 = vpop.eup %3741  ;;  %v4589_v25 = vadd.f32 1.0, %v3740_v34  ;;  %2706 = vmatpush.bf16.msra.mxu0 %v3615_v41  ;;  %v3345_v34 = vor.u32 %v3589_v0, %v3342_v50  ;;  %v3373_v31 = vor.u32 %v3597_v53, %v3372_v60  ;;  %v2072_v50 = vor.u32 1.1754944e-38, %v2071_v48  ;;  %v3585_v48 = vld [vmem:[#allocation10 + $0x40] sm:$0xf0] }
 0x377   :  { %v2021_v42 = vmul.f32 %v4587_v49, %v4577_v62  ;;  %vm2026_vm7 = vweird.f32 %v4587_v49  ;;  %v2064_v45 = vadd.f32 %v4582_v14, %v2063_v10  ;;  %2491 = vmatpush.bf16.msra.mxu1 %v3305_v38  ;;  %v3294_v38 = vld [vmem:[#allocation10 + $0xc] sm:$0xf0]  ;;  %vm2085_vm6 = vcmp.eq.f32.partialorder %v2084_v11, 8.507059e+37 }
 0x378   :  { %3745 = vrcp.f32 %v4589_v25  ;;  %v4595_v3 = vpop.eup %3743  ;;  %vm4617_vm9 = vmor %vm2025_vm8, %vm2026_vm7  ;;  %v2044_v54 = vand.u32 2147483647, %v4589_v25  ;;  %v2046_v55 = vand.u32 2147483648, %v4589_v25  ;;  %2502 = vmatpush.bf16.msra.mxu2 %v3345_v34  ;;  %2513 = vmatpush.bf16.msrb.mxu3 %v3385_v36  ;;  %vm2040_vm15 = vweird.f32 %v4589_v25  ;;  %v3336_v36 = vld [vmem:[#allocation10 + $0x50] sm:$0xf] }
 0x379   :  { %v2022_v61 = vsub.f32 1.0, %v2021_v42  ;;  %v2076_v12 = vmul.f32 %v4595_v3, %v4580_v59  ;;  %v3292_v42 = vld [vmem:[#allocation10] sm:$0xf]  ;;  %vm2081_vm3 = vweird.f32 %v4595_v3 }
 0x37a   :  { %2707 = vmatpush.bf16.msra.mxu0 %v3614_v8  ;;  %v3583_v8 = vld [vmem:[#allocation10 + $0x34] sm:$0xf]  ;;  %vm2045_vm2 = vcmp.eq.f32.partialorder %v2044_v54, 8.507059e+37  ;;  %vm4668_vm5 = vmor %vm2080_vm4, %vm2081_vm3 }
 0x37b   :  { %v2023_v2 = vmul.f32 %v4587_v49, %v2022_v61  ;;  %v2077_v35 = vsub.f32 1.0, %v2076_v12  ;;  %v2069_v61 = vand.u32 2147483647, %v4574_v37  ;;  %v2068_v37 = vsel %vm4640_vm13, %v4582_v14, %v2064_v45  ;;  %v3360_v12 = vld [vmem:[#allocation10 + $0x80] sm:$0xf] }
 0x37c   :  { %2503 = vmatpush.bf16.msra.mxu2 %v3333_v63  ;;  %2514 = vmatpush.bf16.msrb.mxu3 %v3373_v31  ;;  %v3588_v45 = vld [vmem:[#allocation10 + $0x58] sm:$0xf0]  ;;  %v3582_v63 = vld [vmem:[#allocation10 + $0x28] sm:$0xf0] }
 0x37d   :  { %v2024_v16 = vadd.f32 %v4587_v49, %v2023_v2  ;;  %v1783_v2 = vadd.f32 %v4558_v33, %v4554_v30  ;;  %v2078_v26 = vmul.f32 %v4595_v3, %v2077_v35  ;;  %v2047_v30 = vor.u32 1.1754944e-38, %v2046_v55 }
 0x37e   :  { %v4613_v58 = vpop.eup %3745  ;;  %2708 = vmatpush.bf16.msra.mxu0 %v3613_v40  ;;  %vm2070_vm1 = vcmp.eq.f32.partialorder %v2069_v61, 8.507059e+37  ;;  %v3321_v33 = vor.u32 %v3583_v8, %v3318_v51  ;;  %v3577_v40 = vld [vmem:[#allocation10 + $0x4] sm:$0xf]  ;;  %v3312_v61 = vld [vmem:[#allocation10 + $0x20] sm:$0xf] }
 0x37f   :  { %v2028_v62 = vsel %vm4617_vm9, %v4587_v49, %v2024_v16  ;;  %v2036_v32 = vmul.f32 %v4613_v58, %v4589_v25  ;;  %v3578_v49 = vld [vmem:[#allocation10 + $0x8] sm:$0xf0]  ;;  %vm2041_vm14 = vweird.f32 %v4613_v58  ;;  %v2073_v10 = vsel %vm2070_vm1, %v2072_v50, %v2068_v37  ;;  %v3611_v25 = vld [vmem:[#allocation13 + $0x10] sm:$0xff]  ;;  %v4697_v37 = vld [vmem:[%s4739_s14] sm:$0x7] }
 0x380   :  { %v2033_v41 = vsel %vm4621_vm10, %v2032_v21, %v2028_v62  ;;  %v3293_v19 = vor.u32 %v3578_v49, %v3292_v42  ;;  %vm2042_vm0 = vmor %vm2040_vm15, %vm2041_vm14  ;;  %v2079_v57 = vadd.f32 %v4595_v3, %v2078_v26  ;;  %v3361_v16 = vor.u32 %v3594_v9, %v3360_v12  ;;  %2504 = vmatpush.bf16.msra.mxu2 %v3321_v33  ;;  %v3606_v21 = vld [vmem:[#allocation12 + $0x28] sm:$0xff] }
 0x381   :  { %v2090_v56 = vmul.f32 %v2033_v41, %v2006_v15  ;;  %v2037_v47 = vsub.f32 1.0, %v2036_v32  ;;  %v3306_v15 = vld [vmem:[#allocation10 + $0x24] sm:$0xf0]  ;;  %v1798_v22 = vadd.f32 %v1789_v52, %v1783_v2  ;;  %v2096_v34 = vsub.f32 1.0, %v2073_v10 }
 0x382   :  { %2709 = vmatpush.bf16.msra.mxu0 %v3612_v7  ;;  %2492 = vmatpush.bf16.msra.mxu1 %v3293_v19  ;;  %v3610_v32 = vld [vmem:[#allocation13 + $0x8] sm:$0xff]  ;;  %v2083_v17 = vsel %vm4668_vm5, %v4595_v3, %v2079_v57  ;;  %v2100_v35 = vmul.f32 %v2073_v10, %v4543_v43  ;;  %v3297_v49 = vor.u32 %v3577_v40, %v3294_v38  ;;  %v3324_v43 = vld [vmem:[#allocation10 + $0x38] sm:$0xf]  ;;  %v3579_v19 = vld [vmem:[#allocation10 + $0x10] sm:$0xf0]  ;;  %v2141_v26 = vperm.slane %v4697_v37, 0 }
 0x383   :  { %v2092_v6 = vadd.f32 %v2090_v56, %v1795_v1  ;;  %v2038_v27 = vmul.f32 %v4613_v58, %v2037_v47  ;;  %v3580_v1 = vld [vmem:[#allocation10 + $0x1c] sm:$0xf]  ;;  %2515 = vmatpush.bf16.msrb.mxu3 %v3361_v16  ;;  %v3609_v47 = vld [vmem:[#allocation13] sm:$0xff]  ;;  %v3337_v3 = vor.u32 %v3588_v45, %v3336_v36  ;;  %v3325_v5 = vor.u32 %v3585_v48, %v3324_v43  ;;  %v3300_v7 = vld [vmem:[#allocation10 + $0x8] sm:$0xf] }
 0x384   :  { %v3309_v39 = vor.u32 %v3580_v1, %v3306_v15  ;;  %v3301_v8 = vor.u32 %v3579_v19, %v3300_v7  ;;  %v3608_v10 = vld [vmem:[#allocation12 + $0x38] sm:$0xff]  ;;  %v2142_v1 = vperm.slane %v4697_v37, 1 }
 0x385   :  { %3747 = vtanh.f32 %v2092_v6  ;;  %v2039_v0 = vadd.f32 %v4613_v58, %v2038_v27  ;;  %2493 = vmatmul.bf16.vlgmr.msra.gmra.mxu1 %v4208_v20  ;;  %v3313_v27 = vor.u32 %v3582_v63, %v3312_v61 }
 0x386   :  { %2710 = vmatpush.bf16.msra.mxu0 %v3611_v25  ;;  %2505 = vmatpush.bf16.msra.mxu2 %v3309_v39 }
 0x387   :  { %v2043_v14 = vsel %vm2042_vm0, %v4613_v58, %v2039_v0  ;;  %v2086_v58 = vand.u32 2147483648, %v4580_v59  ;;  %v3349_v59 = vor.u32 %v3591_v24, %v3348_v18  ;;  %2767 = vmatpush.bf16.msrb.mxu1 %v3608_v10 }
 0x388   :  { %v2048_v44 = vsel %vm2045_vm2, %v2047_v30, %v2043_v14 }
 0x389   :  { %v2091_v23 = vmul.f32 %v2048_v44, %v2008_v13  ;;  %v2087_v41 = vor.u32 1.1754944e-38, %v2086_v58  ;;  %2516 = vmatpush.bf16.msrb.mxu3 %v3349_v59 }
 0x38a   :  { %2711 = vmatpush.bf16.msra.mxu0 %v3610_v32  ;;  %2506 = vmatpush.bf16.msra.mxu2 %v3297_v49 }
 0x38b   :  { %v3748_v52 = vpop.eup %3747  ;;  %v2093_v62 = vadd.f32 %v2091_v23, %v1798_v22  ;;  %v2088_v56 = vsel %vm2085_vm6, %v2087_v41, %v2083_v17  ;;  %v3607_v22 = vld [vmem:[#allocation12 + $0x30] sm:$0xff] }
 0x38c   :  { %v2098_v28 = vmul.f32 %v3748_v52, %v2096_v34  ;;  %v2097_v60 = vsub.f32 1.0, %v2088_v56  ;;  %v2101_v55 = vmul.f32 %v2088_v56, %v4548_v46  ;;  %v4691_v46 = vld [vmem:[%s4740_s15] sm:$0x7]  ;;  %2768 = vmatpush.bf16.msrb.mxu1 %v3607_v22 }
 0x38d   :  { %3749 = vtanh.f32 %v2093_v62  ;;  %2517 = vmatpush.bf16.msrb.mxu3 %v3337_v3  ;;  %v2351_v2 = vperm.slane %v4691_v46, 0  ;;  %v2352_v44 = vperm.slane %v4691_v46, 1  ;;  %v3605_v62 = vld [vmem:[#allocation12 + $0x20] sm:$0xff] }
 0x38e   :  { %v2102_v42 = vadd.f32 %v2100_v35, %v2098_v28  ;;  %2712 = vmatpush.bf16.msra.mxu0 %v3609_v47  ;;  %v3604_v35 = vld [vmem:[#allocation12 + $0x18] sm:$0xff] }
 0x390   :  { %2104 = vst [vmem:[%s4745_s20] sm:$0xff] %v2102_v42  ;;  %2769 = vmatpush.bf16.msrb.mxu1 %v3606_v21 }
 0x391   :  { %2518 = vmatpush.bf16.msrb.mxu3 %v3325_v5 }
 0x393   :  { %v3750_v53 = vpop.eup %3749 }
 0x394   :  { %v2099_v54 = vmul.f32 %v3750_v53, %v2097_v60  ;;  %2770 = vmatpush.bf16.msrb.mxu1 %v3605_v62  ;;  %v3603_v60 = vld [vmem:[#allocation12 + $0x10] sm:$0xff] }
 0x395   :  { %2519 = vmatpush.bf16.msrb.mxu3 %v3313_v27  ;;  %v3602_v27 = vld [vmem:[#allocation12 + $0x8] sm:$0xff] }
 0x396   :  { %v2103_v6 = vadd.f32 %v2101_v55, %v2099_v54 }
 0x398   :  { %2105 = vst [vmem:[%s4745_s20 + $0x8] sm:$0xff] %v2103_v6  ;;  %v2106_v4 = vpack.c.bf16 %v2103_v6, %v2102_v42  ;;  %v2353_v42 = vperm.slane %v4691_v46, 2  ;;  %2771 = vmatpush.bf16.msrb.mxu1 %v3604_v35 }
 0x399   :  { %2520 = vmatpush.bf16.msrb.mxu3 %v3301_v8 }
 0x39a   :  { %2283 = vmatmul.bf16.vlgmr.msrb.gmra.mxu2 %v2106_v4  ;;  %2297 = vmatmul.bf16.vlgmr.msra.gmra.mxu3 %v2106_v4 }
 0x39b   :  { %2311 = vmatmul.bf16.vlgmr.msrb.gmra.mxu0 %v2106_v4  ;;  %v2143_v4 = vperm.slane %v4697_v37, 2 }
 0x39c   :  { %2772 = vmatpush.bf16.msrb.mxu1 %v3603_v60 }
 0x3a0   :  { %2773 = vmatpush.bf16.msrb.mxu1 %v3602_v27 }
 0x3aa   :  { %2507 = vmatmul.bf16.vlgmr.msra.gmra.mxu2 %v4208_v20  ;;  %2521 = vmatmul.bf16.vlgmr.msrb.gmra.mxu3 %v4208_v20 }
 0x3ab   :  { %2713 = vmatmul.bf16.vlgmr.msra.gmra.mxu0 %v4527_v29 }
 0x402   :  { %v2494_v51 = vpop.f32.mrf.mxu1 }
 0x403   :  { %v2495_v31 = vadd.f32 %v2494_v51, %v2351_v2 }
 0x40a   :  { %v2496_v29 = vpop.f32.mrf.mxu1 }
 0x40b   :  { %v2497_v9 = vadd.f32 %v2496_v29, %v2351_v2 }
 0x418   :  { %v2312_v61 = vpop.f32.mrf.mxu0 }
 0x41d   :  { %v2284_v0 = vpop.f32.mrf.mxu2  ;;  %v2298_v30 = vpop.f32.mrf.mxu3 }
 0x41e   :  { %v2285_v20 = vadd.f32 %v2284_v0, %v2141_v26  ;;  %v2299_v23 = vadd.f32 %v2298_v30, %v2142_v1  ;;  %v2313_v0 = vadd.f32 %v2312_v61, %v2143_v4 }
 0x420   :  { %v2527_v50 = vadd.f32 %v2495_v31, %v2285_v20  ;;  %v2314_v10 = vpop.f32.mrf.mxu0 }
 0x422   :  { %v3386_v12 = vmul.f32 -1.442695, %v2527_v50  ;;  %v3601_v50 = vld [vmem:[#allocation12] sm:$0xff] }
 0x423   :  { %2774 = vmatpush.bf16.msrb.mxu1 %v3601_v50 }
 0x424   :  { %3751 = vpow2.f32 %v3386_v12 }
 0x425   :  { %v2286_v13 = vpop.f32.mrf.mxu2  ;;  %v2300_v18 = vpop.f32.mrf.mxu3 }
 0x426   :  { %v2287_v33 = vadd.f32 %v2286_v13, %v2141_v26  ;;  %v2301_v38 = vadd.f32 %v2300_v18, %v2142_v1 }
 0x428   :  { %v2528_v14 = vadd.f32 %v2497_v9, %v2287_v33 }
 0x42a   :  { %v3752_v25 = vpop.eup %3751  ;;  %v3387_v15 = vmul.f32 -1.442695, %v2528_v14 }
 0x42b   :  { %v2535_v57 = vadd.f32 1.0, %v3752_v25 }
 0x42c   :  { %3753 = vpow2.f32 %v3387_v15 }
 0x42d   :  { %3755 = vrcp.f32 %v2535_v57  ;;  %v2508_v16 = vpop.f32.mrf.mxu2  ;;  %v2522_v41 = vpop.f32.mrf.mxu3  ;;  %v2548_v45 = vand.u32 2147483648, %v2535_v57  ;;  %v2546_v49 = vand.u32 2147483647, %v2535_v57  ;;  %vm2542_vm8 = vweird.f32 %v2535_v57 }
 0x42e   :  { %v2509_v58 = vadd.f32 %v2508_v16, %v2352_v44  ;;  %v2523_v5 = vadd.f32 %v2522_v41, %v2353_v42  ;;  %v2315_v16 = vadd.f32 %v2314_v10, %v2143_v4 }
 0x42f   :  { %v2549_v54 = vor.u32 1.1754944e-38, %v2548_v45  ;;  %vm2547_vm10 = vcmp.eq.f32.partialorder %v2546_v49, 8.507059e+37 }
 0x430   :  { %v2567_v24 = vadd.f32 %v2509_v58, %v2299_v23 }
 0x432   :  { %v3754_v11 = vpop.eup %3753  ;;  %v3388_v34 = vmul.f32 -1.442695, %v2567_v24 }
 0x433   :  { %v3756_v39 = vpop.eup %3755  ;;  %v2536_v52 = vadd.f32 1.0, %v3754_v11 }
 0x434   :  { %3757 = vpow2.f32 %v3388_v34  ;;  %v2538_v32 = vmul.f32 %v3756_v39, %v2535_v57  ;;  %vm2543_vm7 = vweird.f32 %v3756_v39 }
 0x435   :  { %3759 = vrcp.f32 %v2536_v52  ;;  %v2510_v40 = vpop.f32.mrf.mxu2  ;;  %vm2544_vm9 = vmor %vm2542_vm8, %vm2543_vm7  ;;  %v2563_v19 = vand.u32 2147483648, %v2536_v52  ;;  %v2561_v46 = vand.u32 2147483647, %v2536_v52  ;;  %v2524_v2 = vpop.f32.mrf.mxu3  ;;  %vm2557_vm12 = vweird.f32 %v2536_v52 }
 0x436   :  { %v2511_v17 = vadd.f32 %v2510_v40, %v2352_v44  ;;  %v2539_v28 = vsub.f32 1.0, %v2538_v32  ;;  %v2525_v13 = vadd.f32 %v2524_v2, %v2353_v42  ;;  %v3787_v40 = vld [vmem:[%s4757_s24 + $0x10] sm:$0xff] }
 0x437   :  { %v2564_v37 = vor.u32 1.1754944e-38, %v2563_v19  ;;  %vm2562_vm14 = vcmp.eq.f32.partialorder %v2561_v46, 8.507059e+37 }
 0x438   :  { %v2568_v59 = vadd.f32 %v2511_v17, %v2301_v38  ;;  %v2540_v36 = vmul.f32 %v3756_v39, %v2539_v28 }
 0x43a   :  { %v3758_v56 = vpop.eup %3757  ;;  %v3389_v47 = vmul.f32 -1.442695, %v2568_v59  ;;  %v2541_v3 = vadd.f32 %v3756_v39, %v2540_v36 }
 0x43b   :  { %v3760_v43 = vpop.eup %3759  ;;  %v2575_v48 = vadd.f32 1.0, %v3758_v56 }
 0x43c   :  { %3761 = vpow2.f32 %v3389_v47  ;;  %v2545_v53 = vsel %vm2544_vm9, %v3756_v39, %v2541_v3  ;;  %v2553_v55 = vmul.f32 %v3760_v43, %v2536_v52  ;;  %vm2558_vm11 = vweird.f32 %v3760_v43 }
 0x43d   :  { %3763 = vrcp.f32 %v2575_v48  ;;  %v2550_v63 = vsel %vm2547_vm10, %v2549_v54, %v2545_v53  ;;  %vm2559_vm13 = vmor %vm2557_vm12, %vm2558_vm11  ;;  %v2588_v14 = vand.u32 2147483648, %v2575_v48  ;;  %v2586_v1 = vand.u32 2147483647, %v2575_v48 }
 0x43e   :  { %v2554_v6 = vsub.f32 1.0, %v2553_v55  ;;  %v2607_v8 = vmul.f32 %v2550_v63, %v2523_v5  ;;  %vm2582_vm0 = vweird.f32 %v2575_v48 }
 0x43f   :  { %v2589_v22 = vor.u32 1.1754944e-38, %v2588_v14  ;;  %vm2587_vm2 = vcmp.eq.f32.partialorder %v2586_v1, 8.507059e+37 }
 0x440   :  { %v2555_v7 = vmul.f32 %v3760_v43, %v2554_v6  ;;  %v2609_v9 = vadd.f32 %v2607_v8, %v2313_v0 }
 0x442   :  { %v3762_v51 = vpop.eup %3761  ;;  %v2556_v26 = vadd.f32 %v3760_v43, %v2555_v7 }
 0x443   :  { %v3764_v31 = vpop.eup %3763  ;;  %v2576_v20 = vadd.f32 1.0, %v3762_v51 }
 0x444   :  { %v2578_v29 = vmul.f32 %v3764_v31, %v2575_v48  ;;  %v2560_v12 = vsel %vm2559_vm13, %v3760_v43, %v2556_v26  ;;  %vm2583_vm15 = vweird.f32 %v3764_v31  ;;  %v2714_v43 = vpop.f32.mrf.mxu0  ;;  %v3634_v48 = vld [vmem:[%s4743_s18] ss:$0 sm:$0xff] }
 0x445   :  { %3765 = vrcp.f32 %v2576_v20  ;;  %v2565_v33 = vsel %vm2562_vm14, %v2564_v37, %v2560_v12  ;;  %vm2584_vm1 = vmor %vm2582_vm0, %vm2583_vm15  ;;  %v2601_v39 = vand.u32 2147483647, %v2576_v20  ;;  %v2603_v52 = vand.u32 2147483648, %v2576_v20 }
 0x446   :  { %v2579_v30 = vsub.f32 1.0, %v2578_v29  ;;  %3767 = vtanh.f32 %v2609_v9  ;;  %v2608_v15 = vmul.f32 %v2565_v33, %v2525_v13  ;;  %vm2597_vm4 = vweird.f32 %v2576_v20 }
 0x447   :  { %v2604_v35 = vor.u32 1.1754944e-38, %v2603_v52  ;;  %vm2602_vm6 = vcmp.eq.f32.partialorder %v2601_v39, 8.507059e+37 }
 0x448   :  { %v2580_v25 = vmul.f32 %v3764_v31, %v2579_v30  ;;  %v2610_v18 = vadd.f32 %v2608_v15, %v2315_v16 }
 0x44a   :  { %v2581_v44 = vadd.f32 %v3764_v31, %v2580_v25  ;;  %3769 = vtanh.f32 %v2610_v18 }
 0x44b   :  { %v3766_v57 = vpop.eup %3765 }
 0x44c   :  { %v2593_v23 = vmul.f32 %v3766_v57, %v2576_v20  ;;  %v2585_v58 = vsel %vm2584_vm1, %v3764_v31, %v2581_v44  ;;  %v3768_v34 = vpop.eup %3767  ;;  %vm2598_vm3 = vweird.f32 %v3766_v57  ;;  %v2716_v55 = vpop.f32.mrf.mxu0 }
 0x44d   :  { %v2590_v24 = vsel %vm2587_vm2, %v2589_v22, %v2585_v58  ;;  %vm2599_vm5 = vmor %vm2597_vm4, %vm2598_vm3 }
 0x44e   :  { %v2594_v21 = vsub.f32 1.0, %v2593_v23  ;;  %v2613_v11 = vsub.f32 1.0, %v2590_v24  ;;  %v2617_v38 = vmul.f32 %v3787_v40, %v2590_v24 }
 0x450   :  { %v2595_v62 = vmul.f32 %v3766_v57, %v2594_v21  ;;  %v2615_v32 = vmul.f32 %v3768_v34, %v2613_v11  ;;  %v3770_v45 = vpop.eup %3769 }
 0x452   :  { %v2596_v17 = vadd.f32 %v3766_v57, %v2595_v62  ;;  %v2619_v28 = vadd.f32 %v2617_v38, %v2615_v32 }
 0x454   :  { %v2600_v59 = vsel %vm2599_vm5, %v3766_v57, %v2596_v17  ;;  %3390 = vst [vmem:[%s4745_s20 + $0x10] sm:$0xff] %v2619_v28 }
 0x455   :  { %v2605_v41 = vsel %vm2602_vm6, %v2604_v35, %v2600_v59 }
 0x456   :  { %v2614_v36 = vsub.f32 1.0, %v2605_v41 }
 0x458   :  { %v2616_v42 = vmul.f32 %v3770_v45, %v2614_v36 }
 0x45b   :  { %v3788_v49 = vld [vmem:[%s4757_s24 + $0x18] sm:$0xff] }
 0x45c   :  { %v2618_v56 = vmul.f32 %v3788_v49, %v2605_v41 }
 0x45e   :  { %v2620_v47 = vadd.f32 %v2618_v56, %v2616_v42 }
 0x460   :  { %3391 = vst [vmem:[%s4745_s20 + $0x18] sm:$0xff] %v2620_v47  ;;  %v2624_v3 = vpack.c.bf16 %v2620_v47, %v2619_v28 }
 0x462   :  { %2775 = vmatmul.bf16.vlgmr.msrb.gmra.mxu1 %v2624_v3 }
 0x4df   :  { %v2776_v60 = vpop.f32.mrf.mxu1 }
 0x4e0   :  { %v2777_v53 = vadd.f32 %v2776_v60, %v2714_v43 }
 0x4e2   :  { %v2785_v54 = vadd.f32 %v3634_v48, %v2777_v53 }
 0x4e4   :  { %2787 = vst [vmem:[%s4744_s19] sm:$0xff] %v2785_v54 }
 0x4e7   :  { %v2778_v5 = vpop.f32.mrf.mxu1 }
 0x4e8   :  { %v2779_v61 = vadd.f32 %v2778_v5, %v2716_v55 }
 0x4ea   :  { %v2786_v63 = vadd.f32 %v3634_v48, %v2779_v61 }
 0x4ec   :  { %2788 = vst [vmem:[%s4744_s19 + $0x8] sm:$0xff] %v2786_v63 }
 0x4ed   :  { %2797 = vsyncpa [#allocation3], 1 }
 0x4ee   :  { %2798 = vsyncpa [#allocation5], 1 }
 0x4ef   :  { %2799 = vsyncpa [#allocation8], 1 }
 0x4f0   :  { %2800 = vsyncpa [#allocation11], 1 }
 0x4f1   :  { %2801 = vsyncpa [#allocation14], 1 }

</bundles_post_ra>
